<compile_context>
chip_gen: v7x
topology: tpu7x:2x2x1
jax: 0.10.0
libtpu: 0.0.40
codegen_flags: <defaults>
</compile_context>

<pallas_src>
import numpy as np
import jax
import jax.numpy as jnp
from jax.experimental import pallas as pl
from jax.experimental.pallas import tpu as pltpu

EPS = 1e-5


def _round_up(x, m):
    return ((x + m - 1) // m) * m


def _vmem_limit_bytes():
    """Scoped-VMEM budget gated per chip generation."""
    phys = 64 * 1024 * 1024
    try:
        info = pltpu.get_tpu_info()
        phys = int(getattr(info, "vmem_capacity_bytes", phys))
    except Exception:
        pass
    # <= ~48 MiB on v7x (64 MiB physical), up to 96 MiB on v5e/v6e (128 MiB).
    return max(32 * 1024 * 1024, min(3 * phys // 4, 96 * 1024 * 1024))


def _pick_tile(P):
    """Largest row tile (multiple of 8) dividing P, preferring >= 2 grid steps."""
    for t in (1024, 512, 256, 128, 64, 32, 16, 8):
        if P % t == 0 and P // t >= 2:
            return t
    for t in (1024, 512, 256, 128, 64, 32, 16, 8):
        if P % t == 0:
            return t
    return P


# ---------------------------------------------------------------------------
# Kernel A: fused BN1 (precomputed scale/shift) -> ReLU -> 1x1 conv as ONE
# K>=128 MXU matmul on the lane-dense feature buffer.  Also emits per-tile
# (sum, sum^2) partials of z for BN2, so z is never re-read for statistics.
# ---------------------------------------------------------------------------
def _stage_a_kernel(buf_ref, sc_ref, sh_ref, w1_ref, z_ref, stats_ref):
    # buf_ref : (TILE_P, K)   bf16  lane-dense feature buffer prefix
    # sc/sh   : (1, K)        f32   BN1 scale/shift (zero beyond valid channels)
    # w1_ref  : (K, Cbp)      bf16  zero-padded 1x1 conv weights
    # z_ref   : (TILE_P, Cbp) bf16  bottleneck output (lane dense)
    # stats   : (1, 8, Cbp)   f32   rows 0/1 = per-tile sum / sum-of-squares
    y1 = jnp.maximum(
        buf_ref[...].astype(jnp.float32) * sc_ref[...] + sh_ref[...], 0.0)
    acc = jnp.dot(y1.astype(jnp.bfloat16), w1_ref[...],
                  preferred_element_type=jnp.float32)
    z_ref[...] = acc.astype(z_ref.dtype)
    s1 = jnp.sum(acc, axis=0, keepdims=True)
    s2 = jnp.sum(acc * acc, axis=0, keepdims=True)
    row = jax.lax.broadcasted_iota(jnp.int32, (8, acc.shape[-1]), 0)
    stats = jnp.where(row == 0, s1, jnp.where(row == 1, s2, 0.0))
    stats_ref[...] = stats.reshape(stats_ref.shape)


# ---------------------------------------------------------------------------
# Kernel B: BN2 + ReLU + 3x3 conv (padding=1) as 9 accumulated MXU matmuls
# over shifted views of an (8,128)-aligned zero-halo VMEM scratch.  Output
# channels are padded to Gp>=128 so the store / MXU N-dim are lane dense.
# Also emits per-image (sum, sum^2) partials of the new features for the next
# layer's BN1.  One image per grid step.
# ---------------------------------------------------------------------------
def _make_stage_b_kernel(H, W, Wp):
    def kernel(z_ref, sc_ref, sh_ref, w2_ref, f_ref, stats_ref, zp):
        # z_ref : (H*W, Cbp) bf16   sc/sh : (1, Cbp) f32
        # w2    : (9, Cbp, Gp) bf16 f_ref : (H*W, Gp) bf16
        # stats : (1, 8, Gp) f32    zp    : (H+2, Wp, Cbp) f32 halo scratch
        Cbp = z_ref.shape[-1]
        Gp = f_ref.shape[-1]

        # Re-zero only the halo border (aligned 8-wide stores); the interior is
        # fully overwritten below.
        zrow = jnp.zeros((Wp, Cbp), zp.dtype)
        zcol = jnp.zeros((H, 8, Cbp), zp.dtype)
        zp[0, :, :] = zrow
        zp[H + 1, :, :] = zrow
        zp[1:H + 1, 0:8, :] = zcol
        zp[1:H + 1, Wp - 8:Wp, :] = zcol

        y2 = jnp.maximum(
            z_ref[...].astype(jnp.float32) * sc_ref[...] + sh_ref[...], 0.0)
        zp[1:H + 1, 1:W + 1, :] = y2.reshape(H, W, Cbp)

        acc = jnp.zeros((H * W, Gp), jnp.float32)
        for kh in range(3):
            for kw in range(3):
                patch = zp[kh:kh + H, kw:kw + W, :].reshape(H * W, Cbp)
                acc = acc + jnp.dot(patch.astype(jnp.bfloat16),
                                    w2_ref[kh * 3 + kw],
                                    preferred_element_type=jnp.float32)
        f_ref[...] = acc.astype(f_ref.dtype)
        s1 = jnp.sum(acc, axis=0, keepdims=True)
        s2 = jnp.sum(acc * acc, axis=0, keepdims=True)
        row = jax.lax.broadcasted_iota(jnp.int32, (8, Gp), 0)
        stats = jnp.where(row == 0, s1, jnp.where(row == 1, s2, 0.0))
        stats_ref[...] = stats.reshape(stats_ref.shape)

    return kernel


def _torch_to_buffer_perm(l, Cin, G):
    """Torch channel order [f_{l-1},...,f_0,x] -> buffer order [x,f_0,...,f_{l-1}]."""
    idx = list(range(l * G, l * G + Cin))          # x block
    for m in range(l):                             # f_0 ... f_{l-1}
        start = (l - 1 - m) * G
        idx.extend(range(start, start + G))
    return np.asarray(idx, dtype=np.int32)


# ---------------------------------------------------------------------------
# Per-layer wrapper
# ---------------------------------------------------------------------------
def _dense_layer(buf, sum1, sumsq1, params, l, N, H, W, Cin, G, C_pad,
                 vmem_limit):
    w1, g1, b1, g2, b2, w2 = params
    P = N * H * W
    HW = H * W
    Cin_l = Cin + l * G                 # real input channels this layer
    Cb = w1.shape[1]
    Cbp = _round_up(Cb, 128)
    Gp = _round_up(G, 128)
    K_l = min(_round_up(Cin_l, 128), C_pad)
    off = Cin + l * G                   # column offset of this layer's output

    # Reorder torch-ordered params to the buffer channel order.
    perm = _torch_to_buffer_perm(l, Cin, G)
    g1b, b1b, w1b = g1[perm], b1[perm], w1[perm, :]

    # ---- BN1 scale/shift from running per-channel sums (no HBM re-read) ----
    mean1 = sum1 / P
    var1 = jnp.maximum(sumsq1 / P - mean1 * mean1, 0.0)
    g1p = jnp.zeros((C_pad,), jnp.float32).at[:Cin_l].set(g1b)
    b1p = jnp.zeros((C_pad,), jnp.float32).at[:Cin_l].set(b1b)
    scale1 = g1p * jax.lax.rsqrt(var1 + EPS)
    shift1 = b1p - mean1 * scale1
    sc1 = scale1[None, :K_l]
    sh1 = shift1[None, :K_l]

    # Zero-padded bf16 1x1 weights: rows -> K_l, cols -> Cbp.
    w1p = jnp.zeros((K_l, Cbp), jnp.bfloat16).at[:Cin_l, :Cb].set(
        w1b.astype(jnp.bfloat16))

    TILE_P = _pick_tile(P)
    n_tiles = P // TILE_P

    z, zstats = pl.pallas_call(
        _stage_a_kernel,
        out_shape=(jax.ShapeDtypeStruct((P, Cbp), jnp.bfloat16),
                   jax.ShapeDtypeStruct((n_tiles, 8, Cbp), jnp.float32)),
        grid=(n_tiles,),
        in_specs=[
            pl.BlockSpec((TILE_P, K_l), lambda i: (i, 0)),
            pl.BlockSpec((1, K_l), lambda i: (0, 0)),
            pl.BlockSpec((1, K_l), lambda i: (0, 0)),
            pl.BlockSpec((K_l, Cbp), lambda i: (0, 0)),
        ],
        out_specs=(pl.BlockSpec((TILE_P, Cbp), lambda i: (i, 0)),
                   pl.BlockSpec((1, 8, Cbp), lambda i: (i, 0, 0))),
        compiler_params=pltpu.CompilerParams(
            dimension_semantics=("parallel",),
            vmem_limit_bytes=vmem_limit),
        cost_estimate=pl.CostEstimate(
            flops=2 * P * K_l * Cbp,
            transcendentals=0,
            bytes_accessed=2 * (P * K_l + P * Cbp + K_l * Cbp)),
    )(buf, sc1, sh1, w1p)

    # ---- BN2 scale/shift from Stage A's partial sums ------------------------
    zsum = jnp.sum(zstats, axis=0)                   # (8, Cbp)
    mean2 = zsum[0] / P
    var2 = jnp.maximum(zsum[1] / P - mean2 * mean2, 0.0)
    g2p = jnp.zeros((Cbp,), jnp.float32).at[:Cb].set(g2)
    b2p = jnp.zeros((Cbp,), jnp.float32).at[:Cb].set(b2)
    scale2 = g2p * jax.lax.rsqrt(var2 + EPS)
    shift2 = b2p - mean2 * scale2
    sc2 = scale2[None, :]
    sh2 = shift2[None, :]

    # Zero-padded bf16 3x3 weights: (3,3,Cb,G) -> (9, Cbp, Gp).
    w2p = jnp.zeros((9, Cbp, Gp), jnp.bfloat16).at[:, :Cb, :G].set(
        w2.astype(jnp.bfloat16).reshape(9, Cb, G))

    Wp = _round_up(W + 2, 8)
    f_new, fstats = pl.pallas_call(
        _make_stage_b_kernel(H, W, Wp),
        out_shape=(jax.ShapeDtypeStruct((P, Gp), jnp.bfloat16),
                   jax.ShapeDtypeStruct((N, 8, Gp), jnp.float32)),
        grid=(N,),
        in_specs=[
            pl.BlockSpec((HW, Cbp), lambda n: (n, 0)),
            pl.BlockSpec((1, Cbp), lambda n: (0, 0)),
            pl.BlockSpec((1, Cbp), lambda n: (0, 0)),
            pl.BlockSpec((9, Cbp, Gp), lambda n: (0, 0, 0)),
        ],
        out_specs=(pl.BlockSpec((HW, Gp), lambda n: (n, 0)),
                   pl.BlockSpec((1, 8, Gp), lambda n: (n, 0, 0))),
        scratch_shapes=[pltpu.VMEM((H + 2, Wp, Cbp), jnp.float32)],
        compiler_params=pltpu.CompilerParams(
            dimension_semantics=("parallel",),
            vmem_limit_bytes=vmem_limit),
        cost_estimate=pl.CostEstimate(
            flops=2 * P * 9 * Cbp * Gp,
            transcendentals=0,
            bytes_accessed=2 * (P * Cbp + P * Gp + 9 * Cbp * Gp)),
    )(z, sc2, sh2, w2p)

    # ---- merge the G new channels into the wide feature buffer --------------
    # (dynamic_update_slice on a dead operand is performed in place by XLA)
    buf = jax.lax.dynamic_update_slice(buf, f_new[:, :G], (0, off))
    fsum = jnp.sum(fstats, axis=0)                   # (8, Gp)
    sum1 = jax.lax.dynamic_update_slice(sum1, fsum[0, :G], (off,))
    sumsq1 = jax.lax.dynamic_update_slice(sumsq1, fsum[1, :G], (off,))
    return buf, sum1, sumsq1


def dense_block(x_nchw, layer_params):
    N, Cin, H, W = x_nchw.shape
    P = N * H * W
    L = len(layer_params)
    G = layer_params[0][5].shape[-1]
    C_tot = Cin + L * G
    C_pad = _round_up(C_tot, 128)
    assert (H * W) % 8 == 0, "H*W must be a multiple of 8 for TPU block tiling"
    vmem_limit = _vmem_limit_bytes()

    # NCHW (PyTorch) -> flattened NHWC rows in a lane-dense 128-padded bf16
    # buffer, channel order [x | f0 | f1 | ...].
    x_flat = jnp.transpose(x_nchw, (0, 2, 3, 1)).reshape(P, Cin)
    buf = jnp.zeros((P, C_pad), jnp.bfloat16)
    buf = jax.lax.dynamic_update_slice(buf, x_flat.astype(jnp.bfloat16), (0, 0))

    # Running per-channel (sum, sum^2) for BN1.  x's stats are computed once
    # here; each layer's new channels get theirs from the Stage B kernel.
    sum1 = jnp.zeros((C_pad,), jnp.float32).at[:Cin].set(jnp.sum(x_flat, axis=0))
    sumsq1 = jnp.zeros((C_pad,), jnp.float32).at[:Cin].set(
        jnp.sum(x_flat * x_flat, axis=0))

    for l, params in enumerate(layer_params):
        buf, sum1, sumsq1 = _dense_layer(buf, sum1, sumsq1, params, l, N, H, W,
                                         Cin, G, C_pad, vmem_limit)

    # Assemble the output in torch order [f_{L-1}, ..., f_0, x]; x passes
    # through at full f32 precision.
    pieces = []
    for l in reversed(range(L)):
        off = Cin + l * G
        chunk = buf[:, off:off + G].astype(jnp.float32)
        pieces.append(jnp.transpose(chunk.reshape(N, H, W, G), (0, 3, 1, 2)))
    pieces.append(x_nchw)
    return jnp.concatenate(pieces, axis=1)


# ---------------------------------------------------------------------------
# Parameter init (deterministic, matches nn.Module __init__ shapes)
# ---------------------------------------------------------------------------
def init_dense_block_params(key, in_channels, num_layers, bn_size, growth_rate):
    params = []
    Cb = bn_size * growth_rate
    for layer_idx in range(num_layers):
        cin = in_channels + layer_idx * growth_rate
        key, k1, k2 = jax.random.split(key, 3)
        # Conv2d(cin, Cb, 1, bias=False): torch [Cb, cin, 1, 1] -> [cin, Cb]
        w1 = jax.random.normal(k1, (cin, Cb), jnp.float32) * 0.1
        # Conv2d(Cb, G, 3, padding=1, bias=False): torch [G, Cb, 3, 3] -> HWIO
        w2 = jax.random.normal(k2, (3, 3, Cb, growth_rate), jnp.float32) * 0.1
        g1 = jnp.ones((cin,), jnp.float32)
        b1 = jnp.zeros((cin,), jnp.float32)
        g2 = jnp.ones((Cb,), jnp.float32)
        b2 = jnp.zeros((Cb,), jnp.float32)
        params.append((w1, g1, b1, g2, b2, w2))
    return params


# ---------------------------------------------------------------------------
# Pure-JAX f32 reference (for correctness check)
# ---------------------------------------------------------------------------
def _ref_dense_layer(x_nhwc, params):
    w1, g1, b1, g2, b2, w2 = params
    mean1 = jnp.mean(x_nhwc, axis=(0, 1, 2))
    var1 = jnp.mean((x_nhwc - mean1) ** 2, axis=(0, 1, 2))
    y1 = jnp.maximum((x_nhwc - mean1) / jnp.sqrt(var1 + EPS) * g1 + b1, 0.0)
    z = jnp.einsum('nhwc,cd->nhwd', y1, w1)
    mean2 = jnp.mean(z, axis=(0, 1, 2))
    var2 = jnp.mean((z - mean2) ** 2, axis=(0, 1, 2))
    y2 = jnp.maximum((z - mean2) / jnp.sqrt(var2 + EPS) * g2 + b2, 0.0)
    conv = jax.lax.conv_general_dilated(
        y2, w2, window_strides=(1, 1), padding='SAME',
        dimension_numbers=('NHWC', 'HWIO', 'NHWC'))
    return jnp.concatenate([conv, x_nhwc], axis=-1)


def _ref_dense_block(x_nchw, layer_params):
    x = jnp.transpose(x_nchw, (0, 2, 3, 1))
    for p in layer_params:
        x = _ref_dense_layer(x, p)
    return jnp.transpose(x, (0, 3, 1, 2))


# ---------------------------------------------------------------------------
if __name__ == "__main__":
    in_channels, num_layers, bn_size, growth_rate = 4, 2, 2, 4
    N, H, W = 2, 16, 16

    key = jax.random.PRNGKey(0)
    kx, kp = jax.random.split(key)
    x = jax.random.normal(kx, (N, in_channels, H, W), jnp.float32)   # NCHW
    params = init_dense_block_params(kp, in_channels, num_layers, bn_size,
                                     growth_rate)

    out = jax.block_until_ready(jax.jit(dense_block)(x, params))

    expected_c = in_channels + num_layers * growth_rate
    assert out.shape == (N, expected_c, H, W), out.shape

    ref = jax.block_until_ready(_ref_dense_block(x, params))
    max_err = float(jnp.max(jnp.abs(out - ref)))
    # bf16 MXU operands + bf16 HBM storage of the concat/bottleneck
    # intermediates -> looser tolerance than the old all-f32 path.
    assert jnp.allclose(out, ref, rtol=5e-2, atol=1e-1), max_err

    print("KERNEL_OK")
</pallas_src>

<mosaic_0001>
module attributes {stable_mosaic.version = 11 : i64} {
  func.func @_stage_a_kernel(%arg0: i32, %arg1: memref<256x128xbf16, #tpu.memory_space<vmem>>, %arg2: memref<1x128xf32, #tpu.memory_space<vmem>>, %arg3: memref<1x128xf32, #tpu.memory_space<vmem>>, %arg4: memref<128x128xbf16, #tpu.memory_space<vmem>>, %arg5: memref<256x128xbf16, #tpu.memory_space<vmem>>, %arg6: memref<1x8x128xf32, #tpu.memory_space<vmem>>) attributes {dimension_semantics = [#tpu.dimension_semantics<parallel>], iteration_bounds = array<i64: 2>, scalar_prefetch = 0 : i64, scratch_operands = 0 : i64, tpu.core_type = #tpu.core_type<tc>, window_params = [{transform_indices = @transform_0, window_bounds = array<i64: 256, 128>}, {pipeline_mode = #tpu.pipeline_mode<synchronous>, transform_indices = @transform_1, window_bounds = array<i64: 1, 128>}, {pipeline_mode = #tpu.pipeline_mode<synchronous>, transform_indices = @transform_2, window_bounds = array<i64: 1, 128>}, {pipeline_mode = #tpu.pipeline_mode<synchronous>, transform_indices = @transform_3, window_bounds = array<i64: 128, 128>}, {transform_indices = @transform_4, window_bounds = array<i64: 256, 128>}, {transform_indices = @transform_5, window_bounds = array<i64: 1, 8, 128>}]} {
    %c0 = arith.constant 0 : index
    %c0_0 = arith.constant 0 : index
    %0 = vector.load %arg1[%c0, %c0_0] : memref<256x128xbf16, #tpu.memory_space<vmem>>, vector<256x128xbf16>
    %1 = arith.extf %0 : vector<256x128xbf16> to vector<256x128xf32>
    %c0_1 = arith.constant 0 : index
    %c0_2 = arith.constant 0 : index
    %2 = vector.load %arg2[%c0_1, %c0_2] : memref<1x128xf32, #tpu.memory_space<vmem>>, vector<1x128xf32>
    %3 = vector.broadcast %2 : vector<1x128xf32> to vector<256x128xf32>
    %4 = arith.mulf %1, %3 : vector<256x128xf32>
    %c0_3 = arith.constant 0 : index
    %c0_4 = arith.constant 0 : index
    %5 = vector.load %arg3[%c0_3, %c0_4] : memref<1x128xf32, #tpu.memory_space<vmem>>, vector<1x128xf32>
    %6 = vector.broadcast %5 : vector<1x128xf32> to vector<256x128xf32>
    %7 = arith.addf %4, %6 : vector<256x128xf32>
    %cst = arith.constant 0.000000e+00 : f32
    %8 = vector.broadcast %cst : f32 to vector<256x128xf32>
    %9 = arith.maximumf %7, %8 : vector<256x128xf32>
    %10 = arith.truncf %9 : vector<256x128xf32> to vector<256x128xbf16>
    %c0_5 = arith.constant 0 : index
    %c0_6 = arith.constant 0 : index
    %11 = vector.load %arg4[%c0_5, %c0_6] : memref<128x128xbf16, #tpu.memory_space<vmem>>, vector<128x128xbf16>
    %cst_7 = arith.constant dense<0.000000e+00> : vector<256x128xf32>
    %12 = tpu.matmul %10, %11, %cst_7 {dimension_numbers = #tpu.dot_dimension_numbers<[1], [0], [0], [1], [0, 0, 1, 1], [], []>} : vector<256x128xbf16>, vector<128x128xbf16>, vector<256x128xf32> -> vector<256x128xf32>
    %13 = arith.truncf %12 : vector<256x128xf32> to vector<256x128xbf16>
    %c0_8 = arith.constant 0 : index
    %c0_9 = arith.constant 0 : index
    %14 = vector.load %arg5[%c0_8, %c0_9] : memref<256x128xbf16, #tpu.memory_space<vmem>>, vector<256x128xbf16>
    tpu.vector_store %arg5[%c0_8, %c0_9], %13 {strides = array<i32>} : memref<256x128xbf16, #tpu.memory_space<vmem>>, vector<256x128xbf16>,
    %cst_10 = arith.constant dense<0.000000e+00> : vector<128xf32>
    %15 = vector.multi_reduction <add>, %12, %cst_10 [0] : vector<256x128xf32> to vector<128xf32>
    %16 = vector.shape_cast %15 : vector<128xf32> to vector<1x128xf32>
    %17 = arith.mulf %12, %12 : vector<256x128xf32>
    %cst_11 = arith.constant dense<0.000000e+00> : vector<128xf32>
    %18 = vector.multi_reduction <add>, %17, %cst_11 [0] : vector<256x128xf32> to vector<128xf32>
    %19 = vector.shape_cast %18 : vector<128xf32> to vector<1x128xf32>
    %20 = tpu.iota {dimensions = array<i32: 0>} : vector<8x128xi32>
    %c0_i32 = arith.constant 0 : i32
    %21 = vector.broadcast %c0_i32 : i32 to vector<8x128xi32>
    %22 = arith.cmpi eq, %20, %21 : vector<8x128xi32>
    %c1_i32 = arith.constant 1 : i32
    %23 = vector.broadcast %c1_i32 : i32 to vector<8x128xi32>
    %24 = arith.cmpi eq, %20, %23 : vector<8x128xi32>
    %cst_12 = arith.constant 0.000000e+00 : f32
    %25 = vector.shape_cast %19 : vector<1x128xf32> to vector<1x128xf32>
    %26 = vector.broadcast %25 : vector<1x128xf32> to vector<8x128xf32>
    %27 = vector.broadcast %cst_12 : f32 to vector<8x128xf32>
    %28 = arith.select %24, %26, %27 : vector<8x128xi1>, vector<8x128xf32>
    %29 = vector.shape_cast %16 : vector<1x128xf32> to vector<1x128xf32>
    %30 = vector.broadcast %29 : vector<1x128xf32> to vector<8x128xf32>
    %31 = arith.select %22, %30, %28 : vector<8x128xi1>, vector<8x128xf32>
    %32 = vector.shape_cast %31 : vector<8x128xf32> to vector<1x8x128xf32>
    %c0_13 = arith.constant 0 : index
    %c0_14 = arith.constant 0 : index
    %c0_15 = arith.constant 0 : index
    %33 = vector.load %arg6[%c0_13, %c0_14, %c0_15] : memref<1x8x128xf32, #tpu.memory_space<vmem>>, vector<1x8x128xf32>
    tpu.vector_store %arg6[%c0_13, %c0_14, %c0_15], %32 {strides = array<i32>} : memref<1x8x128xf32, #tpu.memory_space<vmem>>, vector<1x8x128xf32>,
    return
  }
  func.func @transform_0(%arg0: i32) -> (i32, i32) {
    %c0_i32 = arith.constant 0 : i32
    %c0_i32_0 = arith.constant 0 : i32
    return %arg0, %c0_i32 : i32, i32
  }
  func.func @transform_1(%arg0: i32) -> (i32, i32) {
    %c0_i32 = arith.constant 0 : i32
    %c0_i32_0 = arith.constant 0 : i32
    %c0_i32_1 = arith.constant 0 : i32
    return %c0_i32, %c0_i32_0 : i32, i32
  }
  func.func @transform_2(%arg0: i32) -> (i32, i32) {
    %c0_i32 = arith.constant 0 : i32
    %c0_i32_0 = arith.constant 0 : i32
    %c0_i32_1 = arith.constant 0 : i32
    return %c0_i32, %c0_i32_0 : i32, i32
  }
  func.func @transform_3(%arg0: i32) -> (i32, i32) {
    %c0_i32 = arith.constant 0 : i32
    %c0_i32_0 = arith.constant 0 : i32
    %c0_i32_1 = arith.constant 0 : i32
    return %c0_i32, %c0_i32_0 : i32, i32
  }
  func.func @transform_4(%arg0: i32) -> (i32, i32) {
    %c0_i32 = arith.constant 0 : i32
    %c0_i32_0 = arith.constant 0 : i32
    return %arg0, %c0_i32 : i32, i32
  }
  func.func @transform_5(%arg0: i32) -> (i32, i32, i32) {
    %c0_i32 = arith.constant 0 : i32
    %c0_i32_0 = arith.constant 0 : i32
    %c0_i32_1 = arith.constant 0 : i32
    return %arg0, %c0_i32, %c0_i32_0 : i32, i32, i32
  }
}

module attributes {stable_mosaic.version = 11 : i64} {
  func.func @kernel(%arg0: i32, %arg1: memref<256x128xbf16, #tpu.memory_space<vmem>>, %arg2: memref<1x128xf32, #tpu.memory_space<vmem>>, %arg3: memref<1x128xf32, #tpu.memory_space<vmem>>, %arg4: memref<9x128x128xbf16, #tpu.memory_space<vmem>>, %arg5: memref<256x128xbf16, #tpu.memory_space<vmem>>, %arg6: memref<1x8x128xf32, #tpu.memory_space<vmem>>, %arg7: memref<18x24x128xf32, #tpu.memory_space<vmem>>) attributes {dimension_semantics = [#tpu.dimension_semantics<parallel>], iteration_bounds = array<i64: 2>, scalar_prefetch = 0 : i64, scratch_operands = 1 : i64, tpu.core_type = #tpu.core_type<tc>, window_params = [{transform_indices = @transform_0, window_bounds = array<i64: 256, 128>}, {pipeline_mode = #tpu.pipeline_mode<synchronous>, transform_indices = @transform_1, window_bounds = array<i64: 1, 128>}, {pipeline_mode = #tpu.pipeline_mode<synchronous>, transform_indices = @transform_2, window_bounds = array<i64: 1, 128>}, {pipeline_mode = #tpu.pipeline_mode<synchronous>, transform_indices = @transform_3, window_bounds = array<i64: 9, 128, 128>}, {transform_indices = @transform_4, window_bounds = array<i64: 256, 128>}, {transform_indices = @transform_5, window_bounds = array<i64: 1, 8, 128>}]} {
    %cst = arith.constant 0.000000e+00 : f32
    %0 = vector.broadcast %cst : f32 to vector<24x128xf32>
    %cst_0 = arith.constant 0.000000e+00 : f32
    %1 = vector.broadcast %cst_0 : f32 to vector<16x8x128xf32>
    %c0 = arith.constant 0 : index
    %c0_1 = arith.constant 0 : index
    %c0_2 = arith.constant 0 : index
    %2 = vector.load %arg7[%c0, %c0_1, %c0_2] : memref<18x24x128xf32, #tpu.memory_space<vmem>>, vector<1x24x128xf32>
    %3 = vector.shape_cast %2 : vector<1x24x128xf32> to vector<24x128xf32>
    %4 = vector.shape_cast %0 : vector<24x128xf32> to vector<1x24x128xf32>
    tpu.vector_store %arg7[%c0, %c0_1, %c0_2], %4 {strides = array<i32>} : memref<18x24x128xf32, #tpu.memory_space<vmem>>, vector<1x24x128xf32>,
    %c17 = arith.constant 17 : index
    %c0_3 = arith.constant 0 : index
    %c0_4 = arith.constant 0 : index
    %5 = vector.load %arg7[%c17, %c0_3, %c0_4] : memref<18x24x128xf32, #tpu.memory_space<vmem>>, vector<1x24x128xf32>
    %6 = vector.shape_cast %5 : vector<1x24x128xf32> to vector<24x128xf32>
    %7 = vector.shape_cast %0 : vector<24x128xf32> to vector<1x24x128xf32>
    tpu.vector_store %arg7[%c17, %c0_3, %c0_4], %7 {strides = array<i32>} : memref<18x24x128xf32, #tpu.memory_space<vmem>>, vector<1x24x128xf32>,
    %c1 = arith.constant 1 : index
    %c0_5 = arith.constant 0 : index
    %c0_6 = arith.constant 0 : index
    %8 = vector.load %arg7[%c1, %c0_5, %c0_6] : memref<18x24x128xf32, #tpu.memory_space<vmem>>, vector<16x8x128xf32>
    tpu.vector_store %arg7[%c1, %c0_5, %c0_6], %1 {strides = array<i32>} : memref<18x24x128xf32, #tpu.memory_space<vmem>>, vector<16x8x128xf32>,
    %c1_7 = arith.constant 1 : index
    %c16 = arith.constant 16 : index
    %c0_8 = arith.constant 0 : index
    %9 = vector.load %arg7[%c1_7, %c16, %c0_8] : memref<18x24x128xf32, #tpu.memory_space<vmem>>, vector<16x8x128xf32>
    tpu.vector_store %arg7[%c1_7, %c16, %c0_8], %1 {strides = array<i32>} : memref<18x24x128xf32, #tpu.memory_space<vmem>>, vector<16x8x128xf32>,
    %c0_9 = arith.constant 0 : index
    %c0_10 = arith.constant 0 : index
    %10 = vector.load %arg1[%c0_9, %c0_10] : memref<256x128xbf16, #tpu.memory_space<vmem>>, vector<256x128xbf16>
    %11 = arith.extf %10 : vector<256x128xbf16> to vector<256x128xf32>
    %c0_11 = arith.constant 0 : index
    %c0_12 = arith.constant 0 : index
    %12 = vector.load %arg2[%c0_11, %c0_12] : memref<1x128xf32, #tpu.memory_space<vmem>>, vector<1x128xf32>
    %13 = vector.broadcast %12 : vector<1x128xf32> to vector<256x128xf32>
    %14 = arith.mulf %11, %13 : vector<256x128xf32>
    %c0_13 = arith.constant 0 : index
    %c0_14 = arith.constant 0 : index
    %15 = vector.load %arg3[%c0_13, %c0_14] : memref<1x128xf32, #tpu.memory_space<vmem>>, vector<1x128xf32>
    %16 = vector.broadcast %15 : vector<1x128xf32> to vector<256x128xf32>
    %17 = arith.addf %14, %16 : vector<256x128xf32>
    %cst_15 = arith.constant 0.000000e+00 : f32
    %18 = vector.broadcast %cst_15 : f32 to vector<256x128xf32>
    %19 = arith.maximumf %17, %18 : vector<256x128xf32>
    %20 = vector.shape_cast %19 : vector<256x128xf32> to vector<16x16x128xf32>
    %c1_16 = arith.constant 1 : index
    %c1_17 = arith.constant 1 : index
    %c0_18 = arith.constant 0 : index
    %21 = vector.load %arg7[%c1_16, %c1_17, %c0_18] : memref<18x24x128xf32, #tpu.memory_space<vmem>>, vector<16x16x128xf32>
    tpu.vector_store %arg7[%c1_16, %c1_17, %c0_18], %20 {strides = array<i32>} : memref<18x24x128xf32, #tpu.memory_space<vmem>>, vector<16x16x128xf32>,
    %cst_19 = arith.constant 0.000000e+00 : f32
    %22 = vector.broadcast %cst_19 : f32 to vector<256x128xf32>
    %c0_20 = arith.constant 0 : index
    %c0_21 = arith.constant 0 : index
    %c0_22 = arith.constant 0 : index
    %23 = vector.load %arg7[%c0_20, %c0_21, %c0_22] : memref<18x24x128xf32, #tpu.memory_space<vmem>>, vector<16x16x128xf32>
    %24 = vector.shape_cast %23 : vector<16x16x128xf32> to vector<256x128xf32>
    %25 = arith.truncf %24 : vector<256x128xf32> to vector<256x128xbf16>
    %c0_23 = arith.constant 0 : index
    %c0_24 = arith.constant 0 : index
    %c0_25 = arith.constant 0 : index
    %26 = vector.load %arg4[%c0_23, %c0_24, %c0_25] : memref<9x128x128xbf16, #tpu.memory_space<vmem>>, vector<1x128x128xbf16>
    %27 = vector.shape_cast %26 : vector<1x128x128xbf16> to vector<128x128xbf16>
    %cst_26 = arith.constant dense<0.000000e+00> : vector<256x128xf32>
    %28 = tpu.matmul %25, %27, %cst_26 {dimension_numbers = #tpu.dot_dimension_numbers<[1], [0], [0], [1], [0, 0, 1, 1], [], []>} : vector<256x128xbf16>, vector<128x128xbf16>, vector<256x128xf32> -> vector<256x128xf32>
    %29 = arith.addf %22, %28 : vector<256x128xf32>
    %c0_27 = arith.constant 0 : index
    %c1_28 = arith.constant 1 : index
    %c0_29 = arith.constant 0 : index
    %30 = vector.load %arg7[%c0_27, %c1_28, %c0_29] : memref<18x24x128xf32, #tpu.memory_space<vmem>>, vector<16x16x128xf32>
    %31 = vector.shape_cast %30 : vector<16x16x128xf32> to vector<256x128xf32>
    %32 = arith.truncf %31 : vector<256x128xf32> to vector<256x128xbf16>
    %c1_30 = arith.constant 1 : index
    %c0_31 = arith.constant 0 : index
    %c0_32 = arith.constant 0 : index
    %33 = vector.load %arg4[%c1_30, %c0_31, %c0_32] : memref<9x128x128xbf16, #tpu.memory_space<vmem>>, vector<1x128x128xbf16>
    %34 = vector.shape_cast %33 : vector<1x128x128xbf16> to vector<128x128xbf16>
    %cst_33 = arith.constant dense<0.000000e+00> : vector<256x128xf32>
    %35 = tpu.matmul %32, %34, %cst_33 {dimension_numbers = #tpu.dot_dimension_numbers<[1], [0], [0], [1], [0, 0, 1, 1], [], []>} : vector<256x128xbf16>, vector<128x128xbf16>, vector<256x128xf32> -> vector<256x128xf32>
    %36 = arith.addf %29, %35 : vector<256x128xf32>
    %c0_34 = arith.constant 0 : index
    %c2 = arith.constant 2 : index
    %c0_35 = arith.constant 0 : index
    %37 = vector.load %arg7[%c0_34, %c2, %c0_35] : memref<18x24x128xf32, #tpu.memory_space<vmem>>, vector<16x16x128xf32>
    %38 = vector.shape_cast %37 : vector<16x16x128xf32> to vector<256x128xf32>
    %39 = arith.truncf %38 : vector<256x128xf32> to vector<256x128xbf16>
    %c2_36 = arith.constant 2 : index
    %c0_37 = arith.constant 0 : index
    %c0_38 = arith.constant 0 : index
    %40 = vector.load %arg4[%c2_36, %c0_37, %c0_38] : memref<9x128x128xbf16, #tpu.memory_space<vmem>>, vector<1x128x128xbf16>
    %41 = vector.shape_cast %40 : vector<1x128x128xbf16> to vector<128x128xbf16>
    %cst_39 = arith.constant dense<0.000000e+00> : vector<256x128xf32>
    %42 = tpu.matmul %39, %41, %cst_39 {dimension_numbers = #tpu.dot_dimension_numbers<[1], [0], [0], [1], [0, 0, 1, 1], [], []>} : vector<256x128xbf16>, vector<128x128xbf16>, vector<256x128xf32> -> vector<256x128xf32>
    %43 = arith.addf %36, %42 : vector<256x128xf32>
    %c1_40 = arith.constant 1 : index
    %c0_41 = arith.constant 0 : index
    %c0_42 = arith.constant 0 : index
    %44 = vector.load %arg7[%c1_40, %c0_41, %c0_42] : memref<18x24x128xf32, #tpu.memory_space<vmem>>, vector<16x16x128xf32>
    %45 = vector.shape_cast %44 : vector<16x16x128xf32> to vector<256x128xf32>
    %46 = arith.truncf %45 : vector<256x128xf32> to vector<256x128xbf16>
    %c3 = arith.constant 3 : index
    %c0_43 = arith.constant 0 : index
    %c0_44 = arith.constant 0 : index
    %47 = vector.load %arg4[%c3, %c0_43, %c0_44] : memref<9x128x128xbf16, #tpu.memory_space<vmem>>, vector<1x128x128xbf16>
    %48 = vector.shape_cast %47 : vector<1x128x128xbf16> to vector<128x128xbf16>
    %cst_45 = arith.constant dense<0.000000e+00> : vector<256x128xf32>
    %49 = tpu.matmul %46, %48, %cst_45 {dimension_numbers = #tpu.dot_dimension_numbers<[1], [0], [0], [1], [0, 0, 1, 1], [], []>} : vector<256x128xbf16>, vector<128x128xbf16>, vector<256x128xf32> -> vector<256x128xf32>
    %50 = arith.addf %43, %49 : vector<256x128xf32>
    %c1_46 = arith.constant 1 : index
    %c1_47 = arith.constant 1 : index
    %c0_48 = arith.constant 0 : index
    %51 = vector.load %arg7[%c1_46, %c1_47, %c0_48] : memref<18x24x128xf32, #tpu.memory_space<vmem>>, vector<16x16x128xf32>
    %52 = vector.shape_cast %51 : vector<16x16x128xf32> to vector<256x128xf32>
    %53 = arith.truncf %52 : vector<256x128xf32> to vector<256x128xbf16>
    %c4 = arith.constant 4 : index
    %c0_49 = arith.constant 0 : index
    %c0_50 = arith.constant 0 : index
    %54 = vector.load %arg4[%c4, %c0_49, %c0_50] : memref<9x128x128xbf16, #tpu.memory_space<vmem>>, vector<1x128x128xbf16>
    %55 = vector.shape_cast %54 : vector<1x128x128xbf16> to vector<128x128xbf16>
    %cst_51 = arith.constant dense<0.000000e+00> : vector<256x128xf32>
    %56 = tpu.matmul %53, %55, %cst_51 {dimension_numbers = #tpu.dot_dimension_numbers<[1], [0], [0], [1], [0, 0, 1, 1], [], []>} : vector<256x128xbf16>, vector<128x128xbf16>, vector<256x128xf32> -> vector<256x128xf32>
    %57 = arith.addf %50, %56 : vector<256x128xf32>
    %c1_52 = arith.constant 1 : index
    %c2_53 = arith.constant 2 : index
    %c0_54 = arith.constant 0 : index
    %58 = vector.load %arg7[%c1_52, %c2_53, %c0_54] : memref<18x24x128xf32, #tpu.memory_space<vmem>>, vector<16x16x128xf32>
    %59 = vector.shape_cast %58 : vector<16x16x128xf32> to vector<256x128xf32>
    %60 = arith.truncf %59 : vector<256x128xf32> to vector<256x128xbf16>
    %c5 = arith.constant 5 : index
    %c0_55 = arith.constant 0 : index
    %c0_56 = arith.constant 0 : index
    %61 = vector.load %arg4[%c5, %c0_55, %c0_56] : memref<9x128x128xbf16, #tpu.memory_space<vmem>>, vector<1x128x128xbf16>
    %62 = vector.shape_cast %61 : vector<1x128x128xbf16> to vector<128x128xbf16>
    %cst_57 = arith.constant dense<0.000000e+00> : vector<256x128xf32>
    %63 = tpu.matmul %60, %62, %cst_57 {dimension_numbers = #tpu.dot_dimension_numbers<[1], [0], [0], [1], [0, 0, 1, 1], [], []>} : vector<256x128xbf16>, vector<128x128xbf16>, vector<256x128xf32> -> vector<256x128xf32>
    %64 = arith.addf %57, %63 : vector<256x128xf32>
    %c2_58 = arith.constant 2 : index
    %c0_59 = arith.constant 0 : index
    %c0_60 = arith.constant 0 : index
    %65 = vector.load %arg7[%c2_58, %c0_59, %c0_60] : memref<18x24x128xf32, #tpu.memory_space<vmem>>, vector<16x16x128xf32>
    %66 = vector.shape_cast %65 : vector<16x16x128xf32> to vector<256x128xf32>
    %67 = arith.truncf %66 : vector<256x128xf32> to vector<256x128xbf16>
    %c6 = arith.constant 6 : index
    %c0_61 = arith.constant 0 : index
    %c0_62 = arith.constant 0 : index
    %68 = vector.load %arg4[%c6, %c0_61, %c0_62] : memref<9x128x128xbf16, #tpu.memory_space<vmem>>, vector<1x128x128xbf16>
    %69 = vector.shape_cast %68 : vector<1x128x128xbf16> to vector<128x128xbf16>
    %cst_63 = arith.constant dense<0.000000e+00> : vector<256x128xf32>
    %70 = tpu.matmul %67, %69, %cst_63 {dimension_numbers = #tpu.dot_dimension_numbers<[1], [0], [0], [1], [0, 0, 1, 1], [], []>} : vector<256x128xbf16>, vector<128x128xbf16>, vector<256x128xf32> -> vector<256x128xf32>
    %71 = arith.addf %64, %70 : vector<256x128xf32>
    %c2_64 = arith.constant 2 : index
    %c1_65 = arith.constant 1 : index
    %c0_66 = arith.constant 0 : index
    %72 = vector.load %arg7[%c2_64, %c1_65, %c0_66] : memref<18x24x128xf32, #tpu.memory_space<vmem>>, vector<16x16x128xf32>
    %73 = vector.shape_cast %72 : vector<16x16x128xf32> to vector<256x128xf32>
    %74 = arith.truncf %73 : vector<256x128xf32> to vector<256x128xbf16>
    %c7 = arith.constant 7 : index
    %c0_67 = arith.constant 0 : index
    %c0_68 = arith.constant 0 : index
    %75 = vector.load %arg4[%c7, %c0_67, %c0_68] : memref<9x128x128xbf16, #tpu.memory_space<vmem>>, vector<1x128x128xbf16>
    %76 = vector.shape_cast %75 : vector<1x128x128xbf16> to vector<128x128xbf16>
    %cst_69 = arith.constant dense<0.000000e+00> : vector<256x128xf32>
    %77 = tpu.matmul %74, %76, %cst_69 {dimension_numbers = #tpu.dot_dimension_numbers<[1], [0], [0], [1], [0, 0, 1, 1], [], []>} : vector<256x128xbf16>, vector<128x128xbf16>, vector<256x128xf32> -> vector<256x128xf32>
    %78 = arith.addf %71, %77 : vector<256x128xf32>
    %c2_70 = arith.constant 2 : index
    %c2_71 = arith.constant 2 : index
    %c0_72 = arith.constant 0 : index
    %79 = vector.load %arg7[%c2_70, %c2_71, %c0_72] : memref<18x24x128xf32, #tpu.memory_space<vmem>>, vector<16x16x128xf32>
    %80 = vector.shape_cast %79 : vector<16x16x128xf32> to vector<256x128xf32>
    %81 = arith.truncf %80 : vector<256x128xf32> to vector<256x128xbf16>
    %c8 = arith.constant 8 : index
    %c0_73 = arith.constant 0 : index
    %c0_74 = arith.constant 0 : index
    %82 = vector.load %arg4[%c8, %c0_73, %c0_74] : memref<9x128x128xbf16, #tpu.memory_space<vmem>>, vector<1x128x128xbf16>
    %83 = vector.shape_cast %82 : vector<1x128x128xbf16> to vector<128x128xbf16>
    %cst_75 = arith.constant dense<0.000000e+00> : vector<256x128xf32>
    %84 = tpu.matmul %81, %83, %cst_75 {dimension_numbers = #tpu.dot_dimension_numbers<[1], [0], [0], [1], [0, 0, 1, 1], [], []>} : vector<256x128xbf16>, vector<128x128xbf16>, vector<256x128xf32> -> vector<256x128xf32>
    %85 = arith.addf %78, %84 : vector<256x128xf32>
    %86 = arith.truncf %85 : vector<256x128xf32> to vector<256x128xbf16>
    %c0_76 = arith.constant 0 : index
    %c0_77 = arith.constant 0 : index
    %87 = vector.load %arg5[%c0_76, %c0_77] : memref<256x128xbf16, #tpu.memory_space<vmem>>, vector<256x128xbf16>
    tpu.vector_store %arg5[%c0_76, %c0_77], %86 {strides = array<i32>} : memref<256x128xbf16, #tpu.memory_space<vmem>>, vector<256x128xbf16>,
    %cst_78 = arith.constant dense<0.000000e+00> : vector<128xf32>
    %88 = vector.multi_reduction <add>, %85, %cst_78 [0] : vector<256x128xf32> to vector<128xf32>
    %89 = vector.shape_cast %88 : vector<128xf32> to vector<1x128xf32>
    %90 = arith.mulf %85, %85 : vector<256x128xf32>
    %cst_79 = arith.constant dense<0.000000e+00> : vector<128xf32>
    %91 = vector.multi_reduction <add>, %90, %cst_79 [0] : vector<256x128xf32> to vector<128xf32>
    %92 = vector.shape_cast %91 : vector<128xf32> to vector<1x128xf32>
    %93 = tpu.iota {dimensions = array<i32: 0>} : vector<8x128xi32>
    %c0_i32 = arith.constant 0 : i32
    %94 = vector.broadcast %c0_i32 : i32 to vector<8x128xi32>
    %95 = arith.cmpi eq, %93, %94 : vector<8x128xi32>
    %c1_i32 = arith.constant 1 : i32
    %96 = vector.broadcast %c1_i32 : i32 to vector<8x128xi32>
    %97 = arith.cmpi eq, %93, %96 : vector<8x128xi32>
    %cst_80 = arith.constant 0.000000e+00 : f32
    %98 = vector.shape_cast %92 : vector<1x128xf32> to vector<1x128xf32>
    %99 = vector.broadcast %98 : vector<1x128xf32> to vector<8x128xf32>
    %100 = vector.broadcast %cst_80 : f32 to vector<8x128xf32>
    %101 = arith.select %97, %99, %100 : vector<8x128xi1>, vector<8x128xf32>
    %102 = vector.shape_cast %89 : vector<1x128xf32> to vector<1x128xf32>
    %103 = vector.broadcast %102 : vector<1x128xf32> to vector<8x128xf32>
    %104 = arith.select %95, %103, %101 : vector<8x128xi1>, vector<8x128xf32>
    %105 = vector.shape_cast %104 : vector<8x128xf32> to vector<1x8x128xf32>
    %c0_81 = arith.constant 0 : index
    %c0_82 = arith.constant 0 : index
    %c0_83 = arith.constant 0 : index
    %106 = vector.load %arg6[%c0_81, %c0_82, %c0_83] : memref<1x8x128xf32, #tpu.memory_space<vmem>>, vector<1x8x128xf32>
    tpu.vector_store %arg6[%c0_81, %c0_82, %c0_83], %105 {strides = array<i32>} : memref<1x8x128xf32, #tpu.memory_space<vmem>>, vector<1x8x128xf32>,
    return
  }
  func.func @transform_0(%arg0: i32) -> (i32, i32) {
    %c0_i32 = arith.constant 0 : i32
    %c0_i32_0 = arith.constant 0 : i32
    return %arg0, %c0_i32 : i32, i32
  }
  func.func @transform_1(%arg0: i32) -> (i32, i32) {
    %c0_i32 = arith.constant 0 : i32
    %c0_i32_0 = arith.constant 0 : i32
    %c0_i32_1 = arith.constant 0 : i32
    return %c0_i32, %c0_i32_0 : i32, i32
  }
  func.func @transform_2(%arg0: i32) -> (i32, i32) {
    %c0_i32 = arith.constant 0 : i32
    %c0_i32_0 = arith.constant 0 : i32
    %c0_i32_1 = arith.constant 0 : i32
    return %c0_i32, %c0_i32_0 : i32, i32
  }
  func.func @transform_3(%arg0: i32) -> (i32, i32, i32) {
    %c0_i32 = arith.constant 0 : i32
    %c0_i32_0 = arith.constant 0 : i32
    %c0_i32_1 = arith.constant 0 : i32
    %c0_i32_2 = arith.constant 0 : i32
    return %c0_i32, %c0_i32_0, %c0_i32_1 : i32, i32, i32
  }
  func.func @transform_4(%arg0: i32) -> (i32, i32) {
    %c0_i32 = arith.constant 0 : i32
    %c0_i32_0 = arith.constant 0 : i32
    return %arg0, %c0_i32 : i32, i32
  }
  func.func @transform_5(%arg0: i32) -> (i32, i32, i32) {
    %c0_i32 = arith.constant 0 : i32
    %c0_i32_0 = arith.constant 0 : i32
    %c0_i32_1 = arith.constant 0 : i32
    return %arg0, %c0_i32, %c0_i32_0 : i32, i32, i32
  }
}

module attributes {stable_mosaic.version = 11 : i64} {
  func.func @kernel(%arg0: i32, %arg1: memref<256x128xbf16, #tpu.memory_space<vmem>>, %arg2: memref<1x128xf32, #tpu.memory_space<vmem>>, %arg3: memref<1x128xf32, #tpu.memory_space<vmem>>, %arg4: memref<9x128x128xbf16, #tpu.memory_space<vmem>>, %arg5: memref<256x128xbf16, #tpu.memory_space<vmem>>, %arg6: memref<1x8x128xf32, #tpu.memory_space<vmem>>, %arg7: memref<18x24x128xf32, #tpu.memory_space<vmem>>) attributes {dimension_semantics = [#tpu.dimension_semantics<parallel>], iteration_bounds = array<i64: 2>, scalar_prefetch = 0 : i64, scratch_operands = 1 : i64, tpu.core_type = #tpu.core_type<tc>, window_params = [{transform_indices = @transform_0, window_bounds = array<i64: 256, 128>}, {pipeline_mode = #tpu.pipeline_mode<synchronous>, transform_indices = @transform_1, window_bounds = array<i64: 1, 128>}, {pipeline_mode = #tpu.pipeline_mode<synchronous>, transform_indices = @transform_2, window_bounds = array<i64: 1, 128>}, {pipeline_mode = #tpu.pipeline_mode<synchronous>, transform_indices = @transform_3, window_bounds = array<i64: 9, 128, 128>}, {transform_indices = @transform_4, window_bounds = array<i64: 256, 128>}, {transform_indices = @transform_5, window_bounds = array<i64: 1, 8, 128>}]} {
    %cst = arith.constant 0.000000e+00 : f32
    %0 = vector.broadcast %cst : f32 to vector<24x128xf32>
    %cst_0 = arith.constant 0.000000e+00 : f32
    %1 = vector.broadcast %cst_0 : f32 to vector<16x8x128xf32>
    %c0 = arith.constant 0 : index
    %c0_1 = arith.constant 0 : index
    %c0_2 = arith.constant 0 : index
    %2 = vector.load %arg7[%c0, %c0_1, %c0_2] : memref<18x24x128xf32, #tpu.memory_space<vmem>>, vector<1x24x128xf32>
    %3 = vector.shape_cast %2 : vector<1x24x128xf32> to vector<24x128xf32>
    %4 = vector.shape_cast %0 : vector<24x128xf32> to vector<1x24x128xf32>
    tpu.vector_store %arg7[%c0, %c0_1, %c0_2], %4 {strides = array<i32>} : memref<18x24x128xf32, #tpu.memory_space<vmem>>, vector<1x24x128xf32>,
    %c17 = arith.constant 17 : index
    %c0_3 = arith.constant 0 : index
    %c0_4 = arith.constant 0 : index
    %5 = vector.load %arg7[%c17, %c0_3, %c0_4] : memref<18x24x128xf32, #tpu.memory_space<vmem>>, vector<1x24x128xf32>
    %6 = vector.shape_cast %5 : vector<1x24x128xf32> to vector<24x128xf32>
    %7 = vector.shape_cast %0 : vector<24x128xf32> to vector<1x24x128xf32>
    tpu.vector_store %arg7[%c17, %c0_3, %c0_4], %7 {strides = array<i32>} : memref<18x24x128xf32, #tpu.memory_space<vmem>>, vector<1x24x128xf32>,
    %c1 = arith.constant 1 : index
    %c0_5 = arith.constant 0 : index
    %c0_6 = arith.constant 0 : index
    %8 = vector.load %arg7[%c1, %c0_5, %c0_6] : memref<18x24x128xf32, #tpu.memory_space<vmem>>, vector<16x8x128xf32>
    tpu.vector_store %arg7[%c1, %c0_5, %c0_6], %1 {strides = array<i32>} : memref<18x24x128xf32, #tpu.memory_space<vmem>>, vector<16x8x128xf32>,
    %c1_7 = arith.constant 1 : index
    %c16 = arith.constant 16 : index
    %c0_8 = arith.constant 0 : index
    %9 = vector.load %arg7[%c1_7, %c16, %c0_8] : memref<18x24x128xf32, #tpu.memory_space<vmem>>, vector<16x8x128xf32>
    tpu.vector_store %arg7[%c1_7, %c16, %c0_8], %1 {strides = array<i32>} : memref<18x24x128xf32, #tpu.memory_space<vmem>>, vector<16x8x128xf32>,
    %c0_9 = arith.constant 0 : index
    %c0_10 = arith.constant 0 : index
    %10 = vector.load %arg1[%c0_9, %c0_10] : memref<256x128xbf16, #tpu.memory_space<vmem>>, vector<256x128xbf16>
    %11 = arith.extf %10 : vector<256x128xbf16> to vector<256x128xf32>
    %c0_11 = arith.constant 0 : index
    %c0_12 = arith.constant 0 : index
    %12 = vector.load %arg2[%c0_11, %c0_12] : memref<1x128xf32, #tpu.memory_space<vmem>>, vector<1x128xf32>
    %13 = vector.broadcast %12 : vector<1x128xf32> to vector<256x128xf32>
    %14 = arith.mulf %11, %13 : vector<256x128xf32>
    %c0_13 = arith.constant 0 : index
    %c0_14 = arith.constant 0 : index
    %15 = vector.load %arg3[%c0_13, %c0_14] : memref<1x128xf32, #tpu.memory_space<vmem>>, vector<1x128xf32>
    %16 = vector.broadcast %15 : vector<1x128xf32> to vector<256x128xf32>
    %17 = arith.addf %14, %16 : vector<256x128xf32>
    %cst_15 = arith.constant 0.000000e+00 : f32
    %18 = vector.broadcast %cst_15 : f32 to vector<256x128xf32>
    %19 = arith.maximumf %17, %18 : vector<256x128xf32>
    %20 = vector.shape_cast %19 : vector<256x128xf32> to vector<16x16x128xf32>
    %c1_16 = arith.constant 1 : index
    %c1_17 = arith.constant 1 : index
    %c0_18 = arith.constant 0 : index
    %21 = vector.load %arg7[%c1_16, %c1_17, %c0_18] : memref<18x24x128xf32, #tpu.memory_space<vmem>>, vector<16x16x128xf32>
    tpu.vector_store %arg7[%c1_16, %c1_17, %c0_18], %20 {strides = array<i32>} : memref<18x24x128xf32, #tpu.memory_space<vmem>>, vector<16x16x128xf32>,
    %cst_19 = arith.constant 0.000000e+00 : f32
    %22 = vector.broadcast %cst_19 : f32 to vector<256x128xf32>
    %c0_20 = arith.constant 0 : index
    %c0_21 = arith.constant 0 : index
    %c0_22 = arith.constant 0 : index
    %23 = vector.load %arg7[%c0_20, %c0_21, %c0_22] : memref<18x24x128xf32, #tpu.memory_space<vmem>>, vector<16x16x128xf32>
    %24 = vector.shape_cast %23 : vector<16x16x128xf32> to vector<256x128xf32>
    %25 = arith.truncf %24 : vector<256x128xf32> to vector<256x128xbf16>
    %c0_23 = arith.constant 0 : index
    %c0_24 = arith.constant 0 : index
    %c0_25 = arith.constant 0 : index
    %26 = vector.load %arg4[%c0_23, %c0_24, %c0_25] : memref<9x128x128xbf16, #tpu.memory_space<vmem>>, vector<1x128x128xbf16>
    %27 = vector.shape_cast %26 : vector<1x128x128xbf16> to vector<128x128xbf16>
    %cst_26 = arith.constant dense<0.000000e+00> : vector<256x128xf32>
    %28 = tpu.matmul %25, %27, %cst_26 {dimension_numbers = #tpu.dot_dimension_numbers<[1], [0], [0], [1], [0, 0, 1, 1], [], []>} : vector<256x128xbf16>, vector<128x128xbf16>, vector<256x128xf32> -> vector<256x128xf32>
    %29 = arith.addf %22, %28 : vector<256x128xf32>
    %c0_27 = arith.constant 0 : index
    %c1_28 = arith.constant 1 : index
    %c0_29 = arith.constant 0 : index
    %30 = vector.load %arg7[%c0_27, %c1_28, %c0_29] : memref<18x24x128xf32, #tpu.memory_space<vmem>>, vector<16x16x128xf32>
    %31 = vector.shape_cast %30 : vector<16x16x128xf32> to vector<256x128xf32>
    %32 = arith.truncf %31 : vector<256x128xf32> to vector<256x128xbf16>
    %c1_30 = arith.constant 1 : index
    %c0_31 = arith.constant 0 : index
    %c0_32 = arith.constant 0 : index
    %33 = vector.load %arg4[%c1_30, %c0_31, %c0_32] : memref<9x128x128xbf16, #tpu.memory_space<vmem>>, vector<1x128x128xbf16>
    %34 = vector.shape_cast %33 : vector<1x128x128xbf16> to vector<128x128xbf16>
    %cst_33 = arith.constant dense<0.000000e+00> : vector<256x128xf32>
    %35 = tpu.matmul %32, %34, %cst_33 {dimension_numbers = #tpu.dot_dimension_numbers<[1], [0], [0], [1], [0, 0, 1, 1], [], []>} : vector<256x128xbf16>, vector<128x128xbf16>, vector<256x128xf32> -> vector<256x128xf32>
    %36 = arith.addf %29, %35 : vector<256x128xf32>
    %c0_34 = arith.constant 0 : index
    %c2 = arith.constant 2 : index
    %c0_35 = arith.constant 0 : index
    %37 = vector.load %arg7[%c0_34, %c2, %c0_35] : memref<18x24x128xf32, #tpu.memory_space<vmem>>, vector<16x16x128xf32>
    %38 = vector.shape_cast %37 : vector<16x16x128xf32> to vector<256x128xf32>
    %39 = arith.truncf %38 : vector<256x128xf32> to vector<256x128xbf16>
    %c2_36 = arith.constant 2 : index
    %c0_37 = arith.constant 0 : index
    %c0_38 = arith.constant 0 : index
    %40 = vector.load %arg4[%c2_36, %c0_37, %c0_38] : memref<9x128x128xbf16, #tpu.memory_space<vmem>>, vector<1x128x128xbf16>
    %41 = vector.shape_cast %40 : vector<1x128x128xbf16> to vector<128x128xbf16>
    %cst_39 = arith.constant dense<0.000000e+00> : vector<256x128xf32>
    %42 = tpu.matmul %39, %41, %cst_39 {dimension_numbers = #tpu.dot_dimension_numbers<[1], [0], [0], [1], [0, 0, 1, 1], [], []>} : vector<256x128xbf16>, vector<128x128xbf16>, vector<256x128xf32> -> vector<256x128xf32>
    %43 = arith.addf %36, %42 : vector<256x128xf32>
    %c1_40 = arith.constant 1 : index
    %c0_41 = arith.constant 0 : index
    %c0_42 = arith.constant 0 : index
    %44 = vector.load %arg7[%c1_40, %c0_41, %c0_42] : memref<18x24x128xf32, #tpu.memory_space<vmem>>, vector<16x16x128xf32>
    %45 = vector.shape_cast %44 : vector<16x16x128xf32> to vector<256x128xf32>
    %46 = arith.truncf %45 : vector<256x128xf32> to vector<256x128xbf16>
    %c3 = arith.constant 3 : index
    %c0_43 = arith.constant 0 : index
    %c0_44 = arith.constant 0 : index
    %47 = vector.load %arg4[%c3, %c0_43, %c0_44] : memref<9x128x128xbf16, #tpu.memory_space<vmem>>, vector<1x128x128xbf16>
    %48 = vector.shape_cast %47 : vector<1x128x128xbf16> to vector<128x128xbf16>
    %cst_45 = arith.constant dense<0.000000e+00> : vector<256x128xf32>
    %49 = tpu.matmul %46, %48, %cst_45 {dimension_numbers = #tpu.dot_dimension_numbers<[1], [0], [0], [1], [0, 0, 1, 1], [], []>} : vector<256x128xbf16>, vector<128x128xbf16>, vector<256x128xf32> -> vector<256x128xf32>
    %50 = arith.addf %43, %49 : vector<256x128xf32>
    %c1_46 = arith.constant 1 : index
    %c1_47 = arith.constant 1 : index
    %c0_48 = arith.constant 0 : index
    %51 = vector.load %arg7[%c1_46, %c1_47, %c0_48] : memref<18x24x128xf32, #tpu.memory_space<vmem>>, vector<16x16x128xf32>
    %52 = vector.shape_cast %51 : vector<16x16x128xf32> to vector<256x128xf32>
    %53 = arith.truncf %52 : vector<256x128xf32> to vector<256x128xbf16>
    %c4 = arith.constant 4 : index
    %c0_49 = arith.constant 0 : index
    %c0_50 = arith.constant 0 : index
    %54 = vector.load %arg4[%c4, %c0_49, %c0_50] : memref<9x128x128xbf16, #tpu.memory_space<vmem>>, vector<1x128x128xbf16>
    %55 = vector.shape_cast %54 : vector<1x128x128xbf16> to vector<128x128xbf16>
    %cst_51 = arith.constant dense<0.000000e+00> : vector<256x128xf32>
    %56 = tpu.matmul %53, %55, %cst_51 {dimension_numbers = #tpu.dot_dimension_numbers<[1], [0], [0], [1], [0, 0, 1, 1], [], []>} : vector<256x128xbf16>, vector<128x128xbf16>, vector<256x128xf32> -> vector<256x128xf32>
    %57 = arith.addf %50, %56 : vector<256x128xf32>
    %c1_52 = arith.constant 1 : index
    %c2_53 = arith.constant 2 : index
    %c0_54 = arith.constant 0 : index
    %58 = vector.load %arg7[%c1_52, %c2_53, %c0_54] : memref<18x24x128xf32, #tpu.memory_space<vmem>>, vector<16x16x128xf32>
    %59 = vector.shape_cast %58 : vector<16x16x128xf32> to vector<256x128xf32>
    %60 = arith.truncf %59 : vector<256x128xf32> to vector<256x128xbf16>
    %c5 = arith.constant 5 : index
    %c0_55 = arith.constant 0 : index
    %c0_56 = arith.constant 0 : index
    %61 = vector.load %arg4[%c5, %c0_55, %c0_56] : memref<9x128x128xbf16, #tpu.memory_space<vmem>>, vector<1x128x128xbf16>
    %62 = vector.shape_cast %61 : vector<1x128x128xbf16> to vector<128x128xbf16>
    %cst_57 = arith.constant dense<0.000000e+00> : vector<256x128xf32>
    %63 = tpu.matmul %60, %62, %cst_57 {dimension_numbers = #tpu.dot_dimension_numbers<[1], [0], [0], [1], [0, 0, 1, 1], [], []>} : vector<256x128xbf16>, vector<128x128xbf16>, vector<256x128xf32> -> vector<256x128xf32>
    %64 = arith.addf %57, %63 : vector<256x128xf32>
    %c2_58 = arith.constant 2 : index
    %c0_59 = arith.constant 0 : index
    %c0_60 = arith.constant 0 : index
    %65 = vector.load %arg7[%c2_58, %c0_59, %c0_60] : memref<18x24x128xf32, #tpu.memory_space<vmem>>, vector<16x16x128xf32>
    %66 = vector.shape_cast %65 : vector<16x16x128xf32> to vector<256x128xf32>
    %67 = arith.truncf %66 : vector<256x128xf32> to vector<256x128xbf16>
    %c6 = arith.constant 6 : index
    %c0_61 = arith.constant 0 : index
    %c0_62 = arith.constant 0 : index
    %68 = vector.load %arg4[%c6, %c0_61, %c0_62] : memref<9x128x128xbf16, #tpu.memory_space<vmem>>, vector<1x128x128xbf16>
    %69 = vector.shape_cast %68 : vector<1x128x128xbf16> to vector<128x128xbf16>
    %cst_63 = arith.constant dense<0.000000e+00> : vector<256x128xf32>
    %70 = tpu.matmul %67, %69, %cst_63 {dimension_numbers = #tpu.dot_dimension_numbers<[1], [0], [0], [1], [0, 0, 1, 1], [], []>} : vector<256x128xbf16>, vector<128x128xbf16>, vector<256x128xf32> -> vector<256x128xf32>
    %71 = arith.addf %64, %70 : vector<256x128xf32>
    %c2_64 = arith.constant 2 : index
    %c1_65 = arith.constant 1 : index
    %c0_66 = arith.constant 0 : index
    %72 = vector.load %arg7[%c2_64, %c1_65, %c0_66] : memref<18x24x128xf32, #tpu.memory_space<vmem>>, vector<16x16x128xf32>
    %73 = vector.shape_cast %72 : vector<16x16x128xf32> to vector<256x128xf32>
    %74 = arith.truncf %73 : vector<256x128xf32> to vector<256x128xbf16>
    %c7 = arith.constant 7 : index
    %c0_67 = arith.constant 0 : index
    %c0_68 = arith.constant 0 : index
    %75 = vector.load %arg4[%c7, %c0_67, %c0_68] : memref<9x128x128xbf16, #tpu.memory_space<vmem>>, vector<1x128x128xbf16>
    %76 = vector.shape_cast %75 : vector<1x128x128xbf16> to vector<128x128xbf16>
    %cst_69 = arith.constant dense<0.000000e+00> : vector<256x128xf32>
    %77 = tpu.matmul %74, %76, %cst_69 {dimension_numbers = #tpu.dot_dimension_numbers<[1], [0], [0], [1], [0, 0, 1, 1], [], []>} : vector<256x128xbf16>, vector<128x128xbf16>, vector<256x128xf32> -> vector<256x128xf32>
    %78 = arith.addf %71, %77 : vector<256x128xf32>
    %c2_70 = arith.constant 2 : index
    %c2_71 = arith.constant 2 : index
    %c0_72 = arith.constant 0 : index
    %79 = vector.load %arg7[%c2_70, %c2_71, %c0_72] : memref<18x24x128xf32, #tpu.memory_space<vmem>>, vector<16x16x128xf32>
    %80 = vector.shape_cast %79 : vector<16x16x128xf32> to vector<256x128xf32>
    %81 = arith.truncf %80 : vector<256x128xf32> to vector<256x128xbf16>
    %c8 = arith.constant 8 : index
    %c0_73 = arith.constant 0 : index
    %c0_74 = arith.constant 0 : index
    %82 = vector.load %arg4[%c8, %c0_73, %c0_74] : memref<9x128x128xbf16, #tpu.memory_space<vmem>>, vector<1x128x128xbf16>
    %83 = vector.shape_cast %82 : vector<1x128x128xbf16> to vector<128x128xbf16>
    %cst_75 = arith.constant dense<0.000000e+00> : vector<256x128xf32>
    %84 = tpu.matmul %81, %83, %cst_75 {dimension_numbers = #tpu.dot_dimension_numbers<[1], [0], [0], [1], [0, 0, 1, 1], [], []>} : vector<256x128xbf16>, vector<128x128xbf16>, vector<256x128xf32> -> vector<256x128xf32>
    %85 = arith.addf %78, %84 : vector<256x128xf32>
    %86 = arith.truncf %85 : vector<256x128xf32> to vector<256x128xbf16>
    %c0_76 = arith.constant 0 : index
    %c0_77 = arith.constant 0 : index
    %87 = vector.load %arg5[%c0_76, %c0_77] : memref<256x128xbf16, #tpu.memory_space<vmem>>, vector<256x128xbf16>
    tpu.vector_store %arg5[%c0_76, %c0_77], %86 {strides = array<i32>} : memref<256x128xbf16, #tpu.memory_space<vmem>>, vector<256x128xbf16>,
    %cst_78 = arith.constant dense<0.000000e+00> : vector<128xf32>
    %88 = vector.multi_reduction <add>, %85, %cst_78 [0] : vector<256x128xf32> to vector<128xf32>
    %89 = vector.shape_cast %88 : vector<128xf32> to vector<1x128xf32>
    %90 = arith.mulf %85, %85 : vector<256x128xf32>
    %cst_79 = arith.constant dense<0.000000e+00> : vector<128xf32>
    %91 = vector.multi_reduction <add>, %90, %cst_79 [0] : vector<256x128xf32> to vector<128xf32>
    %92 = vector.shape_cast %91 : vector<128xf32> to vector<1x128xf32>
    %93 = tpu.iota {dimensions = array<i32: 0>} : vector<8x128xi32>
    %c0_i32 = arith.constant 0 : i32
    %94 = vector.broadcast %c0_i32 : i32 to vector<8x128xi32>
    %95 = arith.cmpi eq, %93, %94 : vector<8x128xi32>
    %c1_i32 = arith.constant 1 : i32
    %96 = vector.broadcast %c1_i32 : i32 to vector<8x128xi32>
    %97 = arith.cmpi eq, %93, %96 : vector<8x128xi32>
    %cst_80 = arith.constant 0.000000e+00 : f32
    %98 = vector.shape_cast %92 : vector<1x128xf32> to vector<1x128xf32>
    %99 = vector.broadcast %98 : vector<1x128xf32> to vector<8x128xf32>
    %100 = vector.broadcast %cst_80 : f32 to vector<8x128xf32>
    %101 = arith.select %97, %99, %100 : vector<8x128xi1>, vector<8x128xf32>
    %102 = vector.shape_cast %89 : vector<1x128xf32> to vector<1x128xf32>
    %103 = vector.broadcast %102 : vector<1x128xf32> to vector<8x128xf32>
    %104 = arith.select %95, %103, %101 : vector<8x128xi1>, vector<8x128xf32>
    %105 = vector.shape_cast %104 : vector<8x128xf32> to vector<1x8x128xf32>
    %c0_81 = arith.constant 0 : index
    %c0_82 = arith.constant 0 : index
    %c0_83 = arith.constant 0 : index
    %106 = vector.load %arg6[%c0_81, %c0_82, %c0_83] : memref<1x8x128xf32, #tpu.memory_space<vmem>>, vector<1x8x128xf32>
    tpu.vector_store %arg6[%c0_81, %c0_82, %c0_83], %105 {strides = array<i32>} : memref<1x8x128xf32, #tpu.memory_space<vmem>>, vector<1x8x128xf32>,
    return
  }
  func.func @transform_0(%arg0: i32) -> (i32, i32) {
    %c0_i32 = arith.constant 0 : i32
    %c0_i32_0 = arith.constant 0 : i32
    return %arg0, %c0_i32 : i32, i32
  }
  func.func @transform_1(%arg0: i32) -> (i32, i32) {
    %c0_i32 = arith.constant 0 : i32
    %c0_i32_0 = arith.constant 0 : i32
    %c0_i32_1 = arith.constant 0 : i32
    return %c0_i32, %c0_i32_0 : i32, i32
  }
  func.func @transform_2(%arg0: i32) -> (i32, i32) {
    %c0_i32 = arith.constant 0 : i32
    %c0_i32_0 = arith.constant 0 : i32
    %c0_i32_1 = arith.constant 0 : i32
    return %c0_i32, %c0_i32_0 : i32, i32
  }
  func.func @transform_3(%arg0: i32) -> (i32, i32, i32) {
    %c0_i32 = arith.constant 0 : i32
    %c0_i32_0 = arith.constant 0 : i32
    %c0_i32_1 = arith.constant 0 : i32
    %c0_i32_2 = arith.constant 0 : i32
    return %c0_i32, %c0_i32_0, %c0_i32_1 : i32, i32, i32
  }
  func.func @transform_4(%arg0: i32) -> (i32, i32) {
    %c0_i32 = arith.constant 0 : i32
    %c0_i32_0 = arith.constant 0 : i32
    return %arg0, %c0_i32 : i32, i32
  }
  func.func @transform_5(%arg0: i32) -> (i32, i32, i32) {
    %c0_i32 = arith.constant 0 : i32
    %c0_i32_0 = arith.constant 0 : i32
    %c0_i32_1 = arith.constant 0 : i32
    return %arg0, %c0_i32, %c0_i32_0 : i32, i32, i32
  }
}

</mosaic_0001>

<bundles_post_ra>
// kernel: dense_block.4
= control target key start
LH: loop header
LB: loop body
LE: loop exit
PB: predicated region body
PF: predicated region fallthrough
CT: control target
= control target key end

     0   :  { %s1417_s18 = smov 0   ;;  %s1685_s0 = inlined_call_operand.vmem [shape: bf16[512,128], index: 0, kind: input, shape index: {}]   ;;  %s1686_s1 = inlined_call_operand.vmem [shape: f32[1,128], index: 1, kind: input, shape index: {}]   ;;  %s1687_s2 = inlined_call_operand.vmem [shape: f32[1,128], index: 2, kind: input, shape index: {}]   ;;  %s1688_s3 = inlined_call_operand.vmem [shape: bf16[128,128], index: 3, kind: input, shape index: {}]   ;;  %s1689_s4 = inlined_call_operand.vmem [shape: bf16[512,128], index: 4, kind: output, shape index: {0}]   ;;  %s1690_s5 = inlined_call_operand.vmem [shape: f32[2,8,128], index: 5, kind: output, shape index: {1}]  }
   0x1 LB: > { %s1423_s19 = sadd.s32 4294967295, %s1385_s18   ;;  %p1019_p0 = scmp.ge.s32.totalorder %s1385_s18, 1  ;;  %s1385_s18 = sphi %s1417_s18, %s16_s18  }
   0x2   : > { %p191_p1 = scmp.lt.s32.totalorder %s1385_s18, 3 }
   0x4   : > { %p192_p2 = pnand %p1019_p0, %p191_p1 }
   0x5   : > { %v1371_v0 = vld [vmem:[%s1688_s3] sm:$0xff] (!%p192_p2)   ;;  %s1020_s22 = sshll.u32 (!%p192_p2), %s1423_s19, 5  ;;  %v1372_v1 = vld [vmem:[%s1688_s3 + $0x8] sm:$0xff] (!%p192_p2)   ;;  %v1373_v2 = vld [vmem:[%s1688_s3 + $0x10] sm:$0xff] (!%p192_p2)   ;;  %p235_p4 = scmp.lt.s32.totalorder (!%p192_p2), %s1423_s19, 1 }
   0x6   : > { %195 = sbr.rel (%p192_p2) target bundleno = 332 (0x14c), region = 36  ;;  %p224_p3 = scmp.lt.s32.totalorder (!%p192_p2), %s1020_s22, 63  ;;  %1299 = vmatprep.subr.bf16.mxu0 (!%p192_p2), %v1371_v0  ;;  %1347 = vmatprep.subr.bf16.mxu1 (!%p192_p2), %v1371_v0  ;;  %v1374_v3 = vld [vmem:[%s1688_s3 + $0x18] sm:$0xff] (!%p192_p2)   ;;  %v1454_v5 = vld [vmem:[%s1686_s1] ss:$0 sm:$0xff] (!%p192_p2)  ;;  %v1376_v34 = vld [vmem:[%s1688_s3 + $0x28] sm:$0xff] (!%p192_p2)  }
   0x7   : > { %1300 = vmatpush3.bf16.msra.mxu0 (!%p192_p2), %v1371_v0  ;;  %1355 = vmatpush3.bf16.msra.mxu1 (!%p192_p2), %v1371_v0  ;;  %v1462_v11 = vld [vmem:[%s1687_s2] ss:$0 sm:$0xff] (!%p192_p2)  ;;  %v1377_v49 = vld [vmem:[%s1688_s3 + $0x30] sm:$0xff] (!%p192_p2)   ;;  %v1378_v63 = vld [vmem:[%s1688_s3 + $0x38] sm:$0xff] (!%p192_p2)  }
   0x8   : > { %1301 = vmatprep.subr.bf16.mxu0 (!%p192_p2), %v1372_v1  ;;  %1348 = vmatprep.subr.bf16.mxu1 (!%p192_p2), %v1372_v1  ;;  %v1375_v20 = vld [vmem:[%s1688_s3 + $0x20] sm:$0xff] (!%p192_p2)  }
   0xb   : > { %1302 = vmatpush3.bf16.msra.mxu0 (!%p192_p2), %v1372_v1  ;;  %1356 = vmatpush3.bf16.msra.mxu1 (!%p192_p2), %v1372_v1 }
   0xc   : > { %1303 = vmatprep.subr.bf16.mxu0 (!%p192_p2), %v1373_v2  ;;  %1349 = vmatprep.subr.bf16.mxu1 (!%p192_p2), %v1373_v2 }
   0xd   : > { %s1692_s22 = smov (!%p224_p3, %s1020_s22), 63  ;;  %s1694_s19 = smov (!%p235_p4, %s1423_s19), 1 }
   0xe   : > { %s1021_s27 = sshll.u32 %s1692_s22, 2  ;;  %s1024_s22 = sshll.u32 %s1694_s19, 3 }
   0xf   : > { %s1445_s30 = scalar_lea.vmem %s1685_s0, %s1021_s27  ;;  %1304 = vmatpush3.bf16.msra.mxu0 %v1373_v2  ;;  %1357 = vmatpush3.bf16.msra.mxu1 %v1373_v2  ;;  %s1587_s25 = scalar_lea.vmem %s1689_s4, %s1021_s27 }
  0x10   : > { %v1102_v4 = vld [vmem:[%s1445_s30] sm:$0xff]   ;;  %v1245_v8 = vld [vmem:[%s1445_s30 + $0x8] sm:$0xff]   ;;  %v1246_v9 = vld [vmem:[%s1445_s30 + $0x10] sm:$0xff]   ;;  %1305 = vmatprep.subr.bf16.mxu0 %v1374_v3  ;;  %1350 = vmatprep.subr.bf16.mxu1 %v1374_v3  ;;  %s238_s28 = scalar_lea.vmem %s1690_s5, %s1024_s22 }
  0x11   : > { %v1103_v6 = vunpack.c.l.bf16 %v1102_v4  ;;  %v1104_v7 = vunpack.c.h.bf16 %v1102_v4  ;;  %v1247_v10 = vld [vmem:[%s1445_s30 + $0x18] sm:$0xff]   ;;  %v1107_v12 = vunpack.c.l.bf16 %v1245_v8  ;;  %v1108_v13 = vunpack.c.h.bf16 %v1245_v8  ;;  %v1248_v29 = vld [vmem:[%s1445_s30 + $0x20] sm:$0xff]   ;;  %v1249_v33 = vld [vmem:[%s1445_s30 + $0x28] sm:$0xff]  }
  0x12   : > { %v1111_v14 = vunpack.c.l.bf16 %v1246_v9  ;;  %v1112_v15 = vunpack.c.h.bf16 %v1246_v9  ;;  %v1115_v18 = vunpack.c.l.bf16 %v1247_v10  ;;  %v1116_v19 = vunpack.c.h.bf16 %v1247_v10  ;;  %v1250_v42 = vld [vmem:[%s1445_s30 + $0x30] sm:$0xff]   ;;  %v1491_v48 = vld [vmem:[%s1445_s30 + $0x38] sm:$0xff]   ;;  %v1252_v60 = vld [vmem:[%s1445_s30 + $0x40] sm:$0xff]  }
  0x13   : > { %v311_v16 = vmul.f32 %v1103_v6, %v1454_v5  ;;  %v312_v17 = vmul.f32 %v1104_v7, %v1454_v5  ;;  %v313_v21 = vmul.f32 %v1107_v12, %v1454_v5  ;;  %v314_v22 = vmul.f32 %v1108_v13, %v1454_v5  ;;  %1306 = vmatpush3.bf16.msra.mxu0 %v1374_v3  ;;  %v1254_v9 = vld [vmem:[%s1445_s30 + $0x50] sm:$0xff]  }
  0x14   : > { %v315_v23 = vmul.f32 %v1111_v14, %v1454_v5  ;;  %v316_v24 = vmul.f32 %v1112_v15, %v1454_v5  ;;  %v317_v27 = vmul.f32 %v1115_v18, %v1454_v5  ;;  %v318_v28 = vmul.f32 %v1116_v19, %v1454_v5  ;;  %1358 = vmatpush3.bf16.msra.mxu1 %v1374_v3  ;;  %v1253_v3 = vld [vmem:[%s1445_s30 + $0x48] sm:$0xff]   ;;  %v1255_v19 = vld [vmem:[%s1445_s30 + $0x58] sm:$0xff]  }
  0x15   : > { %v350_v25 = vadd.f32 %v1462_v11, %v311_v16  ;;  %v351_v26 = vadd.f32 %v1462_v11, %v312_v17  ;;  %v352_v32 = vadd.f32 %v1462_v11, %v313_v21  ;;  %1307 = vmatprep.subr.bf16.mxu0 %v1375_v20  ;;  %v353_v35 = vadd.f32 %v1462_v11, %v314_v22 }
  0x16   : > { %v354_v36 = vadd.f32 %v1462_v11, %v315_v23  ;;  %v355_v37 = vadd.f32 %v1462_v11, %v316_v24  ;;  %1351 = vmatprep.subr.bf16.mxu1 %v1375_v20  ;;  %v356_v39 = vadd.f32 %v1462_v11, %v317_v27  ;;  %v357_v40 = vadd.f32 %v1462_v11, %v318_v28 }
  0x17   : > { %v382_v30 = vmax.f32 %v350_v25, 0.0  ;;  %v383_v31 = vmax.f32 %v351_v26, 0.0  ;;  %v1119_v41 = vunpack.c.l.bf16 %v1248_v29  ;;  %v1120_v43 = vunpack.c.h.bf16 %v1248_v29  ;;  %1308 = vmatpush3.bf16.msra.mxu0 %v1375_v20 }
  0x18   : > { %v1123_v44 = vunpack.c.l.bf16 %v1249_v33  ;;  %v384_v45 = vmax.f32 %v352_v32, 0.0  ;;  %v1124_v47 = vunpack.c.h.bf16 %v1249_v33  ;;  %1309 = vmatprep.subr.bf16.mxu0 %v1376_v34  ;;  %v385_v50 = vmax.f32 %v353_v35, 0.0  ;;  %1359 = vmatpush3.bf16.msra.mxu1 %v1375_v20  ;;  %v1256_v32 = vld [vmem:[%s1445_s30 + $0x60] sm:$0xff]  }
  0x19   : > { %v414_v38 = vpack.c.bf16 %v383_v31, %v382_v30  ;;  %v319_v46 = vmul.f32 %v1119_v41, %v1454_v5  ;;  %v386_v51 = vmax.f32 %v354_v36, 0.0  ;;  %v387_v52 = vmax.f32 %v355_v37, 0.0  ;;  %1352 = vmatprep.subr.bf16.mxu1 %v1376_v34 }
  0x1a   : > { %v1127_v53 = vunpack.c.l.bf16 %v1250_v42  ;;  %v388_v54 = vmax.f32 %v356_v39, 0.0  ;;  %v389_v55 = vmax.f32 %v357_v40, 0.0  ;;  %v320_v56 = vmul.f32 %v1120_v43, %v1454_v5 }
  0x1b   : > { %1315 = vmatprep.mubr.bf16.mxu0 %v414_v38  ;;  %v321_v57 = vmul.f32 %v1123_v44, %v1454_v5  ;;  %v1128_v58 = vunpack.c.h.bf16 %v1250_v42  ;;  %v1131_v59 = vunpack.c.l.bf16 %v1491_v48  ;;  %1310 = vmatpush3.bf16.msra.mxu0 %v1376_v34  ;;  %v1501_v61 = vadd.f32 %v1462_v11, %v319_v46 }
  0x1c   : > { %v322_v62 = vmul.f32 %v1124_v47, %v1454_v5  ;;  %1311 = vmatprep.subr.bf16.mxu0 %v1377_v49  ;;  %v415_v0 = vpack.c.bf16 %v385_v50, %v384_v45  ;;  %v416_v1 = vpack.c.bf16 %v387_v52, %v386_v51  ;;  %1360 = vmatpush3.bf16.msra.mxu1 %v1376_v34  ;;  %v1132_v7 = vunpack.c.h.bf16 %v1491_v48  ;;  %v1257_v45 = vld [vmem:[%s1445_s30 + $0x68] sm:$0xff]  }
  0x1d   : > { %v323_v2 = vmul.f32 %v1127_v53, %v1454_v5  ;;  %v1509_v4 = vpack.c.bf16 %v389_v55, %v388_v54  ;;  %v1512_v6 = vadd.f32 %v1462_v11, %v320_v56  ;;  %1353 = vmatprep.subr.bf16.mxu1 %v1377_v49  ;;  %v1135_v8 = vunpack.c.l.bf16 %v1252_v60  ;;  %v1258_v55 = vld [vmem:[%s1445_s30 + $0x70] sm:$0xff]  }
  0x1e   : > { %v1517_v10 = vadd.f32 %v1462_v11, %v321_v57  ;;  %v1520_v12 = vmul.f32 %v1128_v58, %v1454_v5  ;;  %v1523_v13 = vmul.f32 %v1131_v59, %v1454_v5  ;;  %v1136_v14 = vunpack.c.h.bf16 %v1252_v60 }
  0x1f   : > { %1312 = vmatpush3.bf16.msra.mxu0 %v1377_v49  ;;  %v390_v15 = vmax.f32 %v1501_v61, 0.0  ;;  %v1527_v16 = vadd.f32 %v1462_v11, %v322_v62  ;;  %v327_v17 = vmul.f32 %v1135_v8, %v1454_v5  ;;  %v1139_v18 = vunpack.c.l.bf16 %v1253_v3 }
  0x20   : > { %1313 = vmatprep.subr.bf16.mxu0 %v1378_v63  ;;  %1361 = vmatpush3.bf16.msra.mxu1 %v1377_v49  ;;  %v1532_v20 = vadd.f32 %v1462_v11, %v323_v2  ;;  %v328_v21 = vmul.f32 %v1136_v14, %v1454_v5  ;;  %v1140_v22 = vunpack.c.h.bf16 %v1253_v3  ;;  %v1143_v23 = vunpack.c.l.bf16 %v1254_v9 }
  0x21   : > { %v391_v24 = vmax.f32 %v1512_v6, 0.0  ;;  %1354 = vmatprep.subr.bf16.mxu1 %v1378_v63  ;;  %v366_v25 = vadd.f32 %v1462_v11, %v327_v17  ;;  %v329_v26 = vmul.f32 %v1139_v18, %v1454_v5  ;;  %v1144_v27 = vunpack.c.h.bf16 %v1254_v9  ;;  %v1259_v17 = vld [vmem:[%s1445_s30 + $0x78] sm:$0xff]  }
  0x22   : > { %v367_v28 = vadd.f32 %v1462_v11, %v328_v21  ;;  %v330_v29 = vmul.f32 %v1140_v22, %v1454_v5  ;;  %v331_v30 = vmul.f32 %v1143_v23, %v1454_v5  ;;  %v1147_v31 = vunpack.c.l.bf16 %v1255_v19 }
  0x23   : > { %1314 = vmatpush3.bf16.msra.mxu0 %v1378_v63  ;;  %v398_v33 = vmax.f32 %v366_v25, 0.0  ;;  %v368_v34 = vadd.f32 %v1462_v11, %v329_v26  ;;  %v332_v35 = vmul.f32 %v1144_v27, %v1454_v5  ;;  %v1148_v36 = vunpack.c.h.bf16 %v1255_v19 }
  0x24   : > { %1362 = vmatpush3.bf16.msra.mxu1 %v1378_v63  ;;  %v399_v37 = vmax.f32 %v367_v28, 0.0  ;;  %v369_v38 = vadd.f32 %v1462_v11, %v330_v29  ;;  %v370_v39 = vadd.f32 %v1462_v11, %v331_v30  ;;  %v333_v40 = vmul.f32 %v1147_v31, %v1454_v5 }
  0x25   : > { %v400_v41 = vmax.f32 %v368_v34, 0.0  ;;  %v371_v42 = vadd.f32 %v1462_v11, %v332_v35  ;;  %v334_v43 = vmul.f32 %v1148_v36, %v1454_v5  ;;  %v1151_v44 = vunpack.c.l.bf16 %v1256_v32 }
  0x26   : > { %1316 = vmatmul.mubr.bf16.vlgmr.msra.gmra.mrb[0].mxu0 %v415_v0  ;;  %v422_v46 = vpack.c.bf16 %v399_v37, %v398_v33  ;;  %v401_v47 = vmax.f32 %v369_v38, 0.0  ;;  %v402_v49 = vmax.f32 %v370_v39, 0.0  ;;  %v372_v50 = vadd.f32 %v1462_v11, %v333_v40 }
  0x27   : > { %1319 = vmatprep.mubr.bf16.mxu0 %v416_v1  ;;  %v403_v51 = vmax.f32 %v371_v42, 0.0  ;;  %v373_v52 = vadd.f32 %v1462_v11, %v334_v43  ;;  %v1152_v53 = vunpack.c.h.bf16 %v1256_v32  ;;  %v335_v54 = vmul.f32 %v1151_v44, %v1454_v5 }
  0x28   : > { %1331 = vmatprep.mubr.bf16.mxu1 %v422_v46  ;;  %v423_v56 = vpack.c.bf16 %v401_v47, %v400_v41  ;;  %v404_v57 = vmax.f32 %v372_v50, 0.0  ;;  %v1155_v58 = vunpack.c.l.bf16 %v1257_v45  ;;  %v1156_v59 = vunpack.c.h.bf16 %v1257_v45 }
  0x29   : > { %v424_v60 = vpack.c.bf16 %v403_v51, %v402_v49  ;;  %v405_v61 = vmax.f32 %v373_v52, 0.0  ;;  %v336_v62 = vmul.f32 %v1152_v53, %v1454_v5  ;;  %v374_v63 = vadd.f32 %v1462_v11, %v335_v54 }
  0x2a   : > { %1332 = vmatmul.mubr.bf16.vlgmr.msra.gmra.mrb[0].mxu1 %v423_v56  ;;  %v337_v0 = vmul.f32 %v1155_v58, %v1454_v5  ;;  %v338_v1 = vmul.f32 %v1156_v59, %v1454_v5  ;;  %v1159_v2 = vunpack.c.l.bf16 %v1258_v55  ;;  %v1160_v3 = vunpack.c.h.bf16 %v1258_v55 }
  0x2b   : > { %v418_v6 = vpack.c.bf16 %v391_v24, %v390_v15  ;;  %v363_v8 = vadd.f32 %v1462_v11, %v1520_v12  ;;  %1335 = vmatprep.mubr.bf16.mxu1 %v424_v60  ;;  %v375_v9 = vadd.f32 %v1462_v11, %v336_v62  ;;  %v406_v14 = vmax.f32 %v374_v63, 0.0 }
  0x2c   : > { %v392_v18 = vmax.f32 %v1517_v10, 0.0  ;;  %v326_v19 = vmul.f32 %v1132_v7, %v1454_v5  ;;  %v339_v21 = vmul.f32 %v1159_v2, %v1454_v5  ;;  %v340_v22 = vmul.f32 %v1160_v3, %v1454_v5 }
  0x2d   : > { %v393_v15 = vmax.f32 %v1527_v16, 0.0  ;;  %v394_v23 = vmax.f32 %v1532_v20, 0.0  ;;  %v425_v12 = vpack.c.bf16 %v405_v61, %v404_v57  ;;  %v407_v24 = vmax.f32 %v375_v9, 0.0 }
  0x2e   : > { %1320 = vmatmul.mubr.bf16.gmra.mrb[4].mxu0 %v1509_v4  ;;  %v376_v25 = vadd.f32 %v1462_v11, %v337_v0  ;;  %v377_v10 = vadd.f32 %v1462_v11, %v338_v1  ;;  %v1163_v26 = vunpack.c.l.bf16 %v1259_v17  ;;  %v1164_v27 = vunpack.c.h.bf16 %v1259_v17 }
  0x2f   : > { %1323 = vmatprep.mubr.bf16.mxu0 %v418_v6  ;;  %v395_v48 = vmax.f32 %v363_v8, 0.0  ;;  %v426_v7 = vpack.c.bf16 %v407_v24, %v406_v14  ;;  %v378_v28 = vadd.f32 %v1462_v11, %v339_v21  ;;  %v379_v29 = vadd.f32 %v1462_v11, %v340_v22 }
  0x30   : > { %v419_v16 = vpack.c.bf16 %v393_v15, %v392_v18  ;;  %v364_v20 = vadd.f32 %v1462_v11, %v1523_v13  ;;  %v365_v30 = vadd.f32 %v1462_v11, %v326_v19  ;;  %v408_v4 = vmax.f32 %v376_v25, 0.0 }
  0x31   : > { %v409_v31 = vmax.f32 %v377_v10, 0.0  ;;  %v341_v32 = vmul.f32 %v1163_v26, %v1454_v5  ;;  %v342_v33 = vmul.f32 %v1164_v27, %v1454_v5  ;;  %v420_v34 = vpack.c.bf16 %v395_v48, %v394_v23 }
  0x32   : > { %1336 = vmatmul.mubr.bf16.gmra.mrb[4].mxu1 %v425_v12  ;;  %v410_v35 = vmax.f32 %v378_v28, 0.0  ;;  %v411_v36 = vmax.f32 %v379_v29, 0.0  ;;  %v396_v37 = vmax.f32 %v364_v20, 0.0  ;;  %v397_v38 = vmax.f32 %v365_v30, 0.0 }
  0x33   : > { %1339 = vmatprep.mubr.bf16.mxu1 %v426_v7  ;;  %v427_v39 = vpack.c.bf16 %v409_v31, %v408_v4  ;;  %v380_v13 = vadd.f32 %v1462_v11, %v341_v32  ;;  %v381_v40 = vadd.f32 %v1462_v11, %v342_v33 }
  0x34   : > { %v428_v41 = vpack.c.bf16 %v411_v36, %v410_v35  ;;  %v421_v42 = vpack.c.bf16 %v397_v38, %v396_v37 }
  0x35   : > { %v412_v43 = vmax.f32 %v380_v13, 0.0  ;;  %v413_v44 = vmax.f32 %v381_v40, 0.0 }
  0x36   : > { %1324 = vmatmul.mubr.bf16.gmra.mrb[8].mxu0 %v419_v16 }
  0x37   : > { %1327 = vmatprep.mubr.bf16.mxu0 %v420_v34  ;;  %v429_v5 = vpack.c.bf16 %v413_v44, %v412_v43 }
  0x3a   : > { %1340 = vmatmul.mubr.bf16.gmra.mrb[8].mxu1 %v427_v39 }
  0x3b   : > { %1343 = vmatprep.mubr.bf16.mxu1 %v428_v41 }
  0x3e   : > { %1328 = vmatmul.mubr.bf16.gmra.mrb[12].mxu0 %v421_v42 }
  0x42   : > { %1344 = vmatmul.mubr.bf16.gmra.mrb[12].mxu1 %v429_v5 }
  0xf9   : > { %v1317_v45 = vpop.f32.mrb[0].mxu0 }
  0xfa   : > { %v528_v46 = vpop.f32.mrb[1].mxu0  ;;  %v854_v56 = vmul.f32 %v1317_v45, %v1317_v45 }
  0xfb   : > { %v1318_v11 = vpop.f32.mrb[2].mxu0  ;;  %v852_v50 = vmul.f32 %v528_v46, %v528_v46 }
  0xfc   : > { %v1173_v47 = vpack.c.bf16 %v1318_v11, %v1317_v45  ;;  %v531_v49 = vpop.f32.mrb[3].mxu0  ;;  %v855_v62 = vmul.f32 %v1318_v11, %v1318_v11 }
  0xfd   : > { %v1168_v51 = vpack.c.bf16 %v531_v49, %v528_v46  ;;  %v815_v52 = vadd.f32 %v531_v49, %v528_v46  ;;  %v853_v53 = vmul.f32 %v531_v49, %v531_v49  ;;  %v1589_v54 = vpop.f32.mrb[0].mxu1 }
  0xfe   : > { %1260 = vst [vmem:[%s1587_s25 + $0x8] sm:$0xff] %v1173_v47   ;;  %v1592_v55 = vpop.f32.mrb[1].mxu1 }
  0xff   : > { %1169 = vst [vmem:[%s1587_s25] sm:$0xff] %v1168_v51   ;;  %v816_v57 = vadd.f32 %v1317_v45, %v815_v52  ;;  %v884_v58 = vadd.f32 %v853_v53, %v852_v50  ;;  %v1595_v59 = vpop.f32.mrb[2].mxu1 }
 0x100   : > { %v1213_v60 = vpack.c.bf16 %v1595_v59, %v1589_v54  ;;  %v1599_v61 = vpop.f32.mrb[3].mxu1 }
 0x101   : > { %v885_v63 = vadd.f32 %v884_v58, %v854_v56  ;;  %v1321_v0 = vpop.f32.mrb[4].mxu0  ;;  %v817_v1 = vadd.f32 %v1318_v11, %v816_v57  ;;  %v1208_v2 = vpack.c.bf16 %v1599_v61, %v1592_v55 }
 0x102   : > { %v544_v3 = vpop.f32.mrb[5].mxu0  ;;  %1268 = vst [vmem:[%s1587_s25 + $0x48] sm:$0xff] %v1213_v60   ;;  %v858_v24 = vmul.f32 %v1321_v0, %v1321_v0 }
 0x103   : > { %v818_v6 = vadd.f32 %v817_v1, %v544_v3  ;;  %v856_v8 = vmul.f32 %v544_v3, %v544_v3  ;;  %v886_v9 = vadd.f32 %v885_v63, %v855_v62  ;;  %v1322_v14 = vpop.f32.mrb[6].mxu0  ;;  %1267 = vst [vmem:[%s1587_s25 + $0x40] sm:$0xff] %v1208_v2  }
 0x104   : > { %v1183_v17 = vpack.c.bf16 %v1322_v14, %v1321_v0  ;;  %v547_v18 = vpop.f32.mrb[7].mxu0  ;;  %v859_v7 = vmul.f32 %v1322_v14, %v1322_v14 }
 0x105   : > { %v887_v19 = vadd.f32 %v886_v9, %v856_v8  ;;  %v1178_v21 = vpack.c.bf16 %v547_v18, %v544_v3  ;;  %v819_v22 = vadd.f32 %v818_v6, %v547_v18  ;;  %v857_v15 = vmul.f32 %v547_v18, %v547_v18  ;;  %v1605_v23 = vpop.f32.mrb[4].mxu1 }
 0x106   : > { %1262 = vst [vmem:[%s1587_s25 + $0x18] sm:$0xff] %v1183_v17   ;;  %v1608_v12 = vpop.f32.mrb[5].mxu1  ;;  %v868_v17 = vmul.f32 %v1592_v55, %v1592_v55 }
 0x107   : > { %1261 = vst [vmem:[%s1587_s25 + $0x10] sm:$0xff] %v1178_v21   ;;  %v820_v25 = vadd.f32 %v1321_v0, %v819_v22  ;;  %v888_v10 = vadd.f32 %v887_v19, %v857_v15  ;;  %v1611_v26 = vpop.f32.mrb[6].mxu1 }
 0x108   : > { %v1223_v27 = vpack.c.bf16 %v1611_v26, %v1605_v23  ;;  %v1615_v48 = vpop.f32.mrb[7].mxu1 }
 0x109   : > { %v889_v28 = vadd.f32 %v888_v10, %v858_v24  ;;  %v1325_v29 = vpop.f32.mrb[8].mxu0  ;;  %v821_v16 = vadd.f32 %v1322_v14, %v820_v25  ;;  %v1218_v20 = vpack.c.bf16 %v1615_v48, %v1608_v12 }
 0x10a   : > { %v560_v30 = vpop.f32.mrb[9].mxu0  ;;  %1270 = vst [vmem:[%s1587_s25 + $0x58] sm:$0xff] %v1223_v27   ;;  %v862_v41 = vmul.f32 %v1325_v29, %v1325_v29 }
 0x10b   : > { %v822_v4 = vadd.f32 %v821_v16, %v560_v30  ;;  %v860_v31 = vmul.f32 %v560_v30, %v560_v30  ;;  %v890_v32 = vadd.f32 %v889_v28, %v859_v7  ;;  %v1326_v33 = vpop.f32.mrb[10].mxu0  ;;  %1269 = vst [vmem:[%s1587_s25 + $0x50] sm:$0xff] %v1218_v20   ;;  %v869_v28 = vmul.f32 %v1599_v61, %v1599_v61 }
 0x10c   : > { %v1193_v34 = vpack.c.bf16 %v1326_v33, %v1325_v29  ;;  %v563_v35 = vpop.f32.mrb[11].mxu0  ;;  %v863_v46 = vmul.f32 %v1326_v33, %v1326_v33 }
 0x10d   : > { %v891_v36 = vadd.f32 %v890_v32, %v860_v31  ;;  %v1188_v37 = vpack.c.bf16 %v563_v35, %v560_v30  ;;  %v823_v38 = vadd.f32 %v822_v4, %v563_v35  ;;  %v861_v39 = vmul.f32 %v563_v35, %v563_v35  ;;  %v1621_v13 = vpop.f32.mrb[8].mxu1 }
 0x10e   : > { %1264 = vst [vmem:[%s1587_s25 + $0x28] sm:$0xff] %v1193_v34   ;;  %v1624_v40 = vpop.f32.mrb[9].mxu1  ;;  %v871_v30 = vmul.f32 %v1595_v59, %v1595_v59  ;;  %v872_v31 = vmul.f32 %v1608_v12, %v1608_v12  ;;  %v873_v35 = vmul.f32 %v1615_v48, %v1615_v48 }
 0x10f   : > { %1263 = vst [vmem:[%s1587_s25 + $0x20] sm:$0xff] %v1188_v37   ;;  %v824_v42 = vadd.f32 %v1325_v29, %v823_v38  ;;  %v892_v43 = vadd.f32 %v891_v36, %v861_v39  ;;  %v1627_v44 = vpop.f32.mrb[10].mxu1  ;;  %v870_v29 = vmul.f32 %v1589_v54, %v1589_v54 }
 0x110   : > { %v1233_v5 = vpack.c.bf16 %v1627_v44, %v1621_v13  ;;  %v1631_v45 = vpop.f32.mrb[11].mxu1 }
 0x111   : > { %v893_v11 = vadd.f32 %v892_v43, %v862_v41  ;;  %v1329_v47 = vpop.f32.mrb[12].mxu0  ;;  %v825_v49 = vadd.f32 %v1326_v33, %v824_v42  ;;  %v1228_v50 = vpack.c.bf16 %v1631_v45, %v1624_v40 }
 0x112   : > { %v576_v51 = vpop.f32.mrb[13].mxu0  ;;  %1272 = vst [vmem:[%s1587_s25 + $0x68] sm:$0xff] %v1233_v5   ;;  %v866_v6 = vmul.f32 %v1329_v47, %v1329_v47  ;;  %v877_v5 = vmul.f32 %v1631_v45, %v1631_v45 }
 0x113   : > { %v826_v52 = vadd.f32 %v825_v49, %v576_v51  ;;  %v864_v53 = vmul.f32 %v576_v51, %v576_v51  ;;  %v894_v56 = vadd.f32 %v893_v11, %v863_v46  ;;  %v1330_v57 = vpop.f32.mrb[14].mxu0  ;;  %1271 = vst [vmem:[%s1587_s25 + $0x60] sm:$0xff] %v1228_v50  }
 0x114   : > { %v1203_v58 = vpack.c.bf16 %v1330_v57, %v1329_v47  ;;  %v579_v60 = vpop.f32.mrb[15].mxu0  ;;  %v867_v21 = vmul.f32 %v1330_v57, %v1330_v57 }
 0x115   : > { %v895_v62 = vadd.f32 %v894_v56, %v864_v53  ;;  %v1198_v63 = vpack.c.bf16 %v579_v60, %v576_v51  ;;  %v827_v0 = vadd.f32 %v826_v52, %v579_v60  ;;  %v865_v1 = vmul.f32 %v579_v60, %v579_v60  ;;  %v1345_v2 = vpop.f32.mrb[12].mxu1 }
 0x116   : > { %1266 = vst [vmem:[%s1587_s25 + $0x38] sm:$0xff] %v1203_v58   ;;  %v640_v3 = vpop.f32.mrb[13].mxu1  ;;  %v882_v56 = vmul.f32 %v1345_v2, %v1345_v2 }
 0x117   : > { %1265 = vst [vmem:[%s1587_s25 + $0x30] sm:$0xff] %v1198_v63   ;;  %v828_v8 = vadd.f32 %v1329_v47, %v827_v0  ;;  %v896_v9 = vadd.f32 %v895_v62, %v865_v1  ;;  %v1346_v14 = vpop.f32.mrb[14].mxu1  ;;  %v880_v49 = vmul.f32 %v640_v3, %v640_v3 }
 0x118   : > { %v1243_v18 = vpack.c.bf16 %v1346_v14, %v1345_v2  ;;  %v643_v19 = vpop.f32.mrb[15].mxu1  ;;  %v883_v60 = vmul.f32 %v1346_v14, %v1346_v14 }
 0x119   : > { %v897_v22 = vadd.f32 %v896_v9, %v866_v6  ;;  %v829_v15 = vadd.f32 %v1330_v57, %v828_v8  ;;  %v1238_v24 = vpack.c.bf16 %v643_v19, %v640_v3  ;;  %v921_v8 = vlaneseq }
 0x11a   : > { %1274 = vst [vmem:[%s1587_s25 + $0x78] sm:$0xff] %v1243_v18  }
 0x11b   : > { %v830_v25 = vadd.f32 %v829_v15, %v1592_v55  ;;  %v898_v10 = vadd.f32 %v897_v22, %v867_v21  ;;  %1273 = vst [vmem:[%s1587_s25 + $0x70] sm:$0xff] %v1238_v24   ;;  %v922_v18 = vshrl.u32 %v921_v8, 7 }
 0x11d   : > { %v899_v27 = vadd.f32 %v898_v10, %v868_v17  ;;  %v831_v7 = vadd.f32 %v830_v25, %v1599_v61  ;;  %vm924_vm0 = vcmp.eq.s32.totalorder %v922_v18, 1  ;;  %vm923_vm1 = vcmp.eq.s32.totalorder %v922_v18, 0 }
 0x11f   : > { %v832_v16 = vadd.f32 %v1589_v54, %v831_v7  ;;  %v900_v20 = vadd.f32 %v899_v27, %v869_v28  ;;  %v874_v54 = vmul.f32 %v1605_v23, %v1605_v23 }
 0x121   : > { %v901_v4 = vadd.f32 %v900_v20, %v870_v29  ;;  %v833_v55 = vadd.f32 %v1595_v59, %v832_v16  ;;  %v875_v59 = vmul.f32 %v1611_v26, %v1611_v26 }
 0x123   : > { %v834_v32 = vadd.f32 %v833_v55, %v1608_v12  ;;  %v902_v33 = vadd.f32 %v901_v4, %v871_v30  ;;  %v876_v12 = vmul.f32 %v1624_v40, %v1624_v40 }
 0x125   : > { %v903_v34 = vadd.f32 %v902_v33, %v872_v31  ;;  %v835_v61 = vadd.f32 %v834_v32, %v1615_v48 }
 0x127   : > { %v836_v36 = vadd.f32 %v1605_v23, %v835_v61  ;;  %v904_v37 = vadd.f32 %v903_v34, %v873_v35  ;;  %v878_v23 = vmul.f32 %v1621_v13, %v1621_v13 }
 0x129   : > { %v905_v38 = vadd.f32 %v904_v37, %v874_v54  ;;  %v837_v39 = vadd.f32 %v1611_v26, %v836_v36  ;;  %v879_v26 = vmul.f32 %v1627_v44, %v1627_v44 }
 0x12b   : > { %v838_v41 = vadd.f32 %v837_v39, %v1624_v40  ;;  %v906_v42 = vadd.f32 %v905_v38, %v875_v59 }
 0x12d   : > { %v907_v43 = vadd.f32 %v906_v42, %v876_v12  ;;  %v839_v48 = vadd.f32 %v838_v41, %v1631_v45  ;;  %v881_v45 = vmul.f32 %v643_v19, %v643_v19 }
 0x12f   : > { %v840_v46 = vadd.f32 %v1621_v13, %v839_v48  ;;  %v908_v11 = vadd.f32 %v907_v43, %v877_v5 }
 0x131   : > { %v909_v47 = vadd.f32 %v908_v11, %v878_v23  ;;  %v841_v40 = vadd.f32 %v1627_v44, %v840_v46 }
 0x133   : > { %v842_v50 = vadd.f32 %v841_v40, %v640_v3  ;;  %v910_v51 = vadd.f32 %v909_v47, %v879_v26 }
 0x135   : > { %v911_v52 = vadd.f32 %v910_v51, %v880_v49  ;;  %v843_v53 = vadd.f32 %v842_v50, %v643_v19 }
 0x137   : > { %v844_v57 = vadd.f32 %v1345_v2, %v843_v53  ;;  %v912_v58 = vadd.f32 %v911_v52, %v881_v45 }
 0x139   : > { %v845_v13 = vadd.f32 %v1346_v14, %v844_v57  ;;  %v913_v62 = vadd.f32 %v912_v58, %v882_v56 }
 0x13b   : > { %v846_v63 = vrot.slane %v845_v13, 4  ;;  %v914_v0 = vadd.f32 %v913_v62, %v883_v60 }
 0x13d   : > { %v847_v1 = vadd.f32 %v846_v63, %v845_v13  ;;  %v915_v6 = vrot.slane %v914_v0, 4 }
 0x13f   : > { %v848_v44 = vrot.slane %v847_v1, 2  ;;  %v916_v9 = vadd.f32 %v915_v6, %v914_v0 }
 0x141   : > { %v849_v3 = vadd.f32 %v848_v44, %v847_v1  ;;  %v917_v17 = vrot.slane %v916_v9, 2 }
 0x143   : > { %v918_v21 = vadd.f32 %v917_v17, %v916_v9  ;;  %v850_v19 = vrot.slane %v849_v3, 1 }
 0x145   : > { %v919_v2 = vrot.slane %v918_v21, 1  ;;  %v851_v14 = vadd.f32 %v850_v19, %v849_v3 }
 0x147   : > { %v920_v22 = vadd.f32 %v919_v2, %v918_v21 }
 0x149   : > { %v925_v15 = vsel %vm924_vm0, %v920_v22, 0.0 }
 0x14a   : > { %v926_v24 = vsel %vm923_vm1, %v851_v14, %v925_v15 }
 0x14b   : > { %927 = vst [vmem:[%s238_s28] sm:$0xff] %v926_v24 }
 0x14c PF: > { %s16_s18 = sadd.s32 1, %s1385_s18  }
 0x14d   : > { %p13_p5 = scmp.ge.s32.totalorder %s16_s18, 4  }
 0x14f   :  { %15 = sbr.rel (!%p13_p5) target bundleno = 1 (0x1), region = 78 }

// kernel: dense_block.5
= control target key start
LH: loop header
LB: loop body
LE: loop exit
PB: predicated region body
PF: predicated region fallthrough
CT: control target
= control target key end

     0   :  { %s5037_s18 = smov 0   ;;  %s5783_s0 = inlined_call_operand.vmem [shape: bf16[512,128], index: 0, kind: input, shape index: {}]   ;;  %s5784_s1 = inlined_call_operand.vmem [shape: f32[1,128], index: 1, kind: input, shape index: {}]   ;;  %s5785_s2 = inlined_call_operand.vmem [shape: f32[1,128], index: 2, kind: input, shape index: {}]   ;;  %s5786_s3 = inlined_call_operand.vmem [shape: bf16[9,128,128], index: 3, kind: input, shape index: {}]   ;;  %s5787_s4 = inlined_call_operand.vmem [shape: bf16[512,128], index: 4, kind: output, shape index: {0}]   ;;  %s5788_s5 = inlined_call_operand.vmem [shape: f32[2,8,128], index: 5, kind: output, shape index: {1}]  }
   0x1 LB: > { %s5043_s19 = sadd.s32 4294967295, %s5004_s18   ;;  %p3540_p0 = scmp.ge.s32.totalorder %s5004_s18, 1  ;;  %s5004_s18 = sphi %s5037_s18, %s16_s18  }
   0x2   : > { %p191_p1 = scmp.lt.s32.totalorder %s5004_s18, 3 }
   0x4   : > { %p192_p2 = pnand %p3540_p0, %p191_p1 }
   0x5   : > { %v4917_v0 = vld [vmem:[%s5786_s3 + $0x40] sm:$0xff] (!%p192_p2)   ;;  %v5006_v2 = vmov (!%p192_p2), 0.0   ;;  %s3541_s24 = sshll.u32 (!%p192_p2), %s5043_s19, 5  ;;  %v4919_v3 = vld [vmem:[%s5786_s3 + $0x48] sm:$0xff] (!%p192_p2)   ;;  %v4921_v5 = vld [vmem:[%s5786_s3 + $0x50] sm:$0xff] (!%p192_p2)   ;;  %p235_p4 = scmp.lt.s32.totalorder (!%p192_p2), %s5043_s19, 1 }
   0x6   : > { %195 = sbr.rel (%p192_p2) target bundleno = 559 (0x22f), region = 36  ;;  %v4918_v1 = vld [vmem:[%s5786_s3 + $0x100] sm:$0xff] (!%p192_p2)   ;;  %240 = vst [vmem:[#allocation2] sm:$0xff] (!%p192_p2), %v5006_v2  ;;  %241 = vst [vmem:[#allocation2 + $0x8] sm:$0xff] (!%p192_p2), %v5006_v2  ;;  %4204 = vmatprep.subr.bf16.mxu1 (!%p192_p2), %v4917_v0  ;;  %p224_p3 = scmp.lt.s32.totalorder (!%p192_p2), %s3541_s24, 63  ;;  %v4920_v4 = vld [vmem:[%s5786_s3 + $0x108] sm:$0xff] (!%p192_p2)  }
   0x7   : > { %242 = vst [vmem:[#allocation2 + $0x10] sm:$0xff] (!%p192_p2), %v5006_v2  ;;  %244 = vst [vmem:[#allocation2 + $0x198] sm:$0xff] (!%p192_p2), %v5006_v2  ;;  %4396 = vmatprep.subr.bf16.mxu0 (!%p192_p2), %v4918_v1  ;;  %4205 = vmatpush3.bf16.msra.mxu1 (!%p192_p2), %v4917_v0  ;;  %v4922_v6 = vld [vmem:[%s5786_s3 + $0x110] sm:$0xff] (!%p192_p2)   ;;  %v4923_v7 = vld [vmem:[%s5786_s3 + $0x58] sm:$0xff] (!%p192_p2)  }
   0x8   : > { %245 = vst [vmem:[#allocation2 + $0x1a0] sm:$0xff] (!%p192_p2), %v5006_v2  ;;  %246 = vst [vmem:[#allocation2 + $0x1a8] sm:$0xff] (!%p192_p2), %v5006_v2  ;;  %4397 = vmatpush3.bf16.msra.mxu0 (!%p192_p2), %v4918_v1  ;;  %4206 = vmatprep.subr.bf16.mxu1 (!%p192_p2), %v4919_v3  ;;  %v4924_v8 = vld [vmem:[%s5786_s3 + $0x118] sm:$0xff] (!%p192_p2)   ;;  %v4925_v9 = vld [vmem:[%s5786_s3 + $0x60] sm:$0xff] (!%p192_p2)  }
   0x9   : > { %248 = vst [vmem:[#allocation2 + $0x18] sm:$0xff] (!%p192_p2), %v5006_v2  ;;  %249 = vst [vmem:[#allocation2 + $0x30] sm:$0xff] (!%p192_p2), %v5006_v2  ;;  %4398 = vmatprep.subr.bf16.mxu0 (!%p192_p2), %v4920_v4  ;;  %v4926_v10 = vld [vmem:[%s5786_s3 + $0x120] sm:$0xff] (!%p192_p2)   ;;  %v4927_v11 = vld [vmem:[%s5786_s3 + $0x68] sm:$0xff] (!%p192_p2)  }
   0xa   : > { %250 = vst [vmem:[#allocation2 + $0x48] sm:$0xff] (!%p192_p2), %v5006_v2  ;;  %251 = vst [vmem:[#allocation2 + $0x60] sm:$0xff] (!%p192_p2), %v5006_v2  ;;  %v4928_v15 = vld [vmem:[%s5786_s3 + $0x128] sm:$0xff] (!%p192_p2)   ;;  %v5098_v19 = vld [vmem:[%s5784_s1] ss:$0 sm:$0xff] (!%p192_p2) }
   0xb   : > { %252 = vst [vmem:[#allocation2 + $0x78] sm:$0xff] (!%p192_p2), %v5006_v2  ;;  %253 = vst [vmem:[#allocation2 + $0x90] sm:$0xff] (!%p192_p2), %v5006_v2  ;;  %4207 = vmatpush3.bf16.msra.mxu1 (!%p192_p2), %v4919_v3  ;;  %v5103_v20 = vld [vmem:[%s5785_s2] ss:$0 sm:$0xff] (!%p192_p2)  ;;  %v4929_v22 = vld [vmem:[%s5786_s3 + $0x70] sm:$0xff] (!%p192_p2)  }
   0xc   : > { %254 = vst [vmem:[#allocation2 + $0xa8] sm:$0xff] (!%p192_p2), %v5006_v2  ;;  %255 = vst [vmem:[#allocation2 + $0xc0] sm:$0xff] (!%p192_p2), %v5006_v2  ;;  %4399 = vmatpush3.bf16.msra.mxu0 (!%p192_p2), %v4920_v4  ;;  %4208 = vmatprep.subr.bf16.mxu1 (!%p192_p2), %v4921_v5  ;;  %v4930_v27 = vld [vmem:[%s5786_s3 + $0x130] sm:$0xff] (!%p192_p2)   ;;  %v4931_v36 = vld [vmem:[%s5786_s3 + $0x78] sm:$0xff] (!%p192_p2)  }
   0xd   : > { %256 = vst [vmem:[#allocation2 + $0xd8] sm:$0xff] %v5006_v2  ;;  %257 = vst [vmem:[#allocation2 + $0xf0] sm:$0xff] %v5006_v2  ;;  %s5790_s24 = smov (!%p224_p3, %s3541_s24), 63  ;;  %4400 = vmatprep.subr.bf16.mxu0 %v4922_v6  ;;  %v550_v12 = vld [vmem:[#allocation2 + $0x1] sm:$0xff]  ;;  %v4932_v37 = vld [vmem:[%s5786_s3 + $0x138] sm:$0xff]   ;;  %s5792_s19 = smov (!%p235_p4, %s5043_s19), 1 }
   0xe   : > { %258 = vst [vmem:[#allocation2 + $0x108] sm:$0xff] %v5006_v2  ;;  %259 = vst [vmem:[#allocation2 + $0x120] sm:$0xff] %v5006_v2  ;;  %s3542_s12 = sshll.u32 %s5790_s24, 2  ;;  %v551_v13 = vld [vmem:[#allocation2 + $0x9] sm:$0xff]  ;;  %v4933_v59 = vld [vmem:[%s5786_s3] sm:$0xff]   ;;  %s3545_s24 = sshll.u32 %s5792_s19, 3 }
   0xf   : > { %260 = vst [vmem:[#allocation2 + $0x138] sm:$0xff] %v5006_v2  ;;  %261 = vst [vmem:[#allocation2 + $0x150] sm:$0xff] %v5006_v2  ;;  %4209 = vmatpush3.bf16.msra.mxu1 %v4921_v5  ;;  %s5086_s21 = scalar_lea.vmem %s5783_s0, %s3542_s12  ;;  %v582_v16 = vpack.c.bf16 %v551_v13, %v550_v12  ;;  %v4934_v1 = vld [vmem:[%s5786_s3 + $0x140] sm:$0xff]   ;;  %s5753_s23 = scalar_lea.vmem %s5787_s4, %s3542_s12 }
  0x10   : > { %262 = vst [vmem:[#allocation2 + $0x168] sm:$0xff] %v5006_v2  ;;  %263 = vst [vmem:[#allocation2 + $0x180] sm:$0xff] %v5006_v2  ;;  %4401 = vmatpush3.bf16.msra.mxu0 %v4922_v6  ;;  %4210 = vmatprep.subr.bf16.mxu1 %v4923_v7  ;;  %v3815_v14 = vld [vmem:[%s5086_s21] sm:$0xff]   ;;  %v3958_v21 = vld [vmem:[%s5086_s21 + $0x8] sm:$0xff]   ;;  %s238_s26 = scalar_lea.vmem %s5788_s5, %s3545_s24 }
  0x11   : > { %264 = vst [vmem:[#allocation2 + $0x28] sm:$0xff] %v5006_v2  ;;  %265 = vst [vmem:[#allocation2 + $0x40] sm:$0xff] %v5006_v2  ;;  %4402 = vmatprep.subr.bf16.mxu0 %v4924_v8  ;;  %v3816_v17 = vunpack.c.l.bf16 %v3815_v14  ;;  %v3817_v18 = vunpack.c.h.bf16 %v3815_v14  ;;  %4220 = vmatprep.mubr.bf16.mxu1 %v582_v16  ;;  %v3820_v25 = vunpack.c.l.bf16 %v3958_v21  ;;  %v3821_v26 = vunpack.c.h.bf16 %v3958_v21  ;;  %v3959_v32 = vld [vmem:[%s5086_s21 + $0x10] sm:$0xff]   ;;  %v3960_v35 = vld [vmem:[%s5086_s21 + $0x18] sm:$0xff]  }
  0x12   : > { %266 = vst [vmem:[#allocation2 + $0x58] sm:$0xff] %v5006_v2  ;;  %267 = vst [vmem:[#allocation2 + $0x70] sm:$0xff] %v5006_v2  ;;  %v3824_v33 = vunpack.c.l.bf16 %v3959_v32  ;;  %v3825_v34 = vunpack.c.h.bf16 %v3959_v32  ;;  %v3828_v44 = vunpack.c.l.bf16 %v3960_v35  ;;  %v3829_v45 = vunpack.c.h.bf16 %v3960_v35  ;;  %v3961_v46 = vld [vmem:[%s5086_s21 + $0x20] sm:$0xff]   ;;  %v3962_v55 = vld [vmem:[%s5086_s21 + $0x28] sm:$0xff]  }
  0x13   : > { %268 = vst [vmem:[#allocation2 + $0x88] sm:$0xff] %v5006_v2  ;;  %269 = vst [vmem:[#allocation2 + $0xa0] sm:$0xff] %v5006_v2  ;;  %4211 = vmatpush3.bf16.msra.mxu1 %v4923_v7  ;;  %v351_v23 = vmul.f32 %v3816_v17, %v5098_v19  ;;  %v352_v24 = vmul.f32 %v3817_v18, %v5098_v19  ;;  %v353_v30 = vmul.f32 %v3820_v25, %v5098_v19  ;;  %v3963_v0 = vld [vmem:[%s5086_s21 + $0x30] sm:$0xff]   ;;  %v4935_v21 = vld [vmem:[%s5786_s3 + $0x148] sm:$0xff]  }
  0x14   : > { %270 = vst [vmem:[#allocation2 + $0xb8] sm:$0xff] %v5006_v2  ;;  %271 = vst [vmem:[#allocation2 + $0xd0] sm:$0xff] %v5006_v2  ;;  %4403 = vmatpush3.bf16.msra.mxu0 %v4924_v8  ;;  %4212 = vmatprep.subr.bf16.mxu1 %v4925_v9  ;;  %v354_v31 = vmul.f32 %v3821_v26, %v5098_v19  ;;  %v355_v42 = vmul.f32 %v3824_v33, %v5098_v19  ;;  %v3832_v50 = vunpack.c.l.bf16 %v3961_v46  ;;  %v3965_v26 = vld [vmem:[%s5086_s21 + $0x40] sm:$0xff]  }
  0x15   : > { %272 = vst [vmem:[#allocation2 + $0xe8] sm:$0xff] %v5006_v2  ;;  %273 = vst [vmem:[#allocation2 + $0x100] sm:$0xff] %v5006_v2  ;;  %4404 = vmatprep.subr.bf16.mxu0 %v4926_v10  ;;  %v390_v28 = vadd.f32 %v5103_v20, %v351_v23  ;;  %v391_v29 = vadd.f32 %v5103_v20, %v352_v24  ;;  %v392_v40 = vadd.f32 %v5103_v20, %v353_v30 }
  0x16   : > { %274 = vst [vmem:[#allocation2 + $0x118] sm:$0xff] %v5006_v2  ;;  %275 = vst [vmem:[#allocation2 + $0x130] sm:$0xff] %v5006_v2  ;;  %v393_v41 = vadd.f32 %v5103_v20, %v354_v31  ;;  %v356_v43 = vmul.f32 %v3825_v34, %v5098_v19  ;;  %v394_v51 = vadd.f32 %v5103_v20, %v355_v42  ;;  %v3833_v56 = vunpack.c.h.bf16 %v3961_v46  ;;  %v4939_v34 = vld [vmem:[%s5786_s3 + $0x10] sm:$0xff]  }
  0x17   : > { %276 = vst [vmem:[#allocation2 + $0x148] sm:$0xff] %v5006_v2  ;;  %277 = vst [vmem:[#allocation2 + $0x160] sm:$0xff] %v5006_v2  ;;  %4213 = vmatpush3.bf16.msra.mxu1 %v4925_v9  ;;  %v422_v38 = vmax.f32 %v390_v28, 0.0  ;;  %v423_v39 = vmax.f32 %v391_v29, 0.0  ;;  %v424_v48 = vmax.f32 %v392_v40, 0.0  ;;  %v357_v53 = vmul.f32 %v3828_v44, %v5098_v19  ;;  %v4937_v40 = vld [vmem:[%s5786_s3 + $0x150] sm:$0xff]  }
  0x18   : > { %278 = vst [vmem:[#allocation2 + $0x178] sm:$0xff] %v5006_v2  ;;  %279 = vst [vmem:[#allocation2 + $0x190] sm:$0xff] %v5006_v2  ;;  %4405 = vmatpush3.bf16.msra.mxu0 %v4926_v10  ;;  %4214 = vmatprep.subr.bf16.mxu1 %v4927_v11  ;;  %v425_v49 = vmax.f32 %v393_v41, 0.0  ;;  %v395_v52 = vadd.f32 %v5103_v20, %v356_v43  ;;  %v358_v54 = vmul.f32 %v3829_v45, %v5098_v19  ;;  %v3964_v10 = vld [vmem:[%s5086_s21 + $0x38] sm:$0xff]   ;;  %v3967_v44 = vld [vmem:[%s5086_s21 + $0x50] sm:$0xff]  }
  0x19   : > { %4406 = vmatprep.subr.bf16.mxu0 %v4928_v15  ;;  %454 = vst [vmem:[#allocation2 + $0x19] sm:$0xff] %v422_v38  ;;  %455 = vst [vmem:[#allocation2 + $0x21] sm:$0xff] %v423_v39  ;;  %v1677_v47 = vpack.c.bf16 %v423_v39, %v422_v38  ;;  %v359_v57 = vmul.f32 %v3832_v50, %v5098_v19  ;;  %v3836_v58 = vunpack.c.l.bf16 %v3962_v55  ;;  %v426_v60 = vmax.f32 %v394_v51, 0.0  ;;  %v3966_v39 = vld [vmem:[%s5086_s21 + $0x48] sm:$0xff]  }
  0x1a   : > { %456 = vst [vmem:[#allocation2 + $0x31] sm:$0xff] %v424_v48  ;;  %457 = vst [vmem:[#allocation2 + $0x39] sm:$0xff] %v425_v49  ;;  %v427_v61 = vmax.f32 %v395_v52, 0.0  ;;  %v5141_v62 = vadd.f32 %v5103_v20, %v357_v53  ;;  %v5144_v63 = vadd.f32 %v5103_v20, %v358_v54  ;;  %v360_v2 = vmul.f32 %v3833_v56, %v5098_v19  ;;  %v4938_v53 = vld [vmem:[%s5786_s3 + $0x158] sm:$0xff]  }
  0x1b   : > { %4215 = vmatpush3.bf16.msra.mxu1 %v4927_v11  ;;  %4412 = vmatprep.mubr.bf16.mxu0 %v1677_v47  ;;  %v5152_v3 = vadd.f32 %v5103_v20, %v359_v57  ;;  %v3837_v4 = vunpack.c.h.bf16 %v3962_v55  ;;  %v361_v5 = vmul.f32 %v3836_v58, %v5098_v19  ;;  %v1678_v6 = vpack.c.bf16 %v425_v49, %v424_v48  ;;  %v3968_v57 = vld [vmem:[%s5086_s21 + $0x58] sm:$0xff]  }
  0x1c   : > { %4407 = vmatpush3.bf16.msra.mxu0 %v4928_v15  ;;  %4216 = vmatprep.subr.bf16.mxu1 %v4929_v22  ;;  %458 = vst [vmem:[#allocation2 + $0x49] sm:$0xff] %v426_v60  ;;  %459 = vst [vmem:[#allocation2 + $0x51] sm:$0xff] %v427_v61  ;;  %v428_v7 = vmax.f32 %v5141_v62, 0.0  ;;  %v429_v8 = vmax.f32 %v5144_v63, 0.0  ;;  %v3840_v9 = vunpack.c.l.bf16 %v3963_v0  ;;  %v399_v11 = vadd.f32 %v5103_v20, %v360_v2  ;;  %v4942_v62 = vld [vmem:[%s5786_s3 + $0x18] sm:$0xff]  }
  0x1d   : > { %4408 = vmatprep.subr.bf16.mxu0 %v4930_v27  ;;  %v430_v12 = vmax.f32 %v5152_v3, 0.0  ;;  %v362_v13 = vmul.f32 %v3837_v4, %v5098_v19  ;;  %v5162_v14 = vadd.f32 %v5103_v20, %v361_v5  ;;  %v5164_v15 = vpack.c.bf16 %v427_v61, %v426_v60  ;;  %v3969_v61 = vld [vmem:[%s5086_s21 + $0x60] sm:$0xff]  }
  0x1e   : > { %460 = vst [vmem:[#allocation2 + $0x61] sm:$0xff] %v428_v7  ;;  %461 = vst [vmem:[#allocation2 + $0x69] sm:$0xff] %v429_v8  ;;  %v3841_v16 = vunpack.c.h.bf16 %v3963_v0  ;;  %v363_v17 = vmul.f32 %v3840_v9, %v5098_v19  ;;  %v3844_v18 = vunpack.c.l.bf16 %v3964_v10  ;;  %v3845_v25 = vunpack.c.h.bf16 %v3964_v10 }
  0x1f   : > { %4217 = vmatpush3.bf16.msra.mxu1 %v4929_v22  ;;  %v431_v22 = vmax.f32 %v399_v11, 0.0  ;;  %462 = vst [vmem:[#allocation2 + $0x79] sm:$0xff] %v430_v12  ;;  %v5171_v23 = vadd.f32 %v5103_v20, %v362_v13  ;;  %v432_v24 = vmax.f32 %v5162_v14, 0.0  ;;  %v3848_v33 = vunpack.c.l.bf16 %v3965_v26  ;;  %v3970_v13 = vld [vmem:[%s5086_s21 + $0x68] sm:$0xff]  }
  0x20   : > { %4409 = vmatpush3.bf16.msra.mxu0 %v4930_v27  ;;  %4218 = vmatprep.subr.bf16.mxu1 %v4931_v36  ;;  %v4936_v27 = vld [vmem:[%s5786_s3 + $0x8] sm:$0xff]   ;;  %v364_v28 = vmul.f32 %v3841_v16, %v5098_v19  ;;  %v5180_v29 = vadd.f32 %v5103_v20, %v363_v17  ;;  %v365_v30 = vmul.f32 %v3844_v18, %v5098_v19  ;;  %v3849_v38 = vunpack.c.h.bf16 %v3965_v26 }
  0x21   : > { %4410 = vmatprep.subr.bf16.mxu0 %v4932_v37  ;;  %463 = vst [vmem:[#allocation2 + $0x81] sm:$0xff] %v431_v22  ;;  %v433_v31 = vmax.f32 %v5171_v23, 0.0  ;;  %464 = vst [vmem:[#allocation2 + $0x91] sm:$0xff] %v432_v24  ;;  %v366_v32 = vmul.f32 %v3845_v25, %v5098_v19  ;;  %v367_v42 = vmul.f32 %v3848_v33, %v5098_v19  ;;  %v3852_v43 = vunpack.c.l.bf16 %v3966_v39 }
  0x22   : > { %v5191_v35 = vadd.f32 %v5103_v20, %v364_v28  ;;  %v1680_v45 = vpack.c.bf16 %v429_v8, %v428_v7  ;;  %v368_v48 = vmul.f32 %v3849_v38, %v5098_v19  ;;  %v3853_v51 = vunpack.c.h.bf16 %v3966_v39 }
  0x23   : > { %4219 = vmatpush3.bf16.msra.mxu1 %v4931_v36  ;;  %v434_v36 = vmax.f32 %v5180_v29, 0.0  ;;  %465 = vst [vmem:[#allocation2 + $0x99] sm:$0xff] %v433_v31  ;;  %v5205_v41 = vadd.f32 %v5103_v20, %v366_v32  ;;  %v5216_v50 = vadd.f32 %v5103_v20, %v367_v42  ;;  %v369_v52 = vmul.f32 %v3852_v43, %v5098_v19  ;;  %v3971_v29 = vld [vmem:[%s5086_s21 + $0x70] sm:$0xff]  }
  0x24   : > { %4411 = vmatpush3.bf16.msra.mxu0 %v4932_v37  ;;  %4252 = vmatprep.subr.bf16.mxu1 %v4933_v59  ;;  %v5195_v37 = vadd.f32 %v5103_v20, %v365_v30  ;;  %v435_v46 = vmax.f32 %v5191_v35, 0.0  ;;  %v1681_v54 = vpack.c.bf16 %v431_v22, %v430_v12  ;;  %v5225_v55 = vadd.f32 %v5103_v20, %v368_v48  ;;  %v4941_v30 = vld [vmem:[%s5786_s3 + $0x168] sm:$0xff]   ;;  %v4943_v43 = vld [vmem:[%s5786_s3 + $0x170] sm:$0xff]  }
  0x25   : > { %4444 = vmatprep.subr.bf16.mxu0 %v4934_v1  ;;  %466 = vst [vmem:[#allocation2 + $0xa9] sm:$0xff] %v434_v36  ;;  %v437_v49 = vmax.f32 %v5205_v41, 0.0  ;;  %v3856_v56 = vunpack.c.l.bf16 %v3967_v44  ;;  %v438_v58 = vmax.f32 %v5216_v50, 0.0  ;;  %v5233_v60 = vadd.f32 %v5103_v20, %v369_v52  ;;  %v1952_v48 = vld [vmem:[#allocation2 + $0x22] sm:$0xff] }
  0x26   : > { %4221 = vmatmul.mubr.bf16.vlgmr.msra.gmra.mrb[0].mxu1 %v1677_v47  ;;  %v436_v47 = vmax.f32 %v5195_v37, 0.0  ;;  %467 = vst [vmem:[#allocation2 + $0xb1] sm:$0xff] %v435_v46  ;;  %v439_v63 = vmax.f32 %v5225_v55, 0.0  ;;  %v3857_v0 = vunpack.c.h.bf16 %v3967_v44  ;;  %v3860_v4 = vunpack.c.l.bf16 %v3968_v57  ;;  %v1951_v44 = vld [vmem:[#allocation2 + $0x1a] sm:$0xff] }
  0x27   : > { %4413 = vmatmul.mubr.bf16.vlgmr.msra.gmra.mrb[0].mxu0 %v1678_v6  ;;  %4253 = vmatpush3.bf16.msra.mxu1 %v4933_v59  ;;  %469 = vst [vmem:[#allocation2 + $0xc9] sm:$0xff] %v437_v49  ;;  %v370_v59 = vmul.f32 %v3853_v51, %v5098_v19  ;;  %470 = vst [vmem:[#allocation2 + $0xd9] sm:$0xff] %v438_v58  ;;  %v440_v3 = vmax.f32 %v5233_v60, 0.0  ;;  %v3861_v5 = vunpack.c.h.bf16 %v3968_v57  ;;  %v3864_v9 = vunpack.c.l.bf16 %v3969_v61  ;;  %v4944_v37 = vld [vmem:[%s5786_s3 + $0x178] sm:$0xff]  }
  0x28   : > { %4445 = vmatpush3.bf16.msra.mxu0 %v4934_v1  ;;  %4224 = vmatprep.mubr.bf16.mxu1 %v1678_v6  ;;  %468 = vst [vmem:[#allocation2 + $0xc1] sm:$0xff] %v436_v47  ;;  %v371_v1 = vmul.f32 %v3856_v56, %v5098_v19  ;;  %v4940_v6 = vld [vmem:[%s5786_s3 + $0x160] sm:$0xff]   ;;  %471 = vst [vmem:[#allocation2 + $0xe1] sm:$0xff] %v439_v63  ;;  %v372_v7 = vmul.f32 %v3857_v0, %v5098_v19  ;;  %v3865_v18 = vunpack.c.h.bf16 %v3969_v61 }
  0x29   : > { %4446 = vmatprep.subr.bf16.mxu0 %v4935_v21  ;;  %4416 = vmatprep.mubr.bf16.mxu0 %v5164_v15  ;;  %v5245_v2 = vadd.f32 %v5103_v20, %v370_v59  ;;  %472 = vst [vmem:[#allocation2 + $0xf1] sm:$0xff] %v440_v3  ;;  %v373_v11 = vmul.f32 %v3860_v4, %v5098_v19  ;;  %v3869_v33 = vunpack.c.h.bf16 %v3970_v13  ;;  %v3873_v42 = vunpack.c.h.bf16 %v3971_v29  ;;  %v1954_v4 = vld [vmem:[#allocation2 + $0x3a] sm:$0xff] }
  0x2a   : > { %4254 = vmatprep.subr.bf16.mxu1 %v4936_v27  ;;  %v5255_v8 = vadd.f32 %v5103_v20, %v371_v1  ;;  %v374_v12 = vmul.f32 %v3861_v5, %v5098_v19  ;;  %v5267_v16 = vadd.f32 %v5103_v20, %v372_v7  ;;  %v1682_v22 = vpack.c.bf16 %v433_v31, %v432_v24  ;;  %v1953_v1 = vld [vmem:[#allocation2 + $0x32] sm:$0xff]  ;;  %v4946_v5 = vld [vmem:[%s5786_s3 + $0x180] sm:$0xff]  }
  0x2b   : > { %4255 = vmatpush3.bf16.msra.mxu1 %v4936_v27  ;;  %v441_v10 = vmax.f32 %v5245_v2, 0.0  ;;  %v1683_v25 = vpack.c.bf16 %v435_v46, %v434_v36  ;;  %v5280_v26 = vadd.f32 %v5103_v20, %v373_v11  ;;  %v376_v14 = vmul.f32 %v3865_v18, %v5098_v19  ;;  %v1956_v7 = vld [vmem:[#allocation2 + $0x52] sm:$0xff]  ;;  %v5373_v11 = vld [vmem:[%s5786_s3 + $0x80] sm:$0xff]  }
  0x2c   : > { %4447 = vmatpush3.bf16.msra.mxu0 %v4935_v21  ;;  %4256 = vmatprep.subr.bf16.mxu1 %v4939_v34  ;;  %v442_v17 = vmax.f32 %v5255_v8, 0.0  ;;  %v375_v21 = vmul.f32 %v3864_v9, %v5098_v19  ;;  %v5283_v27 = vadd.f32 %v5103_v20, %v374_v12  ;;  %v443_v28 = vmax.f32 %v5267_v16, 0.0  ;;  %v1957_v2 = vld [vmem:[#allocation2 + $0x62] sm:$0xff]  ;;  %v4952_v8 = vld [vmem:[%s5786_s3 + $0x198] sm:$0xff]  }
  0x2d   : > { %4448 = vmatprep.subr.bf16.mxu0 %v4937_v40  ;;  %473 = vst [vmem:[#allocation2 + $0xf9] sm:$0xff] %v441_v10  ;;  %v3868_v24 = vunpack.c.l.bf16 %v3970_v13  ;;  %v444_v31 = vmax.f32 %v5280_v26, 0.0  ;;  %v5304_v35 = vadd.f32 %v5103_v20, %v376_v14  ;;  %v378_v39 = vmul.f32 %v3869_v33, %v5098_v19  ;;  %v1961_v16 = vld [vmem:[#allocation2 + $0x92] sm:$0xff]  ;;  %v1963_v26 = vld [vmem:[#allocation2 + $0xaa] sm:$0xff] }
  0x2e   : > { %4225 = vmatmul.mubr.bf16.gmra.mrb[4].mxu1 %v5164_v15  ;;  %v4945_v15 = vld [vmem:[%s5786_s3 + $0x20] sm:$0xff]   ;;  %474 = vst [vmem:[#allocation2 + $0x109] sm:$0xff] %v442_v17  ;;  %v5290_v23 = vadd.f32 %v5103_v20, %v375_v21  ;;  %v445_v32 = vmax.f32 %v5283_v27, 0.0  ;;  %475 = vst [vmem:[#allocation2 + $0x111] sm:$0xff] %v443_v28  ;;  %v1684_v57 = vpack.c.bf16 %v437_v49, %v436_v47  ;;  %v4951_v49 = vld [vmem:[%s5786_s3 + $0x38] sm:$0xff]  }
  0x2f   : > { %4417 = vmatmul.mubr.bf16.gmra.mrb[4].mxu0 %v1680_v45  ;;  %4228 = vmatprep.mubr.bf16.mxu1 %v1680_v45  ;;  %v377_v38 = vmul.f32 %v3868_v24, %v5098_v19  ;;  %476 = vst [vmem:[#allocation2 + $0x121] sm:$0xff] %v444_v31  ;;  %v447_v45 = vmax.f32 %v5304_v35, 0.0  ;;  %v5323_v51 = vadd.f32 %v5103_v20, %v378_v39  ;;  %v1964_v27 = vld [vmem:[#allocation2 + $0xb2] sm:$0xff]  ;;  %v4956_v39 = vld [vmem:[%s5786_s3 + $0x1a8] sm:$0xff]   ;;  %v1967_v35 = vld [vmem:[#allocation2 + $0xda] sm:$0xff] }
  0x30   : > { %4449 = vmatpush3.bf16.msra.mxu0 %v4937_v40  ;;  %4420 = vmatprep.mubr.bf16.mxu0 %v1681_v54  ;;  %v446_v36 = vmax.f32 %v5290_v23, 0.0  ;;  %477 = vst [vmem:[#allocation2 + $0x129] sm:$0xff] %v445_v32  ;;  %v3872_v40 = vunpack.c.l.bf16 %v3971_v29  ;;  %v5344_v0 = vpack.c.bf16 %v1952_v48, %v1951_v44  ;;  %v591_v9 = vpack.c.bf16 %v439_v63, %v438_v58  ;;  %v4948_v58 = vld [vmem:[%s5786_s3 + $0x188] sm:$0xff]  }
  0x31   : > { %4450 = vmatprep.subr.bf16.mxu0 %v4938_v53  ;;  %4257 = vmatpush3.bf16.msra.mxu1 %v4939_v34  ;;  %v4947_v34 = vld [vmem:[%s5786_s3 + $0x28] sm:$0xff]   ;;  %v5320_v46 = vadd.f32 %v5103_v20, %v377_v38  ;;  %479 = vst [vmem:[#allocation2 + $0x141] sm:$0xff] %v447_v45  ;;  %v449_v59 = vmax.f32 %v5323_v51, 0.0  ;;  %v5375_v12 = vpack.c.bf16 %v1954_v4, %v1953_v1  ;;  %v4960_v51 = vld [vmem:[%s5786_s3 + $0x1b8] sm:$0xff]  }
  0x32   : > { %4258 = vmatprep.subr.bf16.mxu1 %v4942_v62  ;;  %478 = vst [vmem:[#allocation2 + $0x139] sm:$0xff] %v446_v36  ;;  %v379_v52 = vmul.f32 %v3872_v40, %v5098_v19  ;;  %v592_v13 = vpack.c.bf16 %v441_v10, %v440_v3  ;;  %v1958_v3 = vld [vmem:[#allocation2 + $0x6a] sm:$0xff]  ;;  %v593_v14 = vpack.c.bf16 %v443_v28, %v442_v17  ;;  %v1962_v17 = vld [vmem:[#allocation2 + $0x9a] sm:$0xff]  ;;  %v1965_v23 = vld [vmem:[#allocation2 + $0xc2] sm:$0xff] }
  0x33   : > { %v448_v56 = vmax.f32 %v5320_v46, 0.0  ;;  %481 = vst [vmem:[#allocation2 + $0x159] sm:$0xff] %v449_v59  ;;  %v4954_v28 = vld [vmem:[%s5786_s3 + $0x1a0] sm:$0xff]   ;;  %v5437_v38 = vpack.c.bf16 %v1964_v27, %v1963_v26  ;;  %v1966_v40 = vld [vmem:[#allocation2 + $0xca] sm:$0xff] }
  0x34   : > { %4451 = vmatpush3.bf16.msra.mxu0 %v4938_v53  ;;  %v380_v53 = vmul.f32 %v3873_v42, %v5098_v19  ;;  %v5339_v61 = vadd.f32 %v5103_v20, %v379_v52  ;;  %v4958_v42 = vld [vmem:[%s5786_s3 + $0x1b0] sm:$0xff]   ;;  %v5453_v44 = vpack.c.bf16 %v1966_v40, %v1965_v23  ;;  %v488_v52 = vld [vmem:[#allocation2 + $0x18] sm:$0xff]  ;;  %v492_v4 = vld [vmem:[#allocation2 + $0x48] sm:$0xff] }
  0x35   : > { %4452 = vmatprep.subr.bf16.mxu0 %v4940_v6  ;;  %4259 = vmatpush3.bf16.msra.mxu1 %v4942_v62  ;;  %480 = vst [vmem:[#allocation2 + $0x151] sm:$0xff] %v448_v56  ;;  %v4961_v26 = vld [vmem:[%s5786_s3 + $0xa0] sm:$0xff]   ;;  %v500_v23 = vld [vmem:[#allocation2 + $0xa8] sm:$0xff]  ;;  %v501_v40 = vld [vmem:[#allocation2 + $0xb0] sm:$0xff] }
  0x36   : > { %4229 = vmatmul.mubr.bf16.gmra.mrb[8].mxu1 %v1681_v54  ;;  %4260 = vmatprep.subr.bf16.mxu1 %v4945_v15  ;;  %v4949_v54 = vld [vmem:[%s5786_s3 + $0x30] sm:$0xff]   ;;  %v5342_v62 = vadd.f32 %v5103_v20, %v380_v53  ;;  %v450_v41 = vmax.f32 %v5339_v61, 0.0  ;;  %v489_v53 = vld [vmem:[#allocation2 + $0x20] sm:$0xff] }
  0x37   : > { %4421 = vmatmul.mubr.bf16.gmra.mrb[8].mxu0 %v1682_v22  ;;  %4232 = vmatprep.mubr.bf16.mxu1 %v1682_v22  ;;  %v1959_v22 = vld [vmem:[#allocation2 + $0x7a] sm:$0xff]  ;;  %v1971_v61 = vld [vmem:[#allocation2 + $0x10a] sm:$0xff] }
  0x38   : > { %4453 = vmatpush3.bf16.msra.mxu0 %v4940_v6  ;;  %4424 = vmatprep.mubr.bf16.mxu0 %v1683_v25  ;;  %v451_v47 = vmax.f32 %v5342_v62, 0.0  ;;  %482 = vst [vmem:[#allocation2 + $0x169] sm:$0xff] %v450_v41  ;;  %v1955_v6 = vld [vmem:[#allocation2 + $0x4a] sm:$0xff]  ;;  %v1972_v62 = vld [vmem:[#allocation2 + $0x112] sm:$0xff] }
  0x39   : > { %4454 = vmatprep.subr.bf16.mxu0 %v4941_v30  ;;  %4261 = vmatpush3.bf16.msra.mxu1 %v4945_v15  ;;  %v3972_v15 = vld [vmem:[%s5086_s21 + $0x78] sm:$0xff]   ;;  %v5382_v18 = vpack.c.bf16 %v1956_v7, %v1955_v6  ;;  %v5477_v1 = vpack.c.bf16 %v1972_v62, %v1971_v61  ;;  %v4955_v6 = vld [vmem:[%s5786_s3 + $0x88] sm:$0xff]   ;;  %v494_v7 = vld [vmem:[#allocation2 + $0x60] sm:$0xff] }
  0x3a   : > { %4262 = vmatprep.subr.bf16.mxu1 %v4947_v34  ;;  %483 = vst [vmem:[#allocation2 + $0x171] sm:$0xff] %v451_v47  ;;  %v3876_v50 = vunpack.c.l.bf16 %v3972_v15  ;;  %v3877_v55 = vunpack.c.h.bf16 %v3972_v15  ;;  %v1974_v15 = vld [vmem:[#allocation2 + $0x12a] sm:$0xff] }
  0x3c   : > { %4455 = vmatpush3.bf16.msra.mxu0 %v4941_v30  ;;  %v381_v60 = vmul.f32 %v3876_v50, %v5098_v19  ;;  %v382_v63 = vmul.f32 %v3877_v55, %v5098_v19  ;;  %v4950_v19 = vld [vmem:[%s5786_s3 + $0x190] sm:$0xff]   ;;  %v5407_v30 = vpack.c.bf16 %v1958_v3, %v1957_v2  ;;  %v1975_v50 = vld [vmem:[#allocation2 + $0x13a] sm:$0xff] }
  0x3d   : > { %4456 = vmatprep.subr.bf16.mxu0 %v4943_v43  ;;  %4263 = vmatpush3.bf16.msra.mxu1 %v4947_v34  ;;  %v596_v34 = vpack.c.bf16 %v449_v59, %v448_v56  ;;  %v490_v56 = vld [vmem:[#allocation2 + $0x30] sm:$0xff]  ;;  %v1970_v59 = vld [vmem:[#allocation2 + $0xfa] sm:$0xff] }
  0x3e   : > { %4233 = vmatmul.mubr.bf16.gmra.mrb[12].mxu1 %v1683_v25  ;;  %4264 = vmatprep.subr.bf16.mxu1 %v4949_v54  ;;  %v5393_v10 = vadd.f32 %v5103_v20, %v381_v60  ;;  %v5396_v21 = vadd.f32 %v5103_v20, %v382_v63  ;;  %v1960_v25 = vld [vmem:[#allocation2 + $0x82] sm:$0xff]  ;;  %v594_v20 = vpack.c.bf16 %v445_v32, %v444_v31  ;;  %v4957_v55 = vld [vmem:[%s5786_s3 + $0x90] sm:$0xff]   ;;  %v496_v3 = vld [vmem:[#allocation2 + $0x78] sm:$0xff] }
  0x3f   : > { %4425 = vmatmul.mubr.bf16.gmra.mrb[12].mxu0 %v1684_v57  ;;  %4236 = vmatprep.mubr.bf16.mxu1 %v1684_v57  ;;  %v5413_v33 = vpack.c.bf16 %v1960_v25, %v1959_v22  ;;  %v595_v31 = vpack.c.bf16 %v447_v45, %v446_v36  ;;  %v5431_v32 = vpack.c.bf16 %v1962_v17, %v1961_v16  ;;  %v1968_v36 = vld [vmem:[#allocation2 + $0xe2] sm:$0xff]  ;;  %v491_v57 = vld [vmem:[#allocation2 + $0x38] sm:$0xff] }
  0x40   : > { %4457 = vmatpush3.bf16.msra.mxu0 %v4943_v43  ;;  %4460 = vmatprep.mubr.bf16.mxu0 %v5344_v0  ;;  %v452_v24 = vmax.f32 %v5393_v10, 0.0  ;;  %v453_v29 = vmax.f32 %v5396_v21, 0.0  ;;  %v5451_v43 = vpack.c.bf16 %v451_v47, %v450_v41  ;;  %v4989_v45 = vld [vmem:[#allocation2] sm:$0xff]  ;;  %v5457_v48 = vpack.c.bf16 %v1968_v36, %v1967_v35  ;;  %v4959_v25 = vld [vmem:[%s5786_s3 + $0x98] sm:$0xff]  }
  0x41   : > { %4458 = vmatprep.subr.bf16.mxu0 %v4944_v37  ;;  %4265 = vmatpush3.bf16.msra.mxu1 %v4949_v54  ;;  %v5455_v46 = vpack.c.bf16 %v4989_v45, %v4989_v45  ;;  %v1969_v54 = vld [vmem:[#allocation2 + $0xf2] sm:$0xff]  ;;  %v5471_v41 = vpack.c.bf16 %v489_v53, %v488_v52  ;;  %v497_v22 = vld [vmem:[#allocation2 + $0x80] sm:$0xff]  ;;  %v1979_v16 = vld [vmem:[#allocation2 + $0x16a] sm:$0xff]  ;;  %v5533_v53 = vpack.c.bf16 %v501_v40, %v500_v23 }
  0x42   : > { %4266 = vmatprep.subr.bf16.mxu1 %v4951_v49  ;;  %484 = vst [vmem:[#allocation2 + $0x181] sm:$0xff] %v452_v24  ;;  %485 = vst [vmem:[#allocation2 + $0x189] sm:$0xff] %v453_v29  ;;  %v5473_v47 = vpack.c.bf16 %v1970_v59, %v1969_v54  ;;  %v1980_v17 = vld [vmem:[#allocation2 + $0x172] sm:$0xff]  ;;  %v5509_v27 = vpack.c.bf16 %v497_v22, %v496_v3  ;;  %v502_v35 = vld [vmem:[#allocation2 + $0xc0] sm:$0xff]  ;;  %v5527_v36 = vpack.c.bf16 %v453_v29, %v452_v24 }
  0x43   : > { %v4965_v52 = vld [vmem:[%s5786_s3 + $0xb0] sm:$0xff]   ;;  %v4967_v10 = vld [vmem:[%s5786_s3 + $0xb8] sm:$0xff]   ;;  %v505_v24 = vld [vmem:[#allocation2 + $0xe0] sm:$0xff] }
  0x44   : > { %4459 = vmatpush3.bf16.msra.mxu0 %v4944_v37  ;;  %v5469_v37 = vld [vmem:[%s5786_s3 + $0x1c0] sm:$0xff]   ;;  %v504_v21 = vld [vmem:[#allocation2 + $0xd8] sm:$0xff]  ;;  %v506_v29 = vld [vmem:[#allocation2 + $0xf0] sm:$0xff] }
  0x45   : > { %4492 = vmatprep.subr.bf16.mxu0 %v4946_v5  ;;  %4267 = vmatpush3.bf16.msra.mxu1 %v4951_v49  ;;  %v5475_v49 = vpack.c.bf16 %v491_v57, %v490_v56  ;;  %v507_v57 = vld [vmem:[#allocation2 + $0xf8] sm:$0xff]  ;;  %v5546_v59 = vld [vmem:[%s5786_s3 + $0xc0] sm:$0xff]   ;;  %v5548_v61 = vpack.c.bf16 %v505_v24, %v504_v21  ;;  %v514_v3 = vld [vmem:[#allocation2 + $0x150] sm:$0xff] }
  0x46   : > { %4237 = vmatmul.mubr.bf16.gmra.mrb[16].mxu1 %v591_v9  ;;  %4300 = vmatprep.subr.bf16.mxu1 %v5373_v11  ;;  %v495_v9 = vld [vmem:[#allocation2 + $0x68] sm:$0xff]  ;;  %v5550_v62 = vpack.c.bf16 %v507_v57, %v506_v29  ;;  %v515_v22 = vld [vmem:[#allocation2 + $0x158] sm:$0xff]  ;;  %v4981_v24 = vld [vmem:[%s5786_s3 + $0xf0] sm:$0xff]  }
  0x47   : > { %4461 = vmatmul.mubr.bf16.vlgmr.msra.gmra.mrb[0].mxu0 %v5375_v12  ;;  %4240 = vmatprep.mubr.bf16.mxu1 %v592_v13  ;;  %v1973_v13 = vld [vmem:[#allocation2 + $0x122] sm:$0xff]  ;;  %v5495_v2 = vpack.c.bf16 %v495_v9, %v494_v7  ;;  %v2565_v21 = vld [vmem:[#allocation2 + $0x39] sm:$0xff]  ;;  %v2567_v57 = vld [vmem:[#allocation2 + $0x51] sm:$0xff] }
  0x48   : > { %4493 = vmatpush3.bf16.msra.mxu0 %v4946_v5  ;;  %4464 = vmatprep.mubr.bf16.mxu0 %v5382_v18  ;;  %v493_v5 = vld [vmem:[#allocation2 + $0x50] sm:$0xff]  ;;  %v5493_v63 = vpack.c.bf16 %v1974_v15, %v1973_v13  ;;  %v510_v7 = vld [vmem:[#allocation2 + $0x120] sm:$0xff]  ;;  %v511_v9 = vld [vmem:[#allocation2 + $0x128] sm:$0xff] }
  0x49   : > { %4494 = vmatprep.subr.bf16.mxu0 %v4948_v58  ;;  %v5491_v60 = vpack.c.bf16 %v493_v5, %v492_v4  ;;  %v1982_v45 = vld [vmem:[#allocation2 + $0x18a] sm:$0xff] }
  0x4a   : > { %v4964_v4 = vld [vmem:[%s5786_s3 + $0x1c8] sm:$0xff]   ;;  %v4966_v13 = vld [vmem:[%s5786_s3 + $0x1d0] sm:$0xff]  }
  0x4b   : > { %v508_v5 = vld [vmem:[#allocation2 + $0x108] sm:$0xff] }
  0x4c   : > { %4495 = vmatpush3.bf16.msra.mxu0 %v4948_v58  ;;  %v1976_v58 = vld [vmem:[#allocation2 + $0x142] sm:$0xff] }
  0x4d   : > { %4496 = vmatprep.subr.bf16.mxu0 %v4950_v19 }
  0x4e   : > { %4241 = vmatmul.mubr.bf16.gmra.mrb[20].mxu1 %v593_v14  ;;  %v1977_v14 = vld [vmem:[#allocation2 + $0x152] sm:$0xff] }
  0x4f   : > { %4465 = vmatmul.mubr.bf16.gmra.mrb[4].mxu0 %v5407_v30  ;;  %4244 = vmatprep.mubr.bf16.mxu1 %v594_v20  ;;  %v1978_v20 = vld [vmem:[#allocation2 + $0x15a] sm:$0xff] }
  0x50   : > { %4468 = vmatprep.mubr.bf16.mxu0 %v5413_v33  ;;  %4497 = vmatpush3.bf16.msra.mxu0 %v4950_v19  ;;  %v498_v19 = vld [vmem:[#allocation2 + $0x90] sm:$0xff] }
  0x51   : > { %4498 = vmatprep.subr.bf16.mxu0 %v4952_v8 }
  0x54   : > { %4499 = vmatpush3.bf16.msra.mxu0 %v4952_v8  ;;  %v499_v8 = vld [vmem:[#allocation2 + $0x98] sm:$0xff] }
  0x55   : > { %4500 = vmatprep.subr.bf16.mxu0 %v4954_v28 }
  0x56   : > { %4245 = vmatmul.mubr.bf16.gmra.mrb[24].mxu1 %v595_v31  ;;  %v5513_v31 = vpack.c.bf16 %v499_v8, %v498_v19  ;;  %v516_v8 = vld [vmem:[#allocation2 + $0x168] sm:$0xff] }
  0x57   : > { %4469 = vmatmul.mubr.bf16.gmra.mrb[8].mxu0 %v5431_v32  ;;  %4248 = vmatprep.mubr.bf16.mxu1 %v596_v34  ;;  %v5515_v34 = vpack.c.bf16 %v1980_v17, %v1979_v16  ;;  %v517_v16 = vld [vmem:[#allocation2 + $0x170] sm:$0xff]  ;;  %v1033_v17 = vld [vmem:[#allocation2 + $0x2] sm:$0xff] }
  0x58   : > { %4472 = vmatprep.mubr.bf16.mxu0 %v5437_v38  ;;  %4501 = vmatpush3.bf16.msra.mxu0 %v4954_v28  ;;  %v5511_v28 = vpack.c.bf16 %v1978_v20, %v1977_v14  ;;  %v5580_v14 = vpack.c.bf16 %v515_v22, %v514_v3  ;;  %v4972_v20 = vld [vmem:[%s5786_s3 + $0x1e8] sm:$0xff]   ;;  %v5592_v23 = vpack.c.bf16 %v517_v16, %v516_v8  ;;  %v2575_v3 = vld [vmem:[#allocation2 + $0xb1] sm:$0xff] }
  0x59   : > { %4502 = vmatprep.subr.bf16.mxu0 %v4956_v39  ;;  %v2576_v22 = vld [vmem:[#allocation2 + $0xc1] sm:$0xff] }
  0x5c   : > { %4503 = vmatpush3.bf16.msra.mxu0 %v4956_v39  ;;  %v4963_v39 = vld [vmem:[%s5786_s3 + $0xa8] sm:$0xff]  }
  0x5d   : > { %4504 = vmatprep.subr.bf16.mxu0 %v4958_v42 }
  0x5e   : > { %4249 = vmatmul.mubr.bf16.gmra.mrb[28].mxu1 %v5451_v43 }
  0x5f   : > { %4473 = vmatmul.mubr.bf16.gmra.mrb[12].mxu0 %v5453_v44  ;;  %4268 = vmatprep.mubr.bf16.mxu1 %v5455_v46 }
  0x60   : > { %4476 = vmatprep.mubr.bf16.mxu0 %v5457_v48  ;;  %4505 = vmatpush3.bf16.msra.mxu0 %v4958_v42  ;;  %v1981_v42 = vld [vmem:[#allocation2 + $0x182] sm:$0xff] }
  0x61   : > { %4506 = vmatprep.subr.bf16.mxu0 %v4960_v51  ;;  %v1998_v54 = vpack.c.bf16 %v1982_v45, %v1981_v42  ;;  %v4978_v42 = vld [vmem:[%s5786_s3 + $0x200] sm:$0xff]   ;;  %v4971_v45 = vld [vmem:[%s5786_s3 + $0xc8] sm:$0xff]  }
  0x64   : > { %4507 = vmatpush3.bf16.msra.mxu0 %v4960_v51  ;;  %v503_v51 = vld [vmem:[#allocation2 + $0xc8] sm:$0xff] }
  0x65   : > { %4540 = vmatprep.subr.bf16.mxu0 %v5469_v37  ;;  %v5535_v56 = vpack.c.bf16 %v503_v51, %v502_v35  ;;  %v4976_v35 = vld [vmem:[%s5786_s3 + $0x1f8] sm:$0xff]   ;;  %v4973_v51 = vld [vmem:[%s5786_s3 + $0xd0] sm:$0xff]  }
  0x66   : > { %4269 = vmatmul.mubr.bf16.vlgmr.msra.gmra.mrb[0].mxu1 %v5471_v41 }
  0x67   : > { %4477 = vmatmul.mubr.bf16.gmra.mrb[16].mxu0 %v5473_v47  ;;  %4301 = vmatpush3.bf16.msra.mxu1 %v5373_v11  ;;  %v5497_v11 = vpack.c.bf16 %v1976_v58, %v1975_v50  ;;  %v5566_v50 = vpack.c.bf16 %v511_v9, %v510_v7  ;;  %v513_v58 = vld [vmem:[#allocation2 + $0x140] sm:$0xff]  ;;  %v4980_v7 = vld [vmem:[%s5786_s3 + $0x208] sm:$0xff]   ;;  %v2572_v9 = vld [vmem:[#allocation2 + $0x91] sm:$0xff] }
  0x68   : > { %4272 = vmatprep.mubr.bf16.mxu1 %v5475_v49  ;;  %4480 = vmatprep.mubr.bf16.mxu0 %v5477_v1 }
  0x69   : > { %4302 = vmatprep.subr.bf16.mxu1 %v4955_v6 }
  0x6b   : > { %4303 = vmatpush3.bf16.msra.mxu1 %v4955_v6  ;;  %v509_v6 = vld [vmem:[#allocation2 + $0x110] sm:$0xff] }
  0x6c   : > { %4304 = vmatprep.subr.bf16.mxu1 %v4957_v55  ;;  %v5564_v15 = vpack.c.bf16 %v509_v6, %v508_v5 }
  0x6e   : > { %4273 = vmatmul.mubr.bf16.gmra.mrb[4].mxu1 %v5491_v60 }
  0x6f   : > { %4481 = vmatmul.mubr.bf16.gmra.mrb[20].mxu0 %v5493_v63  ;;  %4276 = vmatprep.mubr.bf16.mxu1 %v5495_v2 }
  0x70   : > { %4484 = vmatprep.mubr.bf16.mxu0 %v5497_v11  ;;  %4305 = vmatpush3.bf16.msra.mxu1 %v4957_v55  ;;  %v4968_v55 = vld [vmem:[%s5786_s3 + $0x1d8] sm:$0xff]  }
  0x71   : > { %4306 = vmatprep.subr.bf16.mxu1 %v4959_v25 }
  0x74   : > { %4307 = vmatpush3.bf16.msra.mxu1 %v4959_v25  ;;  %v4970_v25 = vld [vmem:[%s5786_s3 + $0x1e0] sm:$0xff]  }
  0x75   : > { %4308 = vmatprep.subr.bf16.mxu1 %v4961_v26 }
  0x76   : > { %4277 = vmatmul.mubr.bf16.gmra.mrb[8].mxu1 %v5509_v27 }
  0x77   : > { %4485 = vmatmul.mubr.bf16.gmra.mrb[24].mxu0 %v5511_v28  ;;  %4280 = vmatprep.mubr.bf16.mxu1 %v5513_v31 }
  0x78   : > { %4488 = vmatprep.mubr.bf16.mxu0 %v5515_v34  ;;  %4309 = vmatpush3.bf16.msra.mxu1 %v4961_v26  ;;  %v1034_v26 = vld [vmem:[#allocation2 + $0xa] sm:$0xff] }
  0x79   : > { %4310 = vmatprep.subr.bf16.mxu1 %v4963_v39  ;;  %v1065_v40 = vpack.c.bf16 %v1034_v26, %v1033_v17  ;;  %v2579_v17 = vld [vmem:[#allocation2 + $0xe1] sm:$0xff]  ;;  %v2580_v26 = vld [vmem:[#allocation2 + $0xf1] sm:$0xff] }
  0x7c   : > { %4311 = vmatpush3.bf16.msra.mxu1 %v4963_v39  ;;  %v4974_v39 = vld [vmem:[%s5786_s3 + $0x1f0] sm:$0xff]  }
  0x7d   : > { %4312 = vmatprep.subr.bf16.mxu1 %v4965_v52 }
  0x7e   : > { %4281 = vmatmul.mubr.bf16.gmra.mrb[12].mxu1 %v5533_v53 }
  0x7f   : > { %4489 = vmatmul.mubr.bf16.gmra.mrb[28].mxu0 %v1998_v54  ;;  %4284 = vmatprep.mubr.bf16.mxu1 %v5535_v56  ;;  %v4977_v54 = vld [vmem:[%s5786_s3 + $0xe0] sm:$0xff]  }
  0x80   : > { %4508 = vmatprep.mubr.bf16.mxu0 %v5475_v49  ;;  %4313 = vmatpush3.bf16.msra.mxu1 %v4965_v52  ;;  %v4975_v52 = vld [vmem:[%s5786_s3 + $0xd8] sm:$0xff]  }
  0x81   : > { %4314 = vmatprep.subr.bf16.mxu1 %v4967_v10 }
  0x84   : > { %4315 = vmatpush3.bf16.msra.mxu1 %v4967_v10 }
  0x85   : > { %4348 = vmatprep.subr.bf16.mxu1 %v5546_v59 }
  0x86   : > { %4285 = vmatmul.mubr.bf16.gmra.mrb[16].mxu1 %v5548_v61 }
  0x87   : > { %4509 = vmatmul.mubr.bf16.vlgmr.msra.gmra.mrb[0].mxu0 %v5491_v60  ;;  %4288 = vmatprep.mubr.bf16.mxu1 %v5550_v62 }
  0x88   : > { %4541 = vmatpush3.bf16.msra.mxu0 %v5469_v37  ;;  %4512 = vmatprep.mubr.bf16.mxu0 %v5495_v2  ;;  %v512_v37 = vld [vmem:[#allocation2 + $0x138] sm:$0xff] }
  0x89   : > { %4542 = vmatprep.subr.bf16.mxu0 %v4964_v4  ;;  %v5578_v19 = vpack.c.bf16 %v513_v58, %v512_v37 }
  0x8c   : > { %4543 = vmatpush3.bf16.msra.mxu0 %v4964_v4  ;;  %v2569_v4 = vld [vmem:[#allocation2 + $0x69] sm:$0xff] }
  0x8d   : > { %4544 = vmatprep.subr.bf16.mxu0 %v4966_v13 }
  0x8e   : > { %4289 = vmatmul.mubr.bf16.gmra.mrb[20].mxu1 %v5564_v15 }
  0x8f   : > { %4513 = vmatmul.mubr.bf16.gmra.mrb[4].mxu0 %v5509_v27  ;;  %4292 = vmatprep.mubr.bf16.mxu1 %v5566_v50 }
  0x90   : > { %4516 = vmatprep.mubr.bf16.mxu0 %v5513_v31  ;;  %4545 = vmatpush3.bf16.msra.mxu0 %v4966_v13  ;;  %v2573_v13 = vld [vmem:[#allocation2 + $0x99] sm:$0xff] }
  0x91   : > { %4546 = vmatprep.subr.bf16.mxu0 %v4968_v55  ;;  %v2600_v58 = vpack.c.bf16 %v2573_v13, %v2572_v9 }
  0x94   : > { %4547 = vmatpush3.bf16.msra.mxu0 %v4968_v55  ;;  %v4982_v55 = vld [vmem:[%s5786_s3 + $0x210] sm:$0xff]  }
  0x95   : > { %4548 = vmatprep.subr.bf16.mxu0 %v4970_v25 }
  0x96   : > { %4293 = vmatmul.mubr.bf16.gmra.mrb[24].mxu1 %v5578_v19 }
  0x97   : > { %4517 = vmatmul.mubr.bf16.gmra.mrb[8].mxu0 %v5533_v53  ;;  %4296 = vmatprep.mubr.bf16.mxu1 %v5580_v14 }
  0x98   : > { %4520 = vmatprep.mubr.bf16.mxu0 %v5535_v56  ;;  %4549 = vmatpush3.bf16.msra.mxu0 %v4970_v25  ;;  %v2577_v25 = vld [vmem:[#allocation2 + $0xc9] sm:$0xff] }
  0x99   : > { %4550 = vmatprep.subr.bf16.mxu0 %v4972_v20  ;;  %v2602_v16 = vpack.c.bf16 %v2577_v25, %v2576_v22  ;;  %v2886_v22 = vld [vmem:[#allocation2 + $0xf2] sm:$0xff] }
  0x9c   : > { %4551 = vmatpush3.bf16.msra.mxu0 %v4972_v20  ;;  %v4985_v20 = vld [vmem:[%s5786_s3 + $0x220] sm:$0xff]  }
  0x9d   : > { %4552 = vmatprep.subr.bf16.mxu0 %v4974_v39 }
  0x9e   : > { %4297 = vmatmul.mubr.bf16.gmra.mrb[28].mxu1 %v5592_v23 }
  0x9f   : > { %4521 = vmatmul.mubr.bf16.gmra.mrb[12].mxu0 %v5548_v61  ;;  %4316 = vmatprep.mubr.bf16.mxu1 %v1065_v40  ;;  %v4987_v40 = vld [vmem:[%s5786_s3 + $0x230] sm:$0xff]  }
  0xa0   : > { %4524 = vmatprep.mubr.bf16.mxu0 %v5550_v62  ;;  %4553 = vmatpush3.bf16.msra.mxu0 %v4974_v39  ;;  %v2581_v39 = vld [vmem:[#allocation2 + $0xf9] sm:$0xff] }
  0xa1   : > { %4554 = vmatprep.subr.bf16.mxu0 %v4976_v35 }
  0xa4   : > { %4555 = vmatpush3.bf16.msra.mxu0 %v4976_v35 }
  0xa5   : > { %4588 = vmatprep.subr.bf16.mxu0 %v4978_v42 }
  0xa6   : > { %4317 = vmatmul.mubr.bf16.vlgmr.msra.gmra.mrb[0].mxu1 %v5344_v0  ;;  %v2286_v0 = vld [vmem:[#allocation2 + $0x180] sm:$0xff] }
  0xa7   : > { %4525 = vmatmul.mubr.bf16.gmra.mrb[16].mxu0 %v5564_v15  ;;  %4349 = vmatpush3.bf16.msra.mxu1 %v5546_v59  ;;  %v2568_v59 = vld [vmem:[#allocation2 + $0x61] sm:$0xff] }
  0xa8   : > { %4320 = vmatprep.mubr.bf16.mxu1 %v5375_v12  ;;  %4528 = vmatprep.mubr.bf16.mxu0 %v5566_v50  ;;  %v2287_v12 = vld [vmem:[#allocation2 + $0x188] sm:$0xff]  ;;  %v2598_v6 = vpack.c.bf16 %v2569_v4, %v2568_v59 }
  0xa9   : > { %4350 = vmatprep.subr.bf16.mxu1 %v4971_v45  ;;  %v5624_v10 = vpack.c.bf16 %v2287_v12, %v2286_v0 }
  0xab   : > { %4351 = vmatpush3.bf16.msra.mxu1 %v4971_v45  ;;  %v2583_v45 = vld [vmem:[#allocation2 + $0x111] sm:$0xff] }
  0xac   : > { %4352 = vmatprep.subr.bf16.mxu1 %v4973_v51 }
  0xae   : > { %4321 = vmatmul.mubr.bf16.gmra.mrb[4].mxu1 %v5382_v18  ;;  %v4979_v18 = vld [vmem:[%s5786_s3 + $0xe8] sm:$0xff]  }
  0xaf   : > { %4529 = vmatmul.mubr.bf16.gmra.mrb[20].mxu0 %v5578_v19  ;;  %4324 = vmatprep.mubr.bf16.mxu1 %v5407_v30  ;;  %v2564_v30 = vld [vmem:[#allocation2 + $0x31] sm:$0xff] }
  0xb0   : > { %4532 = vmatprep.mubr.bf16.mxu0 %v5580_v14  ;;  %4353 = vmatpush3.bf16.msra.mxu1 %v4973_v51  ;;  %v2596_v29 = vpack.c.bf16 %v2565_v21, %v2564_v30  ;;  %v2584_v51 = vld [vmem:[#allocation2 + $0x121] sm:$0xff]  ;;  %v2589_v30 = vld [vmem:[#allocation2 + $0x159] sm:$0xff] }
  0xb1   : > { %4354 = vmatprep.subr.bf16.mxu1 %v4975_v52 }
  0xb4   : > { %4355 = vmatpush3.bf16.msra.mxu1 %v4975_v52  ;;  %v2585_v52 = vld [vmem:[#allocation2 + $0x129] sm:$0xff] }
  0xb5   : > { %4356 = vmatprep.subr.bf16.mxu1 %v4977_v54  ;;  %v5685_v12 = vpack.c.bf16 %v2585_v52, %v2584_v51  ;;  %v2899_v51 = vld [vmem:[#allocation2 + $0x18a] sm:$0xff] }
  0xb6   : > { %4325 = vmatmul.mubr.bf16.gmra.mrb[8].mxu1 %v5413_v33  ;;  %v4983_v33 = vld [vmem:[%s5786_s3 + $0xf8] sm:$0xff]  }
  0xb7   : > { %4533 = vmatmul.mubr.bf16.gmra.mrb[24].mxu0 %v5592_v23  ;;  %4328 = vmatprep.mubr.bf16.mxu1 %v5431_v32  ;;  %v2566_v32 = vld [vmem:[#allocation2 + $0x49] sm:$0xff] }
  0xb8   : > { %4536 = vmatprep.mubr.bf16.mxu0 %v5624_v10  ;;  %4357 = vmatpush3.bf16.msra.mxu1 %v4977_v54  ;;  %v2597_v5 = vpack.c.bf16 %v2567_v57, %v2566_v32  ;;  %v4991_v54 = vld [vmem:[%s5786_s3 + $0x108] sm:$0xff]   ;;  %v2871_v32 = vld [vmem:[#allocation2 + $0x3a] sm:$0xff] }
  0xb9   : > { %4358 = vmatprep.subr.bf16.mxu1 %v4979_v18  ;;  %v4995_v57 = vld [vmem:[%s5786_s3 + $0x128] sm:$0xff]  }
  0xbc   : > { %4359 = vmatpush3.bf16.msra.mxu1 %v4979_v18  ;;  %v2588_v18 = vld [vmem:[#allocation2 + $0x151] sm:$0xff] }
  0xbd   : > { %4360 = vmatprep.subr.bf16.mxu1 %v4981_v24 }
  0xbe   : > { %4329 = vmatmul.mubr.bf16.gmra.mrb[12].mxu1 %v5437_v38  ;;  %v5648_v38 = vld [vmem:[%s5786_s3 + $0x100] sm:$0xff]  }
  0xbf   : > { %4537 = vmatmul.mubr.bf16.gmra.mrb[28].mxu0 %v5455_v46  ;;  %4332 = vmatprep.mubr.bf16.mxu1 %v5453_v44  ;;  %v2570_v44 = vld [vmem:[#allocation2 + $0x79] sm:$0xff]  ;;  %v2571_v46 = vld [vmem:[#allocation2 + $0x81] sm:$0xff] }
  0xc0   : > { %4556 = vmatprep.mubr.bf16.mxu0 %v2596_v29  ;;  %4361 = vmatpush3.bf16.msra.mxu1 %v4981_v24  ;;  %v2599_v37 = vpack.c.bf16 %v2571_v46, %v2570_v44  ;;  %v4993_v24 = vld [vmem:[%s5786_s3 + $0x118] sm:$0xff]   ;;  %v4994_v29 = vld [vmem:[%s5786_s3 + $0x120] sm:$0xff]  }
  0xc1   : > { %4362 = vmatprep.subr.bf16.mxu1 %v4983_v33  ;;  %v2878_v44 = vld [vmem:[#allocation2 + $0x92] sm:$0xff]  ;;  %v2879_v46 = vld [vmem:[#allocation2 + $0x9a] sm:$0xff] }
  0xc2   : > { %v2906_v13 = vpack.c.bf16 %v2879_v46, %v2878_v44 }
  0xc4   : > { %4363 = vmatpush3.bf16.msra.mxu1 %v4983_v33  ;;  %v2870_v33 = vld [vmem:[#allocation2 + $0x32] sm:$0xff] }
  0xc5   : > { %4636 = vmatprep.subr.bf16.mxu1 %v5648_v38  ;;  %v2902_v4 = vpack.c.bf16 %v2871_v32, %v2870_v33 }
  0xc6   : > { %4333 = vmatmul.mubr.bf16.gmra.mrb[16].mxu1 %v5457_v48  ;;  %v4984_v48 = vld [vmem:[%s5786_s3 + $0x218] sm:$0xff]  }
  0xc7   : > { %4557 = vmatmul.mubr.bf16.vlgmr.msra.gmra.mrb[0].mxu0 %v2597_v5  ;;  %4336 = vmatprep.mubr.bf16.mxu1 %v5473_v47  ;;  %v2574_v47 = vld [vmem:[#allocation2 + $0xa9] sm:$0xff] }
  0xc8   : > { %4589 = vmatpush3.bf16.msra.mxu0 %v4978_v42  ;;  %4560 = vmatprep.mubr.bf16.mxu0 %v2598_v6  ;;  %v2601_v8 = vpack.c.bf16 %v2575_v3, %v2574_v47  ;;  %v5674_v42 = vpack.c.bf16 %v2581_v39, %v2580_v26  ;;  %v2875_v5 = vld [vmem:[#allocation2 + $0x6a] sm:$0xff]  ;;  %v4997_v6 = vld [vmem:[%s5786_s3 + $0x138] sm:$0xff]   ;;  %v2885_v3 = vld [vmem:[#allocation2 + $0xe2] sm:$0xff] }
  0xc9   : > { %4590 = vmatprep.subr.bf16.mxu0 %v4980_v7  ;;  %v2894_v26 = vld [vmem:[#allocation2 + $0x152] sm:$0xff] }
  0xcc   : > { %4591 = vmatpush3.bf16.msra.mxu0 %v4980_v7 }
  0xcd   : > { %4592 = vmatprep.subr.bf16.mxu0 %v4982_v55 }
  0xce   : > { %4337 = vmatmul.mubr.bf16.gmra.mrb[20].mxu1 %v5477_v1  ;;  %v4986_v1 = vld [vmem:[%s5786_s3 + $0x228] sm:$0xff]  }
  0xcf   : > { %4561 = vmatmul.mubr.bf16.gmra.mrb[4].mxu0 %v2599_v37  ;;  %4340 = vmatprep.mubr.bf16.mxu1 %v5493_v63  ;;  %v2578_v63 = vld [vmem:[#allocation2 + $0xd9] sm:$0xff] }
  0xd0   : > { %4564 = vmatprep.mubr.bf16.mxu0 %v2600_v58  ;;  %4593 = vmatpush3.bf16.msra.mxu0 %v4982_v55  ;;  %v5672_v35 = vpack.c.bf16 %v2579_v17, %v2578_v63  ;;  %v2880_v55 = vld [vmem:[#allocation2 + $0xaa] sm:$0xff]  ;;  %v2881_v37 = vld [vmem:[#allocation2 + $0xb2] sm:$0xff]  ;;  %v2882_v58 = vld [vmem:[#allocation2 + $0xc2] sm:$0xff] }
  0xd1   : > { %4594 = vmatprep.subr.bf16.mxu0 %v4984_v48  ;;  %v2893_v17 = vld [vmem:[#allocation2 + $0x142] sm:$0xff] }
  0xd4   : > { %4595 = vmatpush3.bf16.msra.mxu0 %v4984_v48  ;;  %v2907_v48 = vpack.c.bf16 %v2881_v37, %v2880_v55 }
  0xd5   : > { %4596 = vmatprep.subr.bf16.mxu0 %v4985_v20 }
  0xd6   : > { %4341 = vmatmul.mubr.bf16.gmra.mrb[24].mxu1 %v5497_v11  ;;  %v4988_v11 = vld [vmem:[%s5786_s3 + $0x238] sm:$0xff]  }
  0xd7   : > { %4565 = vmatmul.mubr.bf16.gmra.mrb[8].mxu0 %v2601_v8  ;;  %4344 = vmatprep.mubr.bf16.mxu1 %v5511_v28  ;;  %v2582_v28 = vld [vmem:[#allocation2 + $0x109] sm:$0xff]  ;;  %v2889_v8 = vld [vmem:[#allocation2 + $0x112] sm:$0xff] }
  0xd8   : > { %4568 = vmatprep.mubr.bf16.mxu0 %v2602_v16  ;;  %4597 = vmatpush3.bf16.msra.mxu0 %v4985_v20  ;;  %v5683_v0 = vpack.c.bf16 %v2583_v45, %v2582_v28  ;;  %v2890_v16 = vld [vmem:[#allocation2 + $0x122] sm:$0xff] }
  0xd9   : > { %4598 = vmatprep.subr.bf16.mxu0 %v4986_v1  ;;  %v1673_v28 = vld [vmem:[#allocation2 + $0x169] sm:$0xff] }
  0xda   : > { %v2898_v45 = vld [vmem:[#allocation2 + $0x182] sm:$0xff] }
  0xdc   : > { %4599 = vmatpush3.bf16.msra.mxu0 %v4986_v1 }
  0xdd   : > { %4600 = vmatprep.subr.bf16.mxu0 %v4987_v40 }
  0xde   : > { %4345 = vmatmul.mubr.bf16.gmra.mrb[28].mxu1 %v5515_v34  ;;  %v2587_v34 = vld [vmem:[#allocation2 + $0x141] sm:$0xff] }
  0xdf   : > { %4569 = vmatmul.mubr.bf16.gmra.mrb[12].mxu0 %v5672_v35  ;;  %4364 = vmatprep.mubr.bf16.mxu1 %v5471_v41  ;;  %v2586_v41 = vld [vmem:[#allocation2 + $0x139] sm:$0xff] }
  0xe0   : > { %4572 = vmatprep.mubr.bf16.mxu0 %v5674_v42  ;;  %4601 = vmatpush3.bf16.msra.mxu0 %v4987_v40  ;;  %v5695_v21 = vpack.c.bf16 %v2587_v34, %v2586_v41  ;;  %v2916_v41 = vpack.c.bf16 %v2899_v51, %v2898_v45  ;;  %v1675_v34 = vld [vmem:[#allocation2 + $0x181] sm:$0xff] }
  0xe1   : > { %4602 = vmatprep.subr.bf16.mxu0 %v4988_v11 }
  0xe4   : > { %4603 = vmatpush3.bf16.msra.mxu0 %v4988_v11  ;;  %v2897_v11 = vld [vmem:[#allocation2 + $0x172] sm:$0xff] }
  0xe6   : > { %4365 = vmatmul.mubr.bf16.vlgmr.msra.gmra.mrb[0].mxu1 %v5475_v49  ;;  %v5697_v49 = vpack.c.bf16 %v2589_v30, %v2588_v18  ;;  %v2901_v18 = vld [vmem:[#allocation2 + $0x1a2] sm:$0xff] }
  0xe7   : > { %4573 = vmatmul.mubr.bf16.gmra.mrb[16].mxu0 %v5683_v0  ;;  %4644 = vmatpush3.bf16.msra.mxu1 %v5648_v38 }
  0xe8   : > { %4368 = vmatprep.mubr.bf16.mxu1 %v5491_v60  ;;  %4576 = vmatprep.mubr.bf16.mxu0 %v5685_v12  ;;  %v4992_v60 = vld [vmem:[%s5786_s3 + $0x110] sm:$0xff]  }
  0xe9   : > { %4637 = vmatprep.subr.bf16.mxu1 %v4991_v54 }
  0xeb   : > { %4645 = vmatpush3.bf16.msra.mxu1 %v4991_v54  ;;  %v1676_v54 = vld [vmem:[#allocation2 + $0x189] sm:$0xff] }
  0xec   : > { %4638 = vmatprep.subr.bf16.mxu1 %v4992_v60  ;;  %v1692_v30 = vpack.c.bf16 %v1676_v54, %v1675_v34 }
  0xee   : > { %4369 = vmatmul.mubr.bf16.gmra.mrb[4].mxu1 %v5495_v2  ;;  %v2594_v2 = vld [vmem:[#allocation2 + $0x199] sm:$0xff] }
  0xef   : > { %4577 = vmatmul.mubr.bf16.gmra.mrb[20].mxu0 %v5695_v21  ;;  %4372 = vmatprep.mubr.bf16.mxu1 %v5509_v27  ;;  %v2595_v27 = vld [vmem:[#allocation2 + $0x1a1] sm:$0xff] }
  0xf0   : > { %4580 = vmatprep.mubr.bf16.mxu0 %v5697_v49  ;;  %4646 = vmatpush3.bf16.msra.mxu1 %v4992_v60  ;;  %v2611_v59 = vpack.c.bf16 %v2595_v27, %v2594_v2 }
  0xf1   : > { %4639 = vmatprep.subr.bf16.mxu1 %v4993_v24 }
  0xf4   : > { %4647 = vmatpush3.bf16.msra.mxu1 %v4993_v24 }
  0xf5   : > { %4640 = vmatprep.subr.bf16.mxu1 %v4994_v29 }
  0xf6   : > { %4373 = vmatmul.mubr.bf16.gmra.mrb[8].mxu1 %v5513_v31  ;;  %v2872_v31 = vld [vmem:[#allocation2 + $0x4a] sm:$0xff] }
  0xf7   : > { %4581 = vmatmul.mubr.bf16.gmra.mrb[24].mxu0 %v5451_v43  ;;  %4376 = vmatprep.mubr.bf16.mxu1 %v5533_v53  ;;  %v4996_v43 = vld [vmem:[%s5786_s3 + $0x130] sm:$0xff]   ;;  %v2874_v53 = vld [vmem:[#allocation2 + $0x62] sm:$0xff] }
  0xf8   : > { %4584 = vmatprep.mubr.bf16.mxu0 %v5527_v36  ;;  %4648 = vmatpush3.bf16.msra.mxu1 %v4994_v29  ;;  %v2873_v36 = vld [vmem:[#allocation2 + $0x52] sm:$0xff]  ;;  %v2904_v38 = vpack.c.bf16 %v2875_v5, %v2874_v53 }
  0xf9   : > { %4641 = vmatprep.subr.bf16.mxu1 %v4995_v57  ;;  %v2903_v7 = vpack.c.bf16 %v2873_v36, %v2872_v31 }
  0xfc   : > { %4649 = vmatpush3.bf16.msra.mxu1 %v4995_v57 }
  0xfd   : > { %4642 = vmatprep.subr.bf16.mxu1 %v4996_v43 }
  0xfe   : > { %4377 = vmatmul.mubr.bf16.gmra.mrb[12].mxu1 %v5535_v56  ;;  %v2876_v56 = vld [vmem:[#allocation2 + $0x7a] sm:$0xff] }
  0xff   : > { %4585 = vmatmul.mubr.bf16.gmra.mrb[28].mxu0 %v2611_v59  ;;  %4380 = vmatprep.mubr.bf16.mxu1 %v5548_v61  ;;  %v2877_v61 = vld [vmem:[#allocation2 + $0x82] sm:$0xff] }
 0x100   : > { %4604 = vmatprep.mubr.bf16.mxu0 %v2902_v4  ;;  %4650 = vmatpush3.bf16.msra.mxu1 %v4996_v43  ;;  %v2905_v9 = vpack.c.bf16 %v2877_v61, %v2876_v56 }
 0x101   : > { %4643 = vmatprep.subr.bf16.mxu1 %v4997_v6 }
 0x104   : > { %4651 = vmatpush3.bf16.msra.mxu1 %v4997_v6 }
 0x106   : > { %4381 = vmatmul.mubr.bf16.gmra.mrb[16].mxu1 %v5550_v62  ;;  %v2883_v62 = vld [vmem:[#allocation2 + $0xca] sm:$0xff] }
 0x107   : > { %4605 = vmatmul.mubr.bf16.vlgmr.msra.gmra.mrb[0].mxu0 %v2903_v7  ;;  %4384 = vmatprep.mubr.bf16.mxu1 %v5564_v15  ;;  %v2908_v47 = vpack.c.bf16 %v2883_v62, %v2882_v58  ;;  %v2884_v15 = vld [vmem:[#allocation2 + $0xda] sm:$0xff] }
 0x108   : > { %4608 = vmatprep.mubr.bf16.mxu0 %v2904_v38  ;;  %v2909_v25 = vpack.c.bf16 %v2885_v3, %v2884_v15 }
 0x10e   : > { %4385 = vmatmul.mubr.bf16.gmra.mrb[20].mxu1 %v5566_v50  ;;  %v2887_v50 = vld [vmem:[#allocation2 + $0xfa] sm:$0xff] }
 0x10f   : > { %4609 = vmatmul.mubr.bf16.gmra.mrb[4].mxu0 %v2905_v9  ;;  %4388 = vmatprep.mubr.bf16.mxu1 %v5578_v19  ;;  %v2910_v20 = vpack.c.bf16 %v2887_v50, %v2886_v22  ;;  %v2888_v19 = vld [vmem:[#allocation2 + $0x10a] sm:$0xff] }
 0x110   : > { %4612 = vmatprep.mubr.bf16.mxu0 %v2906_v13  ;;  %v2911_v1 = vpack.c.bf16 %v2889_v8, %v2888_v19 }
 0x116   : > { %4389 = vmatmul.mubr.bf16.gmra.mrb[24].mxu1 %v5580_v14  ;;  %v2891_v14 = vld [vmem:[#allocation2 + $0x12a] sm:$0xff] }
 0x117   : > { %4613 = vmatmul.mubr.bf16.gmra.mrb[8].mxu0 %v2907_v48  ;;  %4392 = vmatprep.mubr.bf16.mxu1 %v5592_v23  ;;  %v2912_v63 = vpack.c.bf16 %v2891_v14, %v2890_v16  ;;  %v2892_v23 = vld [vmem:[#allocation2 + $0x13a] sm:$0xff] }
 0x118   : > { %4616 = vmatprep.mubr.bf16.mxu0 %v2908_v47  ;;  %v2913_v39 = vpack.c.bf16 %v2893_v17, %v2892_v23 }
 0x11e   : > { %4393 = vmatmul.mubr.bf16.gmra.mrb[28].mxu1 %v5624_v10  ;;  %v2895_v10 = vld [vmem:[#allocation2 + $0x15a] sm:$0xff] }
 0x11f   : > { %4617 = vmatmul.mubr.bf16.gmra.mrb[12].mxu0 %v2909_v25  ;;  %4428 = vmatprep.mubr.bf16.mxu1 %v5672_v35  ;;  %v2914_v40 = vpack.c.bf16 %v2895_v10, %v2894_v26  ;;  %v2896_v35 = vld [vmem:[#allocation2 + $0x16a] sm:$0xff] }
 0x120   : > { %4620 = vmatprep.mubr.bf16.mxu0 %v2910_v20  ;;  %v2915_v52 = vpack.c.bf16 %v2897_v11, %v2896_v35 }
 0x126   : > { %4429 = vmatmul.mubr.bf16.vlgmr.msra.gmra.mrb[16].mxu1 %v5674_v42  ;;  %v1674_v42 = vld [vmem:[#allocation2 + $0x171] sm:$0xff] }
 0x127   : > { %4621 = vmatmul.mubr.bf16.gmra.mrb[16].mxu0 %v2911_v1  ;;  %4432 = vmatprep.mubr.bf16.mxu1 %v5683_v0  ;;  %v1691_v0 = vpack.c.bf16 %v1674_v42, %v1673_v28 }
 0x128   : > { %4624 = vmatprep.mubr.bf16.mxu0 %v2912_v63 }
 0x12e   : > { %4433 = vmatmul.mubr.bf16.gmra.mrb[20].mxu1 %v5685_v12  ;;  %v2900_v12 = vld [vmem:[#allocation2 + $0x19a] sm:$0xff] }
 0x12f   : > { %4625 = vmatmul.mubr.bf16.gmra.mrb[20].mxu0 %v2913_v39  ;;  %4436 = vmatprep.mubr.bf16.mxu1 %v5695_v21  ;;  %v2917_v21 = vpack.c.bf16 %v2901_v18, %v2900_v12 }
 0x130   : > { %4628 = vmatprep.mubr.bf16.mxu0 %v2914_v40 }
 0x136   : > { %4437 = vmatmul.mubr.bf16.gmra.mrb[24].mxu1 %v5697_v49 }
 0x137   : > { %4629 = vmatmul.mubr.bf16.gmra.mrb[24].mxu0 %v2915_v52  ;;  %4440 = vmatprep.mubr.bf16.mxu1 %v1691_v0 }
 0x138   : > { %4632 = vmatprep.mubr.bf16.mxu0 %v2916_v41 }
 0x13e   : > { %4441 = vmatmul.mubr.bf16.gmra.mrb[28].mxu1 %v1692_v30 }
 0x13f   : > { %4633 = vmatmul.mubr.bf16.gmra.mrb[28].mxu0 %v2917_v21 }
 0x1b9   : > { %v4366_v60 = vpop.f32.mrb[0].mxu1 }
 0x1ba   : > { %v1486_v24 = vpop.f32.mrb[1].mxu1 }
 0x1bb   : > { %v4367_v29 = vpop.f32.mrb[2].mxu1 }
 0x1bc   : > { %v1489_v2 = vpop.f32.mrb[3].mxu1 }
 0x1c1   : > { %v4370_v27 = vpop.f32.mrb[4].mxu1 }
 0x1c2   : > { %v1502_v33 = vpop.f32.mrb[5].mxu1 }
 0x1c3   : > { %v4371_v32 = vpop.f32.mrb[6].mxu1 }
 0x1c4   : > { %v1505_v57 = vpop.f32.mrb[7].mxu1 }
 0x1c9   : > { %v4374_v49 = vpop.f32.mrb[8].mxu1 }
 0x1ca   : > { %v1518_v59 = vpop.f32.mrb[9].mxu1 }
 0x1cb   : > { %v4375_v4 = vpop.f32.mrb[10].mxu1 }
 0x1cc   : > { %v1521_v43 = vpop.f32.mrb[11].mxu1 }
 0x1d1   : > { %v5740_v31 = vpop.f32.mrb[12].mxu1 }
 0x1d2   : > { %v5742_v36 = vpop.f32.mrb[13].mxu1 }
 0x1d3   : > { %v5744_v53 = vpop.f32.mrb[14].mxu1 }
 0x1d4   : > { %v5746_v5 = vpop.f32.mrb[15].mxu1 }
 0x1da   : > { %v4606_v6 = vpop.f32.mrb[0].mxu0 }
 0x1db   : > { %v4652_v7 = vadd.f32 %v4606_v6, %v4366_v60  ;;  %v3017_v38 = vpop.f32.mrb[1].mxu0 }
 0x1dc   : > { %v4653_v56 = vadd.f32 %v3017_v38, %v1486_v24  ;;  %v4607_v61 = vpop.f32.mrb[2].mxu0 }
 0x1dd   : > { %v4654_v44 = vadd.f32 %v4607_v61, %v4367_v29  ;;  %v3020_v46 = vpop.f32.mrb[3].mxu0  ;;  %v3375_v48 = vmul.f32 %v4652_v7, %v4652_v7 }
 0x1de   : > { %v4655_v9 = vadd.f32 %v3020_v46, %v1489_v2  ;;  %v3373_v55 = vmul.f32 %v4653_v56, %v4653_v56 }
 0x1df   : > { %v3886_v13 = vpack.c.bf16 %v4654_v44, %v4652_v7  ;;  %v3376_v25 = vmul.f32 %v4654_v44, %v4654_v44 }
 0x1e0   : > { %v3881_v37 = vpack.c.bf16 %v4655_v9, %v4653_v56  ;;  %v3336_v58 = vadd.f32 %v4655_v9, %v4653_v56  ;;  %v3374_v62 = vmul.f32 %v4655_v9, %v4655_v9 }
 0x1e1   : > { %3973 = vst [vmem:[%s5753_s23 + $0x8] sm:$0xff] %v3886_v13  }
 0x1e2   : > { %3882 = vst [vmem:[%s5753_s23] sm:$0xff] %v3881_v37   ;;  %v3337_v47 = vadd.f32 %v4652_v7, %v3336_v58  ;;  %v3405_v15 = vadd.f32 %v3374_v62, %v3373_v55  ;;  %v4610_v3 = vpop.f32.mrb[4].mxu0 }
 0x1e3   : > { %v4656_v22 = vadd.f32 %v4610_v3, %v4370_v27  ;;  %v3033_v50 = vpop.f32.mrb[5].mxu0 }
 0x1e4   : > { %v3406_v20 = vadd.f32 %v3405_v15, %v3375_v48  ;;  %v4657_v19 = vadd.f32 %v3033_v50, %v1502_v33  ;;  %v3338_v8 = vadd.f32 %v4654_v44, %v3337_v47  ;;  %v4611_v16 = vpop.f32.mrb[6].mxu0 }
 0x1e5   : > { %v4658_v14 = vadd.f32 %v4611_v16, %v4371_v32  ;;  %v3036_v1 = vpop.f32.mrb[7].mxu0  ;;  %v3379_v28 = vmul.f32 %v4656_v22, %v4656_v22 }
 0x1e6   : > { %v3339_v63 = vadd.f32 %v4657_v19, %v3338_v8  ;;  %v3377_v23 = vmul.f32 %v4657_v19, %v4657_v19  ;;  %v3407_v17 = vadd.f32 %v3406_v20, %v3376_v25  ;;  %v4659_v26 = vadd.f32 %v3036_v1, %v1505_v57 }
 0x1e7   : > { %v3896_v10 = vpack.c.bf16 %v4658_v14, %v4656_v22  ;;  %v3380_v41 = vmul.f32 %v4658_v14, %v4658_v14 }
 0x1e8   : > { %v3408_v39 = vadd.f32 %v3407_v17, %v3377_v23  ;;  %v3891_v40 = vpack.c.bf16 %v4659_v26, %v4657_v19  ;;  %v3340_v35 = vadd.f32 %v4659_v26, %v3339_v63  ;;  %v3378_v11 = vmul.f32 %v4659_v26, %v4659_v26 }
 0x1e9   : > { %3975 = vst [vmem:[%s5753_s23 + $0x18] sm:$0xff] %v3896_v10  }
 0x1ea   : > { %3974 = vst [vmem:[%s5753_s23 + $0x10] sm:$0xff] %v3891_v40   ;;  %v3341_v42 = vadd.f32 %v4656_v22, %v3340_v35  ;;  %v3409_v45 = vadd.f32 %v3408_v39, %v3378_v11  ;;  %v4614_v51 = vpop.f32.mrb[8].mxu0 }
 0x1eb   : > { %v4660_v52 = vadd.f32 %v4614_v51, %v4374_v49  ;;  %v3049_v0 = vpop.f32.mrb[9].mxu0 }
 0x1ec   : > { %v3410_v34 = vadd.f32 %v3409_v45, %v3379_v28  ;;  %v4661_v54 = vadd.f32 %v3049_v0, %v1518_v59  ;;  %v3342_v12 = vadd.f32 %v4658_v14, %v3341_v42  ;;  %v4615_v18 = vpop.f32.mrb[10].mxu0 }
 0x1ed   : > { %v4662_v30 = vadd.f32 %v4615_v18, %v4375_v4  ;;  %v3052_v21 = vpop.f32.mrb[11].mxu0  ;;  %v3383_v49 = vmul.f32 %v4660_v52, %v4660_v52 }
 0x1ee   : > { %v3343_v60 = vadd.f32 %v4661_v54, %v3342_v12  ;;  %v3381_v24 = vmul.f32 %v4661_v54, %v4661_v54  ;;  %v3411_v29 = vadd.f32 %v3410_v34, %v3380_v41  ;;  %v4663_v2 = vadd.f32 %v3052_v21, %v1521_v43 }
 0x1ef   : > { %v3906_v27 = vpack.c.bf16 %v4662_v30, %v4660_v52  ;;  %v3384_v4 = vmul.f32 %v4662_v30, %v4662_v30 }
 0x1f0   : > { %v3412_v33 = vadd.f32 %v3411_v29, %v3381_v24  ;;  %v3901_v32 = vpack.c.bf16 %v4663_v2, %v4661_v54  ;;  %v3344_v57 = vadd.f32 %v4663_v2, %v3343_v60  ;;  %v3382_v6 = vmul.f32 %v4663_v2, %v4663_v2 }
 0x1f1   : > { %3977 = vst [vmem:[%s5753_s23 + $0x28] sm:$0xff] %v3906_v27  }
 0x1f2   : > { %3976 = vst [vmem:[%s5753_s23 + $0x20] sm:$0xff] %v3901_v32   ;;  %v3345_v7 = vadd.f32 %v4660_v52, %v3344_v57  ;;  %v3413_v38 = vadd.f32 %v3412_v33, %v3382_v6  ;;  %v4618_v59 = vpop.f32.mrb[12].mxu0 }
 0x1f3   : > { %v4664_v56 = vadd.f32 %v4618_v59, %v5740_v31  ;;  %v3065_v61 = vpop.f32.mrb[13].mxu0 }
 0x1f4   : > { %v3414_v44 = vadd.f32 %v3413_v38, %v3383_v49  ;;  %v4665_v46 = vadd.f32 %v3065_v61, %v5742_v36  ;;  %v3346_v43 = vadd.f32 %v4662_v30, %v3345_v7  ;;  %v4619_v9 = vpop.f32.mrb[14].mxu0 }
 0x1f5   : > { %v4666_v13 = vadd.f32 %v4619_v9, %v5744_v53  ;;  %v3068_v55 = vpop.f32.mrb[15].mxu0  ;;  %v3387_v25 = vmul.f32 %v4664_v56, %v4664_v56 }
 0x1f6   : > { %v3347_v37 = vadd.f32 %v4665_v46, %v3346_v43  ;;  %v3385_v58 = vmul.f32 %v4665_v46, %v4665_v46  ;;  %v3415_v62 = vadd.f32 %v3414_v44, %v3384_v4  ;;  %v4667_v48 = vadd.f32 %v3068_v55, %v5746_v5 }
 0x1f7   : > { %v3916_v47 = vpack.c.bf16 %v4666_v13, %v4664_v56  ;;  %v3388_v1 = vmul.f32 %v4666_v13, %v4666_v13 }
 0x1f8   : > { %v3416_v15 = vadd.f32 %v3415_v62, %v3385_v58  ;;  %v3911_v31 = vpack.c.bf16 %v4667_v48, %v4665_v46  ;;  %v3348_v3 = vadd.f32 %v4667_v48, %v3347_v37  ;;  %v3386_v22 = vmul.f32 %v4667_v48, %v4667_v48 }
 0x1f9   : > { %3979 = vst [vmem:[%s5753_s23 + $0x38] sm:$0xff] %v3916_v47   ;;  %v4430_v50 = vpop.f32.mrb[16].mxu1 }
 0x1fa   : > { %3978 = vst [vmem:[%s5753_s23 + $0x30] sm:$0xff] %v3911_v31   ;;  %v3349_v36 = vadd.f32 %v4664_v56, %v3348_v3  ;;  %v3417_v20 = vadd.f32 %v3416_v15, %v3386_v22  ;;  %v4622_v19 = vpop.f32.mrb[16].mxu0  ;;  %v1856_v8 = vpop.f32.mrb[17].mxu1 }
 0x1fb   : > { %v4668_v53 = vadd.f32 %v4622_v19, %v4430_v50  ;;  %v3081_v16 = vpop.f32.mrb[17].mxu0  ;;  %v4431_v14 = vpop.f32.mrb[18].mxu1 }
 0x1fc   : > { %v3418_v63 = vadd.f32 %v3417_v20, %v3387_v25  ;;  %v4669_v5 = vadd.f32 %v3081_v16, %v1856_v8  ;;  %v3350_v23 = vadd.f32 %v4666_v13, %v3349_v36  ;;  %v4623_v17 = vpop.f32.mrb[18].mxu0  ;;  %v1859_v26 = vpop.f32.mrb[19].mxu1 }
 0x1fd   : > { %v4670_v10 = vadd.f32 %v4623_v17, %v4431_v14  ;;  %v3084_v39 = vpop.f32.mrb[19].mxu0  ;;  %v3391_v34 = vmul.f32 %v4668_v53, %v4668_v53 }
 0x1fe   : > { %v3351_v40 = vadd.f32 %v4669_v5, %v3350_v23  ;;  %v3389_v35 = vmul.f32 %v4669_v5, %v4669_v5  ;;  %v3419_v11 = vadd.f32 %v3418_v63, %v3388_v1  ;;  %v4671_v28 = vadd.f32 %v3084_v39, %v1859_v26 }
 0x1ff   : > { %v3926_v42 = vpack.c.bf16 %v4670_v10, %v4668_v53  ;;  %v3392_v29 = vmul.f32 %v4670_v10, %v4670_v10 }
 0x200   : > { %v3420_v45 = vadd.f32 %v3419_v11, %v3389_v35  ;;  %v3921_v51 = vpack.c.bf16 %v4671_v28, %v4669_v5  ;;  %v3352_v52 = vadd.f32 %v4671_v28, %v3351_v40  ;;  %v3390_v0 = vmul.f32 %v4671_v28, %v4671_v28 }
 0x201   : > { %3981 = vst [vmem:[%s5753_s23 + $0x48] sm:$0xff] %v3926_v42   ;;  %v4434_v41 = vpop.f32.mrb[20].mxu1 }
 0x202   : > { %3980 = vst [vmem:[%s5753_s23 + $0x40] sm:$0xff] %v3921_v51   ;;  %v3353_v54 = vadd.f32 %v4668_v53, %v3352_v52  ;;  %v3421_v12 = vadd.f32 %v3420_v45, %v3390_v0  ;;  %v4626_v18 = vpop.f32.mrb[20].mxu0  ;;  %v1872_v30 = vpop.f32.mrb[21].mxu1 }
 0x203   : > { %v4672_v21 = vadd.f32 %v4626_v18, %v4434_v41  ;;  %v3097_v60 = vpop.f32.mrb[21].mxu0  ;;  %v4435_v24 = vpop.f32.mrb[22].mxu1 }
 0x204   : > { %v3422_v2 = vadd.f32 %v3421_v12, %v3391_v34  ;;  %v4673_v27 = vadd.f32 %v3097_v60, %v1872_v30  ;;  %v3354_v33 = vadd.f32 %v4670_v10, %v3353_v54  ;;  %v4627_v32 = vpop.f32.mrb[22].mxu0  ;;  %v1875_v57 = vpop.f32.mrb[23].mxu1 }
 0x205   : > { %v4674_v6 = vadd.f32 %v4627_v32, %v4435_v24  ;;  %v3100_v49 = vpop.f32.mrb[23].mxu0  ;;  %v3395_v13 = vmul.f32 %v4672_v21, %v4672_v21 }
 0x206   : > { %v3355_v7 = vadd.f32 %v4673_v27, %v3354_v33  ;;  %v3393_v38 = vmul.f32 %v4673_v27, %v4673_v27  ;;  %v3423_v59 = vadd.f32 %v3422_v2, %v3392_v29  ;;  %v4675_v56 = vadd.f32 %v3100_v49, %v1875_v57 }
 0x207   : > { %v3936_v61 = vpack.c.bf16 %v4674_v6, %v4672_v21  ;;  %v3396_v31 = vmul.f32 %v4674_v6, %v4674_v6 }
 0x208   : > { %v3424_v4 = vadd.f32 %v3423_v59, %v3393_v38  ;;  %v3931_v44 = vpack.c.bf16 %v4675_v56, %v4673_v27  ;;  %v3356_v46 = vadd.f32 %v4675_v56, %v3355_v7  ;;  %v3394_v43 = vmul.f32 %v4675_v56, %v4675_v56 }
 0x209   : > { %3983 = vst [vmem:[%s5753_s23 + $0x58] sm:$0xff] %v3936_v61   ;;  %v4438_v9 = vpop.f32.mrb[24].mxu1 }
 0x20a   : > { %3982 = vst [vmem:[%s5753_s23 + $0x50] sm:$0xff] %v3931_v44   ;;  %v3357_v55 = vadd.f32 %v4672_v21, %v3356_v46  ;;  %v3425_v37 = vadd.f32 %v3424_v4, %v3394_v43  ;;  %v4630_v58 = vpop.f32.mrb[24].mxu0  ;;  %v1888_v62 = vpop.f32.mrb[25].mxu1  ;;  %v3442_v46 = vlaneseq }
 0x20b   : > { %v4676_v48 = vadd.f32 %v4630_v58, %v4438_v9  ;;  %v3113_v47 = vpop.f32.mrb[25].mxu0  ;;  %v4439_v15 = vpop.f32.mrb[26].mxu1 }
 0x20c   : > { %v3426_v3 = vadd.f32 %v3425_v37, %v3395_v13  ;;  %v4677_v22 = vadd.f32 %v3113_v47, %v1888_v62  ;;  %v3358_v50 = vadd.f32 %v4674_v6, %v3357_v55  ;;  %v4631_v25 = vpop.f32.mrb[26].mxu0  ;;  %v1891_v36 = vpop.f32.mrb[27].mxu1  ;;  %v3443_v37 = vshrl.u32 %v3442_v46, 7 }
 0x20d   : > { %v4678_v20 = vadd.f32 %v4631_v25, %v4439_v15  ;;  %v3116_v19 = vpop.f32.mrb[27].mxu0  ;;  %v3399_v10 = vmul.f32 %v4676_v48, %v4676_v48 }
 0x20e   : > { %v3359_v8 = vadd.f32 %v4677_v22, %v3358_v50  ;;  %v3397_v53 = vmul.f32 %v4677_v22, %v4677_v22  ;;  %v3427_v16 = vadd.f32 %v3426_v3, %v3396_v31  ;;  %v4679_v14 = vadd.f32 %v3116_v19, %v1891_v36 }
 0x20f   : > { %v3946_v1 = vpack.c.bf16 %v4678_v20, %v4676_v48  ;;  %v3400_v51 = vmul.f32 %v4678_v20, %v4678_v20  ;;  %vm3445_vm0 = vcmp.eq.s32.totalorder %v3443_v37, 1  ;;  %vm3444_vm1 = vcmp.eq.s32.totalorder %v3443_v37, 0 }
 0x210   : > { %v3428_v63 = vadd.f32 %v3427_v16, %v3397_v53  ;;  %v3941_v5 = vpack.c.bf16 %v4679_v14, %v4677_v22  ;;  %v3360_v23 = vadd.f32 %v4679_v14, %v3359_v8  ;;  %v3398_v17 = vmul.f32 %v4679_v14, %v4679_v14 }
 0x211   : > { %3985 = vst [vmem:[%s5753_s23 + $0x68] sm:$0xff] %v3946_v1   ;;  %v4442_v26 = vpop.f32.mrb[28].mxu1 }
 0x212   : > { %3984 = vst [vmem:[%s5753_s23 + $0x60] sm:$0xff] %v3941_v5   ;;  %v3361_v39 = vadd.f32 %v4676_v48, %v3360_v23  ;;  %v3429_v40 = vadd.f32 %v3428_v63, %v3398_v17  ;;  %v4634_v35 = vpop.f32.mrb[28].mxu0  ;;  %v1904_v11 = vpop.f32.mrb[29].mxu1 }
 0x213   : > { %v4680_v28 = vadd.f32 %v4634_v35, %v4442_v26  ;;  %v3129_v42 = vpop.f32.mrb[29].mxu0  ;;  %v4443_v45 = vpop.f32.mrb[30].mxu1 }
 0x214   : > { %v3430_v52 = vadd.f32 %v3429_v40, %v3399_v10  ;;  %v4681_v0 = vadd.f32 %v3129_v42, %v1904_v11  ;;  %v3362_v41 = vadd.f32 %v4678_v20, %v3361_v39  ;;  %v4635_v34 = vpop.f32.mrb[30].mxu0  ;;  %v1907_v54 = vpop.f32.mrb[31].mxu1 }
 0x215   : > { %v4682_v12 = vadd.f32 %v4635_v34, %v4443_v45  ;;  %v3132_v18 = vpop.f32.mrb[31].mxu0  ;;  %v3403_v57 = vmul.f32 %v4680_v28, %v4680_v28 }
 0x216   : > { %v3363_v30 = vadd.f32 %v4681_v0, %v3362_v41  ;;  %v3401_v21 = vmul.f32 %v4681_v0, %v4681_v0  ;;  %v3431_v60 = vadd.f32 %v3430_v52, %v3400_v51  ;;  %v4683_v24 = vadd.f32 %v3132_v18, %v1907_v54 }
 0x217   : > { %v3956_v29 = vpack.c.bf16 %v4682_v12, %v4680_v28  ;;  %v3404_v7 = vmul.f32 %v4682_v12, %v4682_v12 }
 0x218   : > { %v3432_v2 = vadd.f32 %v3431_v60, %v3401_v21  ;;  %v3951_v27 = vpack.c.bf16 %v4683_v24, %v4681_v0  ;;  %v3364_v33 = vadd.f32 %v4683_v24, %v3363_v30  ;;  %v3402_v32 = vmul.f32 %v4683_v24, %v4683_v24 }
 0x219   : > { %3987 = vst [vmem:[%s5753_s23 + $0x78] sm:$0xff] %v3956_v29  }
 0x21a   : > { %3986 = vst [vmem:[%s5753_s23 + $0x70] sm:$0xff] %v3951_v27   ;;  %v3365_v6 = vadd.f32 %v4680_v28, %v3364_v33  ;;  %v3433_v49 = vadd.f32 %v3432_v2, %v3402_v32 }
 0x21c   : > { %v3366_v38 = vadd.f32 %v4682_v12, %v3365_v6  ;;  %v3434_v59 = vadd.f32 %v3433_v49, %v3403_v57 }
 0x21e   : > { %v3367_v56 = vrot.slane %v3366_v38, 4  ;;  %v3435_v61 = vadd.f32 %v3434_v59, %v3404_v7 }
 0x220   : > { %v3368_v4 = vadd.f32 %v3367_v56, %v3366_v38  ;;  %v3436_v44 = vrot.slane %v3435_v61, 4 }
 0x222   : > { %v3369_v43 = vrot.slane %v3368_v4, 2  ;;  %v3437_v9 = vadd.f32 %v3436_v44, %v3435_v61 }
 0x224   : > { %v3370_v13 = vadd.f32 %v3369_v43, %v3368_v4  ;;  %v3438_v55 = vrot.slane %v3437_v9, 2 }
 0x226   : > { %v3439_v58 = vadd.f32 %v3438_v55, %v3437_v9  ;;  %v3371_v62 = vrot.slane %v3370_v13, 1 }
 0x228   : > { %v3440_v48 = vrot.slane %v3439_v58, 1  ;;  %v3372_v15 = vadd.f32 %v3371_v62, %v3370_v13 }
 0x22a   : > { %v3441_v47 = vadd.f32 %v3440_v48, %v3439_v58 }
 0x22c   : > { %v3446_v31 = vsel %vm3445_vm0, %v3441_v47, 0.0 }
 0x22d   : > { %v3447_v3 = vsel %vm3444_vm1, %v3372_v15, %v3446_v31 }
 0x22e   : > { %3448 = vst [vmem:[%s238_s26] sm:$0xff] %v3447_v3 }
 0x22f PF: > { %s16_s18 = sadd.s32 1, %s5004_s18  }
 0x230   : > { %p13_p5 = scmp.ge.s32.totalorder %s16_s18, 4  }
 0x232   :  { %15 = sbr.rel (!%p13_p5) target bundleno = 1 (0x1), region = 89 }

// kernel: dense_block.7
= control target key start
LH: loop header
LB: loop body
LE: loop exit
PB: predicated region body
PF: predicated region fallthrough
CT: control target
= control target key end

     0   :  { %11 = vsyncpa [#allocation4], 0  ;;  %s5969_s0 = inlined_call_operand.vmem [shape: bf16[512,128], index: 0, kind: input, shape index: {}]   ;;  %s5970_s1 = inlined_call_operand.vmem [shape: f32[1,128], index: 1, kind: input, shape index: {}]   ;;  %s5971_s2 = inlined_call_operand.vmem [shape: f32[1,128], index: 2, kind: input, shape index: {}]   ;;  %s5972_s3 = inlined_call_operand.vmem [shape: bf16[9,128,128], index: 3, kind: input, shape index: {}]   ;;  %s5973_s4 = inlined_call_operand.vmem [shape: bf16[512,128], index: 4, kind: output, shape index: {0}]   ;;  %s5974_s5 = inlined_call_operand.hbm [shape: f32[2,8,128], index: 5, kind: output, shape index: {1}]  }
   0x1   :  { %13 = vsyncpa [#allocation4 + $0x1], 0  ;;  %s5146_s18 = smov 0   ;;  %s5148_s19 = smov 0  }
   0x2   :  { %s5150_s20 = smov 0   ;;  %s5152_s21 = smov 0  }
   0x3 LB: > { %s5167_s22 = sadd.s32 4294967295, %s5112_s21   ;;  %s3556_s23 = sadd.s32 4294967294, %s5112_s21   ;;  %s5112_s21 = sphi %s5152_s21, %s5980_s21   ;;  %s5108_s20 = sphi %s5150_s20, %s5979_s20   ;;  %s5104_s19 = sphi %s5148_s19, %s5978_s19   ;;  %s5100_s18 = sphi %s5146_s18, %s5977_s18  }
   0x4   : > { %s5171_s24 = sadd.s32 1, %s5112_s21   ;;  %s141_s25 = sadd.s32 1, %s5108_s20 }
   0x5   : > { %s138_s26 = ssub.s32 %s5112_s21, %s5171_s24  ;;  %p151_p0 = scmp.ne.s32.totalorder %s5108_s20, %s5104_s19 }
   0x6   : > { %p139_p1 = scmp.eq.s32.totalorder %s138_s26, 0  ;;  %p152_p2 = scmp.eq.s32.totalorder %s5167_s22, 1 }
   0x7   : > { %p157_p3 = scmp.ne.s32.totalorder %s5104_s19, %s5100_s18  ;;  %p158_p4 = scmp.eq.s32.totalorder %s3556_s23, 1 }
   0x8   : > { %s5182_s27 = scalar_select %p139_p1, %s5108_s20, %s141_s25  }
   0x9   : > { %p5184_p5 = por %p152_p2, %p151_p0  ;;  %p5188_p6 = por %p158_p4, %p157_p3 }
   0xa   : > { %p3559_p7 = scmp.ge.s32.totalorder %s5112_s21, 1  ;;  %p194_p8 = scmp.lt.s32.totalorder %s5112_s21, 3 }
   0xc   : > { %p195_p9 = pnand %p3559_p7, %p194_p8 }
   0xd   : > { %v4969_v0 = vld [vmem:[%s5972_s3 + $0x40] sm:$0xff] (!%p195_p9)   ;;  %v5114_v2 = vmov (!%p195_p9), 0.0   ;;  %s3561_s9 = sshll.u32 (!%p195_p9), %s5167_s22, 5  ;;  %v4971_v3 = vld [vmem:[%s5972_s3 + $0x48] sm:$0xff] (!%p195_p9)   ;;  %v4973_v5 = vld [vmem:[%s5972_s3 + $0x50] sm:$0xff] (!%p195_p9)   ;;  %s3800_s11 = sshll.u32 (!%p195_p9), %s5167_s22, 7 }
   0xe   : > { %198 = sbr.rel (%p195_p9) target bundleno = 580 (0x244), region = 36  ;;  %v4970_v1 = vld [vmem:[%s5972_s3 + $0x100] sm:$0xff] (!%p195_p9)   ;;  %240 = vst [vmem:[#allocation2] sm:$0xff] (!%p195_p9), %v5114_v2  ;;  %241 = vst [vmem:[#allocation2 + $0x8] sm:$0xff] (!%p195_p9), %v5114_v2  ;;  %4225 = vmatprep.subr.bf16.mxu1 (!%p195_p9), %v4969_v0  ;;  %p228_p10 = scmp.lt.s32.totalorder (!%p195_p9), %s3561_s9, 63  ;;  %v4972_v4 = vld [vmem:[%s5972_s3 + $0x108] sm:$0xff] (!%p195_p9)  }
   0xf   : > { %242 = vst [vmem:[#allocation2 + $0x10] sm:$0xff] (!%p195_p9), %v5114_v2  ;;  %244 = vst [vmem:[#allocation2 + $0x198] sm:$0xff] (!%p195_p9), %v5114_v2  ;;  %4417 = vmatprep.subr.bf16.mxu0 (!%p195_p9), %v4970_v1  ;;  %4226 = vmatpush3.bf16.msra.mxu1 (!%p195_p9), %v4969_v0  ;;  %v4974_v6 = vld [vmem:[%s5972_s3 + $0x110] sm:$0xff] (!%p195_p9)   ;;  %v4975_v7 = vld [vmem:[%s5972_s3 + $0x58] sm:$0xff] (!%p195_p9)   ;;  %s5115_s23 = smov (!%p195_p9), [#allocation3]  }
  0x10   : > { %245 = vst [vmem:[#allocation2 + $0x1a0] sm:$0xff] (!%p195_p9), %v5114_v2  ;;  %246 = vst [vmem:[#allocation2 + $0x1a8] sm:$0xff] (!%p195_p9), %v5114_v2  ;;  %4418 = vmatpush3.bf16.msra.mxu0 (!%p195_p9), %v4970_v1  ;;  %4227 = vmatprep.subr.bf16.mxu1 (!%p195_p9), %v4971_v3  ;;  %v4976_v8 = vld [vmem:[%s5972_s3 + $0x118] sm:$0xff] (!%p195_p9)   ;;  %v4977_v9 = vld [vmem:[%s5972_s3 + $0x60] sm:$0xff] (!%p195_p9)   ;;  %s5054_s25 = sshll.u32 (!%p195_p9), %s5115_s23, 4  ;;  %s5055_s25 = int_to_ptr.vmem [resolvable:$false] %s5054_s25 }
  0x11   : > { %248 = vst [vmem:[#allocation2 + $0x18] sm:$0xff] (!%p195_p9), %v5114_v2  ;;  %249 = vst [vmem:[#allocation2 + $0x30] sm:$0xff] (!%p195_p9), %v5114_v2  ;;  %4419 = vmatprep.subr.bf16.mxu0 (!%p195_p9), %v4972_v4  ;;  %v4978_v10 = vld [vmem:[%s5972_s3 + $0x120] sm:$0xff] (!%p195_p9)   ;;  %v4979_v11 = vld [vmem:[%s5972_s3 + $0x68] sm:$0xff] (!%p195_p9)   ;;  %s5056_s26 = scalar_lea.vmem (!%p195_p9), %s5055_s25, 256 }
  0x12   : > { %250 = vst [vmem:[#allocation2 + $0x48] sm:$0xff] (!%p195_p9), %v5114_v2  ;;  %251 = vst [vmem:[#allocation2 + $0x60] sm:$0xff] (!%p195_p9), %v5114_v2  ;;  %v4980_v15 = vld [vmem:[%s5972_s3 + $0x128] sm:$0xff] (!%p195_p9)   ;;  %v5245_v19 = vld [vmem:[%s5970_s1] ss:$0 sm:$0xff] (!%p195_p9) }
  0x13   : > { %252 = vst [vmem:[#allocation2 + $0x78] sm:$0xff] (!%p195_p9), %v5114_v2  ;;  %253 = vst [vmem:[#allocation2 + $0x90] sm:$0xff] (!%p195_p9), %v5114_v2  ;;  %4228 = vmatpush3.bf16.msra.mxu1 (!%p195_p9), %v4971_v3  ;;  %v5250_v20 = vld [vmem:[%s5971_s2] ss:$0 sm:$0xff] (!%p195_p9)  ;;  %v4981_v22 = vld [vmem:[%s5972_s3 + $0x70] sm:$0xff] (!%p195_p9)  }
  0x14   : > { %254 = vst [vmem:[#allocation2 + $0xa8] sm:$0xff] (!%p195_p9), %v5114_v2  ;;  %255 = vst [vmem:[#allocation2 + $0xc0] sm:$0xff] (!%p195_p9), %v5114_v2  ;;  %4420 = vmatpush3.bf16.msra.mxu0 (!%p195_p9), %v4972_v4  ;;  %4229 = vmatprep.subr.bf16.mxu1 (!%p195_p9), %v4973_v5  ;;  %v4982_v27 = vld [vmem:[%s5972_s3 + $0x130] sm:$0xff] (!%p195_p9)   ;;  %v4983_v36 = vld [vmem:[%s5972_s3 + $0x78] sm:$0xff] (!%p195_p9)  }
  0x15   : > { %256 = vst [vmem:[#allocation2 + $0xd8] sm:$0xff] %v5114_v2  ;;  %257 = vst [vmem:[#allocation2 + $0xf0] sm:$0xff] %v5114_v2  ;;  %s5982_s9 = smov (!%p228_p10, %s3561_s9), 63  ;;  %4421 = vmatprep.subr.bf16.mxu0 %v4974_v6  ;;  %v550_v12 = vld [vmem:[#allocation2 + $0x1] sm:$0xff]  ;;  %v4984_v37 = vld [vmem:[%s5972_s3 + $0x138] sm:$0xff]  }
  0x16   : > { %258 = vst [vmem:[#allocation2 + $0x108] sm:$0xff] %v5114_v2  ;;  %259 = vst [vmem:[#allocation2 + $0x120] sm:$0xff] %v5114_v2  ;;  %s3562_s6 = sshll.u32 %s5982_s9, 2  ;;  %v551_v13 = vld [vmem:[#allocation2 + $0x9] sm:$0xff]  ;;  %v4985_v59 = vld [vmem:[%s5972_s3] sm:$0xff]   ;;  %s224_s9 = sand.u32 1, %s5104_s19  }
  0x17   : > { %260 = vst [vmem:[#allocation2 + $0x138] sm:$0xff] %v5114_v2  ;;  %261 = vst [vmem:[#allocation2 + $0x150] sm:$0xff] %v5114_v2  ;;  %4230 = vmatpush3.bf16.msra.mxu1 %v4973_v5  ;;  %s5233_s14 = scalar_lea.vmem %s5969_s0, %s3562_s6  ;;  %v582_v16 = vpack.c.bf16 %v551_v13, %v550_v12  ;;  %v4986_v1 = vld [vmem:[%s5972_s3 + $0x140] sm:$0xff]   ;;  %s5900_s10 = scalar_lea.vmem %s5973_s4, %s3562_s6 }
  0x18   : > { %262 = vst [vmem:[#allocation2 + $0x168] sm:$0xff] %v5114_v2  ;;  %263 = vst [vmem:[#allocation2 + $0x180] sm:$0xff] %v5114_v2  ;;  %4422 = vmatpush3.bf16.msra.mxu0 %v4974_v6  ;;  %4231 = vmatprep.subr.bf16.mxu1 %v4975_v7  ;;  %v3836_v14 = vld [vmem:[%s5233_s14] sm:$0xff]   ;;  %v3979_v21 = vld [vmem:[%s5233_s14 + $0x8] sm:$0xff]   ;;  %s3560_s6 = sshll.u32 %s224_s9, 3  ;;  %s3455_s17 = scalar_lea.sflag [#allocation4], %s224_s9 }
  0x19   : > { %264 = vst [vmem:[#allocation2 + $0x28] sm:$0xff] %v5114_v2  ;;  %265 = vst [vmem:[#allocation2 + $0x40] sm:$0xff] %v5114_v2  ;;  %4423 = vmatprep.subr.bf16.mxu0 %v4976_v8  ;;  %v3837_v17 = vunpack.c.l.bf16 %v3836_v14  ;;  %v3838_v18 = vunpack.c.h.bf16 %v3836_v14  ;;  %4241 = vmatprep.mubr.bf16.mxu1 %v582_v16  ;;  %v3841_v25 = vunpack.c.l.bf16 %v3979_v21  ;;  %v3842_v26 = vunpack.c.h.bf16 %v3979_v21  ;;  %v3980_v32 = vld [vmem:[%s5233_s14 + $0x10] sm:$0xff]   ;;  %v3981_v35 = vld [vmem:[%s5233_s14 + $0x18] sm:$0xff]   ;;  %s226_s12 = scalar_lea.vmem [#allocation3], %s3560_s6 }
  0x1a   : > { %266 = vst [vmem:[#allocation2 + $0x58] sm:$0xff] %v5114_v2  ;;  %267 = vst [vmem:[#allocation2 + $0x70] sm:$0xff] %v5114_v2  ;;  %v3845_v33 = vunpack.c.l.bf16 %v3980_v32  ;;  %v3846_v34 = vunpack.c.h.bf16 %v3980_v32  ;;  %v3849_v44 = vunpack.c.l.bf16 %v3981_v35  ;;  %v3850_v45 = vunpack.c.h.bf16 %v3981_v35  ;;  %v3982_v46 = vld [vmem:[%s5233_s14 + $0x20] sm:$0xff]   ;;  %v3983_v55 = vld [vmem:[%s5233_s14 + $0x28] sm:$0xff]   ;;  %s3472_s13 = sshll.u32 %s226_s12, 4  ;;  %s5929_s13 = int_to_ptr.vmem [resolvable:$true] %s3472_s13 }
  0x1b   : > { %268 = vst [vmem:[#allocation2 + $0x88] sm:$0xff] %v5114_v2  ;;  %269 = vst [vmem:[#allocation2 + $0xa0] sm:$0xff] %v5114_v2  ;;  %4232 = vmatpush3.bf16.msra.mxu1 %v4975_v7  ;;  %v351_v23 = vmul.f32 %v3837_v17, %v5245_v19  ;;  %v352_v24 = vmul.f32 %v3838_v18, %v5245_v19  ;;  %v353_v30 = vmul.f32 %v3841_v25, %v5245_v19  ;;  %v3984_v0 = vld [vmem:[%s5233_s14 + $0x30] sm:$0xff]   ;;  %v4987_v21 = vld [vmem:[%s5972_s3 + $0x148] sm:$0xff]   ;;  %s5050_s22 = scalar_lea.vmem %s5929_s13, 128  ;;  %p5057_p0 = scmp.lt.s32.totalorder %s5929_s13, %s5055_s25 }
  0x1c   : > { %270 = vst [vmem:[#allocation2 + $0xb8] sm:$0xff] %v5114_v2  ;;  %271 = vst [vmem:[#allocation2 + $0xd0] sm:$0xff] %v5114_v2  ;;  %4424 = vmatpush3.bf16.msra.mxu0 %v4976_v8  ;;  %4233 = vmatprep.subr.bf16.mxu1 %v4977_v9  ;;  %v354_v31 = vmul.f32 %v3842_v26, %v5245_v19  ;;  %v355_v42 = vmul.f32 %v3845_v33, %v5245_v19  ;;  %v3853_v50 = vunpack.c.l.bf16 %v3982_v46  ;;  %v3986_v26 = vld [vmem:[%s5233_s14 + $0x40] sm:$0xff]   ;;  %p5051_p11 = scmp.ne.s32.totalorder %s5929_s13, %s5050_s22  ;;  %p5058_p1 = scmp.lt.s32.totalorder %s5056_s26, %s5050_s22 }
  0x1d   : > { %272 = vst [vmem:[#allocation2 + $0xe8] sm:$0xff] %v5114_v2  ;;  %273 = vst [vmem:[#allocation2 + $0x100] sm:$0xff] %v5114_v2  ;;  %4425 = vmatprep.subr.bf16.mxu0 %v4978_v10  ;;  %v390_v28 = vadd.f32 %v5250_v20, %v351_v23  ;;  %v391_v29 = vadd.f32 %v5250_v20, %v352_v24  ;;  %v392_v40 = vadd.f32 %v5250_v20, %v353_v30 }
  0x1e   : > { %274 = vst [vmem:[#allocation2 + $0x118] sm:$0xff] %v5114_v2  ;;  %275 = vst [vmem:[#allocation2 + $0x130] sm:$0xff] %v5114_v2  ;;  %v393_v41 = vadd.f32 %v5250_v20, %v354_v31  ;;  %v356_v43 = vmul.f32 %v3846_v34, %v5245_v19  ;;  %v394_v51 = vadd.f32 %v5250_v20, %v355_v42  ;;  %v3854_v56 = vunpack.c.h.bf16 %v3982_v46  ;;  %v4991_v34 = vld [vmem:[%s5972_s3 + $0x10] sm:$0xff]   ;;  %p5052_p12 = pnand %p5051_p11, %p5184_p5  ;;  %p5059_p2 = por %p5058_p1, %p5057_p0 }
  0x1f   : > { %276 = vst [vmem:[#allocation2 + $0x148] sm:$0xff] %v5114_v2  ;;  %277 = vst [vmem:[#allocation2 + $0x160] sm:$0xff] %v5114_v2  ;;  %4234 = vmatpush3.bf16.msra.mxu1 %v4977_v9  ;;  %v422_v38 = vmax.f32 %v390_v28, 0.0  ;;  %v423_v39 = vmax.f32 %v391_v29, 0.0  ;;  %v424_v48 = vmax.f32 %v392_v40, 0.0  ;;  %v357_v53 = vmul.f32 %v3849_v44, %v5245_v19  ;;  %v4989_v40 = vld [vmem:[%s5972_s3 + $0x150] sm:$0xff]  }
  0x20   : > { %278 = vst [vmem:[#allocation2 + $0x178] sm:$0xff] %v5114_v2  ;;  %279 = vst [vmem:[#allocation2 + $0x190] sm:$0xff] %v5114_v2  ;;  %4426 = vmatpush3.bf16.msra.mxu0 %v4978_v10  ;;  %4235 = vmatprep.subr.bf16.mxu1 %v4979_v11  ;;  %v425_v49 = vmax.f32 %v393_v41, 0.0  ;;  %v395_v52 = vadd.f32 %v5250_v20, %v356_v43  ;;  %v358_v54 = vmul.f32 %v3850_v45, %v5245_v19  ;;  %v3985_v10 = vld [vmem:[%s5233_s14 + $0x38] sm:$0xff]   ;;  %v3988_v44 = vld [vmem:[%s5233_s14 + $0x50] sm:$0xff]   ;;  %p5053_p13 = pneg %p5052_p12 }
  0x21   : > { %4427 = vmatprep.subr.bf16.mxu0 %v4980_v15  ;;  %454 = vst [vmem:[#allocation2 + $0x19] sm:$0xff] %v422_v38  ;;  %455 = vst [vmem:[#allocation2 + $0x21] sm:$0xff] %v423_v39  ;;  %v1677_v47 = vpack.c.bf16 %v423_v39, %v422_v38  ;;  %v359_v57 = vmul.f32 %v3853_v50, %v5245_v19  ;;  %v3857_v58 = vunpack.c.l.bf16 %v3983_v55  ;;  %v426_v60 = vmax.f32 %v394_v51, 0.0  ;;  %v3987_v39 = vld [vmem:[%s5233_s14 + $0x48] sm:$0xff]  }
  0x22   : > { %456 = vst [vmem:[#allocation2 + $0x31] sm:$0xff] %v424_v48  ;;  %457 = vst [vmem:[#allocation2 + $0x39] sm:$0xff] %v425_v49  ;;  %v427_v61 = vmax.f32 %v395_v52, 0.0  ;;  %v5288_v62 = vadd.f32 %v5250_v20, %v357_v53  ;;  %v5291_v63 = vadd.f32 %v5250_v20, %v358_v54  ;;  %v360_v2 = vmul.f32 %v3854_v56, %v5245_v19  ;;  %v4990_v53 = vld [vmem:[%s5972_s3 + $0x158] sm:$0xff]   ;;  %p5060_p3 = pnand %p5059_p2, %p5053_p13 }
  0x23   : > { %4236 = vmatpush3.bf16.msra.mxu1 %v4979_v11  ;;  %4433 = vmatprep.mubr.bf16.mxu0 %v1677_v47  ;;  %v5299_v3 = vadd.f32 %v5250_v20, %v359_v57  ;;  %v3858_v4 = vunpack.c.h.bf16 %v3983_v55  ;;  %v361_v5 = vmul.f32 %v3857_v58, %v5245_v19  ;;  %v1678_v6 = vpack.c.bf16 %v425_v49, %v424_v48  ;;  %v3989_v57 = vld [vmem:[%s5233_s14 + $0x58] sm:$0xff]  }
  0x24   : > { %4428 = vmatpush3.bf16.msra.mxu0 %v4980_v15  ;;  %4237 = vmatprep.subr.bf16.mxu1 %v4981_v22  ;;  %458 = vst [vmem:[#allocation2 + $0x49] sm:$0xff] %v426_v60  ;;  %459 = vst [vmem:[#allocation2 + $0x51] sm:$0xff] %v427_v61  ;;  %v428_v7 = vmax.f32 %v5288_v62, 0.0  ;;  %v429_v8 = vmax.f32 %v5291_v63, 0.0  ;;  %v3861_v9 = vunpack.c.l.bf16 %v3984_v0  ;;  %v399_v11 = vadd.f32 %v5250_v20, %v360_v2  ;;  %v4994_v62 = vld [vmem:[%s5972_s3 + $0x18] sm:$0xff]  }
  0x25   : > { %4429 = vmatprep.subr.bf16.mxu0 %v4982_v27  ;;  %v430_v12 = vmax.f32 %v5299_v3, 0.0  ;;  %v362_v13 = vmul.f32 %v3858_v4, %v5245_v19  ;;  %v5309_v14 = vadd.f32 %v5250_v20, %v361_v5  ;;  %v5311_v15 = vpack.c.bf16 %v427_v61, %v426_v60  ;;  %v3990_v61 = vld [vmem:[%s5233_s14 + $0x60] sm:$0xff]  }
  0x26   : > { %460 = vst [vmem:[#allocation2 + $0x61] sm:$0xff] %v428_v7  ;;  %461 = vst [vmem:[#allocation2 + $0x69] sm:$0xff] %v429_v8  ;;  %v3862_v16 = vunpack.c.h.bf16 %v3984_v0  ;;  %v363_v17 = vmul.f32 %v3861_v9, %v5245_v19  ;;  %v3865_v18 = vunpack.c.l.bf16 %v3985_v10  ;;  %v3866_v25 = vunpack.c.h.bf16 %v3985_v10 }
  0x27   : > { %4238 = vmatpush3.bf16.msra.mxu1 %v4981_v22  ;;  %v431_v22 = vmax.f32 %v399_v11, 0.0  ;;  %462 = vst [vmem:[#allocation2 + $0x79] sm:$0xff] %v430_v12  ;;  %v5318_v23 = vadd.f32 %v5250_v20, %v362_v13  ;;  %v432_v24 = vmax.f32 %v5309_v14, 0.0  ;;  %v3869_v33 = vunpack.c.l.bf16 %v3986_v26  ;;  %v3991_v13 = vld [vmem:[%s5233_s14 + $0x68] sm:$0xff]  }
  0x28   : > { %4430 = vmatpush3.bf16.msra.mxu0 %v4982_v27  ;;  %4239 = vmatprep.subr.bf16.mxu1 %v4983_v36  ;;  %v4988_v27 = vld [vmem:[%s5972_s3 + $0x8] sm:$0xff]   ;;  %v364_v28 = vmul.f32 %v3862_v16, %v5245_v19  ;;  %v5327_v29 = vadd.f32 %v5250_v20, %v363_v17  ;;  %v365_v30 = vmul.f32 %v3865_v18, %v5245_v19  ;;  %v3870_v38 = vunpack.c.h.bf16 %v3986_v26 }
  0x29   : > { %4431 = vmatprep.subr.bf16.mxu0 %v4984_v37  ;;  %463 = vst [vmem:[#allocation2 + $0x81] sm:$0xff] %v431_v22  ;;  %v433_v31 = vmax.f32 %v5318_v23, 0.0  ;;  %464 = vst [vmem:[#allocation2 + $0x91] sm:$0xff] %v432_v24  ;;  %v366_v32 = vmul.f32 %v3866_v25, %v5245_v19  ;;  %v367_v42 = vmul.f32 %v3869_v33, %v5245_v19  ;;  %v3873_v43 = vunpack.c.l.bf16 %v3987_v39 }
  0x2a   : > { %v5338_v35 = vadd.f32 %v5250_v20, %v364_v28  ;;  %v1680_v45 = vpack.c.bf16 %v429_v8, %v428_v7  ;;  %v368_v48 = vmul.f32 %v3870_v38, %v5245_v19  ;;  %v3874_v51 = vunpack.c.h.bf16 %v3987_v39 }
  0x2b   : > { %4240 = vmatpush3.bf16.msra.mxu1 %v4983_v36  ;;  %v434_v36 = vmax.f32 %v5327_v29, 0.0  ;;  %465 = vst [vmem:[#allocation2 + $0x99] sm:$0xff] %v433_v31  ;;  %v5352_v41 = vadd.f32 %v5250_v20, %v366_v32  ;;  %v5363_v50 = vadd.f32 %v5250_v20, %v367_v42  ;;  %v369_v52 = vmul.f32 %v3873_v43, %v5245_v19  ;;  %v3992_v29 = vld [vmem:[%s5233_s14 + $0x70] sm:$0xff]  }
  0x2c   : > { %4432 = vmatpush3.bf16.msra.mxu0 %v4984_v37  ;;  %4273 = vmatprep.subr.bf16.mxu1 %v4985_v59  ;;  %v5342_v37 = vadd.f32 %v5250_v20, %v365_v30  ;;  %v435_v46 = vmax.f32 %v5338_v35, 0.0  ;;  %v1681_v54 = vpack.c.bf16 %v431_v22, %v430_v12  ;;  %v5372_v55 = vadd.f32 %v5250_v20, %v368_v48  ;;  %v4993_v30 = vld [vmem:[%s5972_s3 + $0x168] sm:$0xff]   ;;  %v4995_v43 = vld [vmem:[%s5972_s3 + $0x170] sm:$0xff]  }
  0x2d   : > { %4465 = vmatprep.subr.bf16.mxu0 %v4986_v1  ;;  %466 = vst [vmem:[#allocation2 + $0xa9] sm:$0xff] %v434_v36  ;;  %v437_v49 = vmax.f32 %v5352_v41, 0.0  ;;  %v3877_v56 = vunpack.c.l.bf16 %v3988_v44  ;;  %v438_v58 = vmax.f32 %v5363_v50, 0.0  ;;  %v5380_v60 = vadd.f32 %v5250_v20, %v369_v52  ;;  %v1952_v48 = vld [vmem:[#allocation2 + $0x22] sm:$0xff] }
  0x2e   : > { %4242 = vmatmul.mubr.bf16.vlgmr.msra.gmra.mrb[0].mxu1 %v1677_v47  ;;  %v436_v47 = vmax.f32 %v5342_v37, 0.0  ;;  %467 = vst [vmem:[#allocation2 + $0xb1] sm:$0xff] %v435_v46  ;;  %v439_v63 = vmax.f32 %v5372_v55, 0.0  ;;  %v3878_v0 = vunpack.c.h.bf16 %v3988_v44  ;;  %v3881_v4 = vunpack.c.l.bf16 %v3989_v57  ;;  %v1951_v44 = vld [vmem:[#allocation2 + $0x1a] sm:$0xff] }
  0x2f   : > { %4434 = vmatmul.mubr.bf16.vlgmr.msra.gmra.mrb[0].mxu0 %v1678_v6  ;;  %4274 = vmatpush3.bf16.msra.mxu1 %v4985_v59  ;;  %469 = vst [vmem:[#allocation2 + $0xc9] sm:$0xff] %v437_v49  ;;  %v370_v59 = vmul.f32 %v3874_v51, %v5245_v19  ;;  %470 = vst [vmem:[#allocation2 + $0xd9] sm:$0xff] %v438_v58  ;;  %v440_v3 = vmax.f32 %v5380_v60, 0.0  ;;  %v3882_v5 = vunpack.c.h.bf16 %v3989_v57  ;;  %v3885_v9 = vunpack.c.l.bf16 %v3990_v61  ;;  %v4996_v37 = vld [vmem:[%s5972_s3 + $0x178] sm:$0xff]  }
  0x30   : > { %4466 = vmatpush3.bf16.msra.mxu0 %v4986_v1  ;;  %4245 = vmatprep.mubr.bf16.mxu1 %v1678_v6  ;;  %468 = vst [vmem:[#allocation2 + $0xc1] sm:$0xff] %v436_v47  ;;  %v371_v1 = vmul.f32 %v3877_v56, %v5245_v19  ;;  %v4992_v6 = vld [vmem:[%s5972_s3 + $0x160] sm:$0xff]   ;;  %471 = vst [vmem:[#allocation2 + $0xe1] sm:$0xff] %v439_v63  ;;  %v372_v7 = vmul.f32 %v3878_v0, %v5245_v19  ;;  %v3886_v18 = vunpack.c.h.bf16 %v3990_v61 }
  0x31   : > { %4467 = vmatprep.subr.bf16.mxu0 %v4987_v21  ;;  %4437 = vmatprep.mubr.bf16.mxu0 %v5311_v15  ;;  %v5392_v2 = vadd.f32 %v5250_v20, %v370_v59  ;;  %472 = vst [vmem:[#allocation2 + $0xf1] sm:$0xff] %v440_v3  ;;  %v373_v11 = vmul.f32 %v3881_v4, %v5245_v19  ;;  %v3890_v33 = vunpack.c.h.bf16 %v3991_v13  ;;  %v3894_v42 = vunpack.c.h.bf16 %v3992_v29  ;;  %v1954_v4 = vld [vmem:[#allocation2 + $0x3a] sm:$0xff] }
  0x32   : > { %4275 = vmatprep.subr.bf16.mxu1 %v4988_v27  ;;  %v5402_v8 = vadd.f32 %v5250_v20, %v371_v1  ;;  %v374_v12 = vmul.f32 %v3882_v5, %v5245_v19  ;;  %v5414_v16 = vadd.f32 %v5250_v20, %v372_v7  ;;  %v1682_v22 = vpack.c.bf16 %v433_v31, %v432_v24  ;;  %v1953_v1 = vld [vmem:[#allocation2 + $0x32] sm:$0xff]  ;;  %v4998_v5 = vld [vmem:[%s5972_s3 + $0x180] sm:$0xff]  }
  0x33   : > { %4276 = vmatpush3.bf16.msra.mxu1 %v4988_v27  ;;  %v441_v10 = vmax.f32 %v5392_v2, 0.0  ;;  %v1683_v25 = vpack.c.bf16 %v435_v46, %v434_v36  ;;  %v5427_v26 = vadd.f32 %v5250_v20, %v373_v11  ;;  %v376_v14 = vmul.f32 %v3886_v18, %v5245_v19  ;;  %v1956_v7 = vld [vmem:[#allocation2 + $0x52] sm:$0xff]  ;;  %v5520_v11 = vld [vmem:[%s5972_s3 + $0x80] sm:$0xff]  }
  0x34   : > { %4468 = vmatpush3.bf16.msra.mxu0 %v4987_v21  ;;  %4277 = vmatprep.subr.bf16.mxu1 %v4991_v34  ;;  %v442_v17 = vmax.f32 %v5402_v8, 0.0  ;;  %v375_v21 = vmul.f32 %v3885_v9, %v5245_v19  ;;  %v5430_v27 = vadd.f32 %v5250_v20, %v374_v12  ;;  %v443_v28 = vmax.f32 %v5414_v16, 0.0  ;;  %v1957_v2 = vld [vmem:[#allocation2 + $0x62] sm:$0xff]  ;;  %v5004_v8 = vld [vmem:[%s5972_s3 + $0x198] sm:$0xff]  }
  0x35   : > { %4469 = vmatprep.subr.bf16.mxu0 %v4989_v40  ;;  %473 = vst [vmem:[#allocation2 + $0xf9] sm:$0xff] %v441_v10  ;;  %v3889_v24 = vunpack.c.l.bf16 %v3991_v13  ;;  %v444_v31 = vmax.f32 %v5427_v26, 0.0  ;;  %v5451_v35 = vadd.f32 %v5250_v20, %v376_v14  ;;  %v378_v39 = vmul.f32 %v3890_v33, %v5245_v19  ;;  %v1961_v16 = vld [vmem:[#allocation2 + $0x92] sm:$0xff]  ;;  %v1963_v26 = vld [vmem:[#allocation2 + $0xaa] sm:$0xff] }
  0x36   : > { %4246 = vmatmul.mubr.bf16.gmra.mrb[4].mxu1 %v5311_v15  ;;  %v4997_v15 = vld [vmem:[%s5972_s3 + $0x20] sm:$0xff]   ;;  %474 = vst [vmem:[#allocation2 + $0x109] sm:$0xff] %v442_v17  ;;  %v5437_v23 = vadd.f32 %v5250_v20, %v375_v21  ;;  %v445_v32 = vmax.f32 %v5430_v27, 0.0  ;;  %475 = vst [vmem:[#allocation2 + $0x111] sm:$0xff] %v443_v28  ;;  %v1684_v57 = vpack.c.bf16 %v437_v49, %v436_v47  ;;  %v5003_v49 = vld [vmem:[%s5972_s3 + $0x38] sm:$0xff]  }
  0x37   : > { %4438 = vmatmul.mubr.bf16.gmra.mrb[4].mxu0 %v1680_v45  ;;  %4249 = vmatprep.mubr.bf16.mxu1 %v1680_v45  ;;  %v377_v38 = vmul.f32 %v3889_v24, %v5245_v19  ;;  %476 = vst [vmem:[#allocation2 + $0x121] sm:$0xff] %v444_v31  ;;  %v447_v45 = vmax.f32 %v5451_v35, 0.0  ;;  %v5470_v51 = vadd.f32 %v5250_v20, %v378_v39  ;;  %v1964_v27 = vld [vmem:[#allocation2 + $0xb2] sm:$0xff]  ;;  %v5008_v39 = vld [vmem:[%s5972_s3 + $0x1a8] sm:$0xff]   ;;  %v1967_v35 = vld [vmem:[#allocation2 + $0xda] sm:$0xff] }
  0x38   : > { %4470 = vmatpush3.bf16.msra.mxu0 %v4989_v40  ;;  %4441 = vmatprep.mubr.bf16.mxu0 %v1681_v54  ;;  %v446_v36 = vmax.f32 %v5437_v23, 0.0  ;;  %477 = vst [vmem:[#allocation2 + $0x129] sm:$0xff] %v445_v32  ;;  %v3893_v40 = vunpack.c.l.bf16 %v3992_v29  ;;  %v5491_v0 = vpack.c.bf16 %v1952_v48, %v1951_v44  ;;  %v591_v9 = vpack.c.bf16 %v439_v63, %v438_v58  ;;  %v5000_v58 = vld [vmem:[%s5972_s3 + $0x188] sm:$0xff]  }
  0x39   : > { %4471 = vmatprep.subr.bf16.mxu0 %v4990_v53  ;;  %4278 = vmatpush3.bf16.msra.mxu1 %v4991_v34  ;;  %v4999_v34 = vld [vmem:[%s5972_s3 + $0x28] sm:$0xff]   ;;  %v5467_v46 = vadd.f32 %v5250_v20, %v377_v38  ;;  %479 = vst [vmem:[#allocation2 + $0x141] sm:$0xff] %v447_v45  ;;  %v449_v59 = vmax.f32 %v5470_v51, 0.0  ;;  %v5522_v12 = vpack.c.bf16 %v1954_v4, %v1953_v1  ;;  %v5012_v51 = vld [vmem:[%s5972_s3 + $0x1b8] sm:$0xff]  }
  0x3a   : > { %4279 = vmatprep.subr.bf16.mxu1 %v4994_v62  ;;  %478 = vst [vmem:[#allocation2 + $0x139] sm:$0xff] %v446_v36  ;;  %v379_v52 = vmul.f32 %v3893_v40, %v5245_v19  ;;  %v592_v13 = vpack.c.bf16 %v441_v10, %v440_v3  ;;  %v1958_v3 = vld [vmem:[#allocation2 + $0x6a] sm:$0xff]  ;;  %v593_v14 = vpack.c.bf16 %v443_v28, %v442_v17  ;;  %v1962_v17 = vld [vmem:[#allocation2 + $0x9a] sm:$0xff]  ;;  %v1965_v23 = vld [vmem:[#allocation2 + $0xc2] sm:$0xff] }
  0x3b   : > { %v448_v56 = vmax.f32 %v5467_v46, 0.0  ;;  %481 = vst [vmem:[#allocation2 + $0x159] sm:$0xff] %v449_v59  ;;  %v5006_v28 = vld [vmem:[%s5972_s3 + $0x1a0] sm:$0xff]   ;;  %v5584_v38 = vpack.c.bf16 %v1964_v27, %v1963_v26  ;;  %v1966_v40 = vld [vmem:[#allocation2 + $0xca] sm:$0xff] }
  0x3c   : > { %4472 = vmatpush3.bf16.msra.mxu0 %v4990_v53  ;;  %v380_v53 = vmul.f32 %v3894_v42, %v5245_v19  ;;  %v5486_v61 = vadd.f32 %v5250_v20, %v379_v52  ;;  %v5010_v42 = vld [vmem:[%s5972_s3 + $0x1b0] sm:$0xff]   ;;  %v5600_v44 = vpack.c.bf16 %v1966_v40, %v1965_v23  ;;  %v488_v52 = vld [vmem:[#allocation2 + $0x18] sm:$0xff]  ;;  %v492_v4 = vld [vmem:[#allocation2 + $0x48] sm:$0xff] }
  0x3d   : > { %4473 = vmatprep.subr.bf16.mxu0 %v4992_v6  ;;  %4280 = vmatpush3.bf16.msra.mxu1 %v4994_v62  ;;  %480 = vst [vmem:[#allocation2 + $0x151] sm:$0xff] %v448_v56  ;;  %v5013_v26 = vld [vmem:[%s5972_s3 + $0xa0] sm:$0xff]   ;;  %v500_v23 = vld [vmem:[#allocation2 + $0xa8] sm:$0xff]  ;;  %v501_v40 = vld [vmem:[#allocation2 + $0xb0] sm:$0xff] }
  0x3e   : > { %4250 = vmatmul.mubr.bf16.gmra.mrb[8].mxu1 %v1681_v54  ;;  %4281 = vmatprep.subr.bf16.mxu1 %v4997_v15  ;;  %v5001_v54 = vld [vmem:[%s5972_s3 + $0x30] sm:$0xff]   ;;  %v5489_v62 = vadd.f32 %v5250_v20, %v380_v53  ;;  %v450_v41 = vmax.f32 %v5486_v61, 0.0  ;;  %v489_v53 = vld [vmem:[#allocation2 + $0x20] sm:$0xff] }
  0x3f   : > { %4442 = vmatmul.mubr.bf16.gmra.mrb[8].mxu0 %v1682_v22  ;;  %4253 = vmatprep.mubr.bf16.mxu1 %v1682_v22  ;;  %v1959_v22 = vld [vmem:[#allocation2 + $0x7a] sm:$0xff]  ;;  %v1971_v61 = vld [vmem:[#allocation2 + $0x10a] sm:$0xff] }
  0x40   : > { %4474 = vmatpush3.bf16.msra.mxu0 %v4992_v6  ;;  %4445 = vmatprep.mubr.bf16.mxu0 %v1683_v25  ;;  %v451_v47 = vmax.f32 %v5489_v62, 0.0  ;;  %482 = vst [vmem:[#allocation2 + $0x169] sm:$0xff] %v450_v41  ;;  %v1955_v6 = vld [vmem:[#allocation2 + $0x4a] sm:$0xff]  ;;  %v1972_v62 = vld [vmem:[#allocation2 + $0x112] sm:$0xff] }
  0x41   : > { %4475 = vmatprep.subr.bf16.mxu0 %v4993_v30  ;;  %4282 = vmatpush3.bf16.msra.mxu1 %v4997_v15  ;;  %v3993_v15 = vld [vmem:[%s5233_s14 + $0x78] sm:$0xff]   ;;  %v5529_v18 = vpack.c.bf16 %v1956_v7, %v1955_v6  ;;  %v5624_v1 = vpack.c.bf16 %v1972_v62, %v1971_v61  ;;  %v5007_v6 = vld [vmem:[%s5972_s3 + $0x88] sm:$0xff]   ;;  %v494_v7 = vld [vmem:[#allocation2 + $0x60] sm:$0xff]  ;;  %s5927_s14 = scalar_lea.hbm %s5974_s5, %s3800_s11 }
  0x42   : > { %4283 = vmatprep.subr.bf16.mxu1 %v4999_v34  ;;  %483 = vst [vmem:[#allocation2 + $0x171] sm:$0xff] %v451_v47  ;;  %v3897_v50 = vunpack.c.l.bf16 %v3993_v15  ;;  %v3898_v55 = vunpack.c.h.bf16 %v3993_v15  ;;  %v1974_v15 = vld [vmem:[#allocation2 + $0x12a] sm:$0xff] }
  0x44   : > { %4476 = vmatpush3.bf16.msra.mxu0 %v4993_v30  ;;  %v381_v60 = vmul.f32 %v3897_v50, %v5245_v19  ;;  %v382_v63 = vmul.f32 %v3898_v55, %v5245_v19  ;;  %v5002_v19 = vld [vmem:[%s5972_s3 + $0x190] sm:$0xff]   ;;  %v5554_v30 = vpack.c.bf16 %v1958_v3, %v1957_v2  ;;  %v1975_v50 = vld [vmem:[#allocation2 + $0x13a] sm:$0xff] }
  0x45   : > { %4477 = vmatprep.subr.bf16.mxu0 %v4995_v43  ;;  %4284 = vmatpush3.bf16.msra.mxu1 %v4999_v34  ;;  %v596_v34 = vpack.c.bf16 %v449_v59, %v448_v56  ;;  %v490_v56 = vld [vmem:[#allocation2 + $0x30] sm:$0xff]  ;;  %v1970_v59 = vld [vmem:[#allocation2 + $0xfa] sm:$0xff] }
  0x46   : > { %4254 = vmatmul.mubr.bf16.gmra.mrb[12].mxu1 %v1683_v25  ;;  %4285 = vmatprep.subr.bf16.mxu1 %v5001_v54  ;;  %v5540_v10 = vadd.f32 %v5250_v20, %v381_v60  ;;  %v5543_v21 = vadd.f32 %v5250_v20, %v382_v63  ;;  %v1960_v25 = vld [vmem:[#allocation2 + $0x82] sm:$0xff]  ;;  %v594_v20 = vpack.c.bf16 %v445_v32, %v444_v31  ;;  %v5009_v55 = vld [vmem:[%s5972_s3 + $0x90] sm:$0xff]   ;;  %v496_v3 = vld [vmem:[#allocation2 + $0x78] sm:$0xff] }
  0x47   : > { %4446 = vmatmul.mubr.bf16.gmra.mrb[12].mxu0 %v1684_v57  ;;  %4257 = vmatprep.mubr.bf16.mxu1 %v1684_v57  ;;  %v5560_v33 = vpack.c.bf16 %v1960_v25, %v1959_v22  ;;  %v595_v31 = vpack.c.bf16 %v447_v45, %v446_v36  ;;  %v5578_v32 = vpack.c.bf16 %v1962_v17, %v1961_v16  ;;  %v1968_v36 = vld [vmem:[#allocation2 + $0xe2] sm:$0xff]  ;;  %v491_v57 = vld [vmem:[#allocation2 + $0x38] sm:$0xff] }
  0x48   : > { %4478 = vmatpush3.bf16.msra.mxu0 %v4995_v43  ;;  %4481 = vmatprep.mubr.bf16.mxu0 %v5491_v0  ;;  %v452_v24 = vmax.f32 %v5540_v10, 0.0  ;;  %v453_v29 = vmax.f32 %v5543_v21, 0.0  ;;  %v5598_v43 = vpack.c.bf16 %v451_v47, %v450_v41  ;;  %v5041_v45 = vld [vmem:[#allocation2] sm:$0xff]  ;;  %v5604_v48 = vpack.c.bf16 %v1968_v36, %v1967_v35  ;;  %v5011_v25 = vld [vmem:[%s5972_s3 + $0x98] sm:$0xff]  }
  0x49   : > { %4479 = vmatprep.subr.bf16.mxu0 %v4996_v37  ;;  %4286 = vmatpush3.bf16.msra.mxu1 %v5001_v54  ;;  %v5602_v46 = vpack.c.bf16 %v5041_v45, %v5041_v45  ;;  %v1969_v54 = vld [vmem:[#allocation2 + $0xf2] sm:$0xff]  ;;  %v5618_v41 = vpack.c.bf16 %v489_v53, %v488_v52  ;;  %v497_v22 = vld [vmem:[#allocation2 + $0x80] sm:$0xff]  ;;  %v1979_v16 = vld [vmem:[#allocation2 + $0x16a] sm:$0xff]  ;;  %v5680_v53 = vpack.c.bf16 %v501_v40, %v500_v23 }
  0x4a   : > { %4287 = vmatprep.subr.bf16.mxu1 %v5003_v49  ;;  %484 = vst [vmem:[#allocation2 + $0x181] sm:$0xff] %v452_v24  ;;  %485 = vst [vmem:[#allocation2 + $0x189] sm:$0xff] %v453_v29  ;;  %v5620_v47 = vpack.c.bf16 %v1970_v59, %v1969_v54  ;;  %v1980_v17 = vld [vmem:[#allocation2 + $0x172] sm:$0xff]  ;;  %v5656_v27 = vpack.c.bf16 %v497_v22, %v496_v3  ;;  %v502_v35 = vld [vmem:[#allocation2 + $0xc0] sm:$0xff]  ;;  %v5674_v36 = vpack.c.bf16 %v453_v29, %v452_v24 }
  0x4b   : > { %v5017_v52 = vld [vmem:[%s5972_s3 + $0xb0] sm:$0xff]   ;;  %v5019_v10 = vld [vmem:[%s5972_s3 + $0xb8] sm:$0xff]   ;;  %v505_v24 = vld [vmem:[#allocation2 + $0xe0] sm:$0xff] }
  0x4c   : > { %4480 = vmatpush3.bf16.msra.mxu0 %v4996_v37  ;;  %v5616_v37 = vld [vmem:[%s5972_s3 + $0x1c0] sm:$0xff]   ;;  %v504_v21 = vld [vmem:[#allocation2 + $0xd8] sm:$0xff]  ;;  %v506_v29 = vld [vmem:[#allocation2 + $0xf0] sm:$0xff] }
  0x4d   : > { %4513 = vmatprep.subr.bf16.mxu0 %v4998_v5  ;;  %4288 = vmatpush3.bf16.msra.mxu1 %v5003_v49  ;;  %v5622_v49 = vpack.c.bf16 %v491_v57, %v490_v56  ;;  %v507_v57 = vld [vmem:[#allocation2 + $0xf8] sm:$0xff]  ;;  %v5693_v59 = vld [vmem:[%s5972_s3 + $0xc0] sm:$0xff]   ;;  %v5695_v61 = vpack.c.bf16 %v505_v24, %v504_v21  ;;  %v514_v3 = vld [vmem:[#allocation2 + $0x150] sm:$0xff] }
  0x4e   : > { %4258 = vmatmul.mubr.bf16.gmra.mrb[16].mxu1 %v591_v9  ;;  %4321 = vmatprep.subr.bf16.mxu1 %v5520_v11  ;;  %v495_v9 = vld [vmem:[#allocation2 + $0x68] sm:$0xff]  ;;  %v5697_v62 = vpack.c.bf16 %v507_v57, %v506_v29  ;;  %v515_v22 = vld [vmem:[#allocation2 + $0x158] sm:$0xff]  ;;  %v5033_v24 = vld [vmem:[%s5972_s3 + $0xf0] sm:$0xff]  }
  0x4f   : > { %4482 = vmatmul.mubr.bf16.vlgmr.msra.gmra.mrb[0].mxu0 %v5522_v12  ;;  %4261 = vmatprep.mubr.bf16.mxu1 %v592_v13  ;;  %v1973_v13 = vld [vmem:[#allocation2 + $0x122] sm:$0xff]  ;;  %v5642_v2 = vpack.c.bf16 %v495_v9, %v494_v7  ;;  %v2565_v21 = vld [vmem:[#allocation2 + $0x39] sm:$0xff]  ;;  %v2567_v57 = vld [vmem:[#allocation2 + $0x51] sm:$0xff] }
  0x50   : > { %4514 = vmatpush3.bf16.msra.mxu0 %v4998_v5  ;;  %4485 = vmatprep.mubr.bf16.mxu0 %v5529_v18  ;;  %v493_v5 = vld [vmem:[#allocation2 + $0x50] sm:$0xff]  ;;  %v5640_v63 = vpack.c.bf16 %v1974_v15, %v1973_v13  ;;  %v510_v7 = vld [vmem:[#allocation2 + $0x120] sm:$0xff]  ;;  %v511_v9 = vld [vmem:[#allocation2 + $0x128] sm:$0xff] }
  0x51   : > { %4515 = vmatprep.subr.bf16.mxu0 %v5000_v58  ;;  %v5638_v60 = vpack.c.bf16 %v493_v5, %v492_v4  ;;  %v1982_v45 = vld [vmem:[#allocation2 + $0x18a] sm:$0xff] }
  0x52   : > { %v5016_v4 = vld [vmem:[%s5972_s3 + $0x1c8] sm:$0xff]   ;;  %v5018_v13 = vld [vmem:[%s5972_s3 + $0x1d0] sm:$0xff]  }
  0x53   : > { %v508_v5 = vld [vmem:[#allocation2 + $0x108] sm:$0xff] }
  0x54   : > { %4516 = vmatpush3.bf16.msra.mxu0 %v5000_v58  ;;  %v1976_v58 = vld [vmem:[#allocation2 + $0x142] sm:$0xff] }
  0x55   : > { %4517 = vmatprep.subr.bf16.mxu0 %v5002_v19 }
  0x56   : > { %4262 = vmatmul.mubr.bf16.gmra.mrb[20].mxu1 %v593_v14  ;;  %v1977_v14 = vld [vmem:[#allocation2 + $0x152] sm:$0xff] }
  0x57   : > { %4486 = vmatmul.mubr.bf16.gmra.mrb[4].mxu0 %v5554_v30  ;;  %4265 = vmatprep.mubr.bf16.mxu1 %v594_v20  ;;  %v1978_v20 = vld [vmem:[#allocation2 + $0x15a] sm:$0xff] }
  0x58   : > { %4489 = vmatprep.mubr.bf16.mxu0 %v5560_v33  ;;  %4518 = vmatpush3.bf16.msra.mxu0 %v5002_v19  ;;  %v498_v19 = vld [vmem:[#allocation2 + $0x90] sm:$0xff] }
  0x59   : > { %4519 = vmatprep.subr.bf16.mxu0 %v5004_v8 }
  0x5c   : > { %4520 = vmatpush3.bf16.msra.mxu0 %v5004_v8  ;;  %v499_v8 = vld [vmem:[#allocation2 + $0x98] sm:$0xff] }
  0x5d   : > { %4521 = vmatprep.subr.bf16.mxu0 %v5006_v28 }
  0x5e   : > { %4266 = vmatmul.mubr.bf16.gmra.mrb[24].mxu1 %v595_v31  ;;  %v5660_v31 = vpack.c.bf16 %v499_v8, %v498_v19  ;;  %v516_v8 = vld [vmem:[#allocation2 + $0x168] sm:$0xff] }
  0x5f   : > { %4490 = vmatmul.mubr.bf16.gmra.mrb[8].mxu0 %v5578_v32  ;;  %4269 = vmatprep.mubr.bf16.mxu1 %v596_v34  ;;  %v5662_v34 = vpack.c.bf16 %v1980_v17, %v1979_v16  ;;  %v517_v16 = vld [vmem:[#allocation2 + $0x170] sm:$0xff]  ;;  %v1033_v17 = vld [vmem:[#allocation2 + $0x2] sm:$0xff] }
  0x60   : > { %4493 = vmatprep.mubr.bf16.mxu0 %v5584_v38  ;;  %4522 = vmatpush3.bf16.msra.mxu0 %v5006_v28  ;;  %v5658_v28 = vpack.c.bf16 %v1978_v20, %v1977_v14  ;;  %v5727_v14 = vpack.c.bf16 %v515_v22, %v514_v3  ;;  %v5024_v20 = vld [vmem:[%s5972_s3 + $0x1e8] sm:$0xff]   ;;  %v5739_v23 = vpack.c.bf16 %v517_v16, %v516_v8  ;;  %v2575_v3 = vld [vmem:[#allocation2 + $0xb1] sm:$0xff] }
  0x61   : > { %4523 = vmatprep.subr.bf16.mxu0 %v5008_v39  ;;  %v2576_v22 = vld [vmem:[#allocation2 + $0xc1] sm:$0xff] }
  0x64   : > { %4524 = vmatpush3.bf16.msra.mxu0 %v5008_v39  ;;  %v5015_v39 = vld [vmem:[%s5972_s3 + $0xa8] sm:$0xff]  }
  0x65   : > { %4525 = vmatprep.subr.bf16.mxu0 %v5010_v42 }
  0x66   : > { %4270 = vmatmul.mubr.bf16.gmra.mrb[28].mxu1 %v5598_v43 }
  0x67   : > { %4494 = vmatmul.mubr.bf16.gmra.mrb[12].mxu0 %v5600_v44  ;;  %4289 = vmatprep.mubr.bf16.mxu1 %v5602_v46 }
  0x68   : > { %4497 = vmatprep.mubr.bf16.mxu0 %v5604_v48  ;;  %4526 = vmatpush3.bf16.msra.mxu0 %v5010_v42  ;;  %v1981_v42 = vld [vmem:[#allocation2 + $0x182] sm:$0xff] }
  0x69   : > { %4527 = vmatprep.subr.bf16.mxu0 %v5012_v51  ;;  %v1998_v54 = vpack.c.bf16 %v1982_v45, %v1981_v42  ;;  %v5030_v42 = vld [vmem:[%s5972_s3 + $0x200] sm:$0xff]   ;;  %v5023_v45 = vld [vmem:[%s5972_s3 + $0xc8] sm:$0xff]  }
  0x6c   : > { %4528 = vmatpush3.bf16.msra.mxu0 %v5012_v51  ;;  %v503_v51 = vld [vmem:[#allocation2 + $0xc8] sm:$0xff] }
  0x6d   : > { %4561 = vmatprep.subr.bf16.mxu0 %v5616_v37  ;;  %v5682_v56 = vpack.c.bf16 %v503_v51, %v502_v35  ;;  %v5028_v35 = vld [vmem:[%s5972_s3 + $0x1f8] sm:$0xff]   ;;  %v5025_v51 = vld [vmem:[%s5972_s3 + $0xd0] sm:$0xff]  }
  0x6e   : > { %4290 = vmatmul.mubr.bf16.vlgmr.msra.gmra.mrb[0].mxu1 %v5618_v41 }
  0x6f   : > { %4498 = vmatmul.mubr.bf16.gmra.mrb[16].mxu0 %v5620_v47  ;;  %4322 = vmatpush3.bf16.msra.mxu1 %v5520_v11  ;;  %v5644_v11 = vpack.c.bf16 %v1976_v58, %v1975_v50  ;;  %v5713_v50 = vpack.c.bf16 %v511_v9, %v510_v7  ;;  %v513_v58 = vld [vmem:[#allocation2 + $0x140] sm:$0xff]  ;;  %v5032_v7 = vld [vmem:[%s5972_s3 + $0x208] sm:$0xff]   ;;  %v2572_v9 = vld [vmem:[#allocation2 + $0x91] sm:$0xff] }
  0x70   : > { %4293 = vmatprep.mubr.bf16.mxu1 %v5622_v49  ;;  %4501 = vmatprep.mubr.bf16.mxu0 %v5624_v1 }
  0x71   : > { %4323 = vmatprep.subr.bf16.mxu1 %v5007_v6 }
  0x73   : > { %4324 = vmatpush3.bf16.msra.mxu1 %v5007_v6  ;;  %v509_v6 = vld [vmem:[#allocation2 + $0x110] sm:$0xff] }
  0x74   : > { %4325 = vmatprep.subr.bf16.mxu1 %v5009_v55  ;;  %v5711_v15 = vpack.c.bf16 %v509_v6, %v508_v5 }
  0x76   : > { %4294 = vmatmul.mubr.bf16.gmra.mrb[4].mxu1 %v5638_v60 }
  0x77   : > { %4502 = vmatmul.mubr.bf16.gmra.mrb[20].mxu0 %v5640_v63  ;;  %4297 = vmatprep.mubr.bf16.mxu1 %v5642_v2 }
  0x78   : > { %4505 = vmatprep.mubr.bf16.mxu0 %v5644_v11  ;;  %4326 = vmatpush3.bf16.msra.mxu1 %v5009_v55  ;;  %v5020_v55 = vld [vmem:[%s5972_s3 + $0x1d8] sm:$0xff]  }
  0x79   : > { %4327 = vmatprep.subr.bf16.mxu1 %v5011_v25 }
  0x7c   : > { %4328 = vmatpush3.bf16.msra.mxu1 %v5011_v25  ;;  %v5022_v25 = vld [vmem:[%s5972_s3 + $0x1e0] sm:$0xff]  }
  0x7d   : > { %4329 = vmatprep.subr.bf16.mxu1 %v5013_v26 }
  0x7e   : > { %4298 = vmatmul.mubr.bf16.gmra.mrb[8].mxu1 %v5656_v27 }
  0x7f   : > { %4506 = vmatmul.mubr.bf16.gmra.mrb[24].mxu0 %v5658_v28  ;;  %4301 = vmatprep.mubr.bf16.mxu1 %v5660_v31 }
  0x80   : > { %4509 = vmatprep.mubr.bf16.mxu0 %v5662_v34  ;;  %4330 = vmatpush3.bf16.msra.mxu1 %v5013_v26  ;;  %v1034_v26 = vld [vmem:[#allocation2 + $0xa] sm:$0xff] }
  0x81   : > { %4331 = vmatprep.subr.bf16.mxu1 %v5015_v39  ;;  %v1065_v40 = vpack.c.bf16 %v1034_v26, %v1033_v17  ;;  %v2579_v17 = vld [vmem:[#allocation2 + $0xe1] sm:$0xff]  ;;  %v2580_v26 = vld [vmem:[#allocation2 + $0xf1] sm:$0xff] }
  0x84   : > { %4332 = vmatpush3.bf16.msra.mxu1 %v5015_v39  ;;  %v5026_v39 = vld [vmem:[%s5972_s3 + $0x1f0] sm:$0xff]  }
  0x85   : > { %4333 = vmatprep.subr.bf16.mxu1 %v5017_v52 }
  0x86   : > { %4302 = vmatmul.mubr.bf16.gmra.mrb[12].mxu1 %v5680_v53 }
  0x87   : > { %4510 = vmatmul.mubr.bf16.gmra.mrb[28].mxu0 %v1998_v54  ;;  %4305 = vmatprep.mubr.bf16.mxu1 %v5682_v56  ;;  %v5029_v54 = vld [vmem:[%s5972_s3 + $0xe0] sm:$0xff]  }
  0x88   : > { %4529 = vmatprep.mubr.bf16.mxu0 %v5622_v49  ;;  %4334 = vmatpush3.bf16.msra.mxu1 %v5017_v52  ;;  %v5027_v52 = vld [vmem:[%s5972_s3 + $0xd8] sm:$0xff]  }
  0x89   : > { %4335 = vmatprep.subr.bf16.mxu1 %v5019_v10 }
  0x8c   : > { %4336 = vmatpush3.bf16.msra.mxu1 %v5019_v10 }
  0x8d   : > { %4369 = vmatprep.subr.bf16.mxu1 %v5693_v59 }
  0x8e   : > { %4306 = vmatmul.mubr.bf16.gmra.mrb[16].mxu1 %v5695_v61 }
  0x8f   : > { %4530 = vmatmul.mubr.bf16.vlgmr.msra.gmra.mrb[0].mxu0 %v5638_v60  ;;  %4309 = vmatprep.mubr.bf16.mxu1 %v5697_v62 }
  0x90   : > { %4562 = vmatpush3.bf16.msra.mxu0 %v5616_v37  ;;  %4533 = vmatprep.mubr.bf16.mxu0 %v5642_v2  ;;  %v512_v37 = vld [vmem:[#allocation2 + $0x138] sm:$0xff] }
  0x91   : > { %4563 = vmatprep.subr.bf16.mxu0 %v5016_v4  ;;  %v5725_v19 = vpack.c.bf16 %v513_v58, %v512_v37 }
  0x94   : > { %4564 = vmatpush3.bf16.msra.mxu0 %v5016_v4  ;;  %v2569_v4 = vld [vmem:[#allocation2 + $0x69] sm:$0xff] }
  0x95   : > { %4565 = vmatprep.subr.bf16.mxu0 %v5018_v13 }
  0x96   : > { %4310 = vmatmul.mubr.bf16.gmra.mrb[20].mxu1 %v5711_v15 }
  0x97   : > { %4534 = vmatmul.mubr.bf16.gmra.mrb[4].mxu0 %v5656_v27  ;;  %4313 = vmatprep.mubr.bf16.mxu1 %v5713_v50 }
  0x98   : > { %4537 = vmatprep.mubr.bf16.mxu0 %v5660_v31  ;;  %4566 = vmatpush3.bf16.msra.mxu0 %v5018_v13  ;;  %v2573_v13 = vld [vmem:[#allocation2 + $0x99] sm:$0xff] }
  0x99   : > { %4567 = vmatprep.subr.bf16.mxu0 %v5020_v55  ;;  %v2600_v58 = vpack.c.bf16 %v2573_v13, %v2572_v9 }
  0x9c   : > { %4568 = vmatpush3.bf16.msra.mxu0 %v5020_v55  ;;  %v5034_v55 = vld [vmem:[%s5972_s3 + $0x210] sm:$0xff]  }
  0x9d   : > { %4569 = vmatprep.subr.bf16.mxu0 %v5022_v25 }
  0x9e   : > { %4314 = vmatmul.mubr.bf16.gmra.mrb[24].mxu1 %v5725_v19 }
  0x9f   : > { %4538 = vmatmul.mubr.bf16.gmra.mrb[8].mxu0 %v5680_v53  ;;  %4317 = vmatprep.mubr.bf16.mxu1 %v5727_v14 }
  0xa0   : > { %4541 = vmatprep.mubr.bf16.mxu0 %v5682_v56  ;;  %4570 = vmatpush3.bf16.msra.mxu0 %v5022_v25  ;;  %v2577_v25 = vld [vmem:[#allocation2 + $0xc9] sm:$0xff] }
  0xa1   : > { %4571 = vmatprep.subr.bf16.mxu0 %v5024_v20  ;;  %v2602_v16 = vpack.c.bf16 %v2577_v25, %v2576_v22  ;;  %v2886_v22 = vld [vmem:[#allocation2 + $0xf2] sm:$0xff] }
  0xa4   : > { %4572 = vmatpush3.bf16.msra.mxu0 %v5024_v20  ;;  %v5037_v20 = vld [vmem:[%s5972_s3 + $0x220] sm:$0xff]  }
  0xa5   : > { %4573 = vmatprep.subr.bf16.mxu0 %v5026_v39 }
  0xa6   : > { %4318 = vmatmul.mubr.bf16.gmra.mrb[28].mxu1 %v5739_v23 }
  0xa7   : > { %4542 = vmatmul.mubr.bf16.gmra.mrb[12].mxu0 %v5695_v61  ;;  %4337 = vmatprep.mubr.bf16.mxu1 %v1065_v40  ;;  %v5039_v40 = vld [vmem:[%s5972_s3 + $0x230] sm:$0xff]  }
  0xa8   : > { %4545 = vmatprep.mubr.bf16.mxu0 %v5697_v62  ;;  %4574 = vmatpush3.bf16.msra.mxu0 %v5026_v39  ;;  %v2581_v39 = vld [vmem:[#allocation2 + $0xf9] sm:$0xff] }
  0xa9   : > { %4575 = vmatprep.subr.bf16.mxu0 %v5028_v35 }
  0xac   : > { %4576 = vmatpush3.bf16.msra.mxu0 %v5028_v35 }
  0xad   : > { %4609 = vmatprep.subr.bf16.mxu0 %v5030_v42 }
  0xae   : > { %4338 = vmatmul.mubr.bf16.vlgmr.msra.gmra.mrb[0].mxu1 %v5491_v0  ;;  %v2286_v0 = vld [vmem:[#allocation2 + $0x180] sm:$0xff] }
  0xaf   : > { %4546 = vmatmul.mubr.bf16.gmra.mrb[16].mxu0 %v5711_v15  ;;  %4370 = vmatpush3.bf16.msra.mxu1 %v5693_v59  ;;  %v2568_v59 = vld [vmem:[#allocation2 + $0x61] sm:$0xff] }
  0xb0   : > { %4341 = vmatprep.mubr.bf16.mxu1 %v5522_v12  ;;  %4549 = vmatprep.mubr.bf16.mxu0 %v5713_v50  ;;  %v2287_v12 = vld [vmem:[#allocation2 + $0x188] sm:$0xff]  ;;  %v2598_v6 = vpack.c.bf16 %v2569_v4, %v2568_v59 }
  0xb1   : > { %4371 = vmatprep.subr.bf16.mxu1 %v5023_v45  ;;  %v5771_v10 = vpack.c.bf16 %v2287_v12, %v2286_v0 }
  0xb3   : > { %4372 = vmatpush3.bf16.msra.mxu1 %v5023_v45  ;;  %v2583_v45 = vld [vmem:[#allocation2 + $0x111] sm:$0xff] }
  0xb4   : > { %4373 = vmatprep.subr.bf16.mxu1 %v5025_v51 }
  0xb6   : > { %4342 = vmatmul.mubr.bf16.gmra.mrb[4].mxu1 %v5529_v18  ;;  %v5031_v18 = vld [vmem:[%s5972_s3 + $0xe8] sm:$0xff]  }
  0xb7   : > { %4550 = vmatmul.mubr.bf16.gmra.mrb[20].mxu0 %v5725_v19  ;;  %4345 = vmatprep.mubr.bf16.mxu1 %v5554_v30  ;;  %v2564_v30 = vld [vmem:[#allocation2 + $0x31] sm:$0xff] }
  0xb8   : > { %4553 = vmatprep.mubr.bf16.mxu0 %v5727_v14  ;;  %4374 = vmatpush3.bf16.msra.mxu1 %v5025_v51  ;;  %v2596_v29 = vpack.c.bf16 %v2565_v21, %v2564_v30  ;;  %v2584_v51 = vld [vmem:[#allocation2 + $0x121] sm:$0xff]  ;;  %v2589_v30 = vld [vmem:[#allocation2 + $0x159] sm:$0xff] }
  0xb9   : > { %4375 = vmatprep.subr.bf16.mxu1 %v5027_v52 }
  0xbc   : > { %4376 = vmatpush3.bf16.msra.mxu1 %v5027_v52  ;;  %v2585_v52 = vld [vmem:[#allocation2 + $0x129] sm:$0xff] }
  0xbd   : > { %4377 = vmatprep.subr.bf16.mxu1 %v5029_v54  ;;  %v5832_v12 = vpack.c.bf16 %v2585_v52, %v2584_v51  ;;  %v2899_v51 = vld [vmem:[#allocation2 + $0x18a] sm:$0xff] }
  0xbe   : > { %4346 = vmatmul.mubr.bf16.gmra.mrb[8].mxu1 %v5560_v33  ;;  %v5035_v33 = vld [vmem:[%s5972_s3 + $0xf8] sm:$0xff]  }
  0xbf   : > { %4554 = vmatmul.mubr.bf16.gmra.mrb[24].mxu0 %v5739_v23  ;;  %4349 = vmatprep.mubr.bf16.mxu1 %v5578_v32  ;;  %v2566_v32 = vld [vmem:[#allocation2 + $0x49] sm:$0xff] }
  0xc0   : > { %4557 = vmatprep.mubr.bf16.mxu0 %v5771_v10  ;;  %4378 = vmatpush3.bf16.msra.mxu1 %v5029_v54  ;;  %v2597_v5 = vpack.c.bf16 %v2567_v57, %v2566_v32  ;;  %v5043_v54 = vld [vmem:[%s5972_s3 + $0x108] sm:$0xff]   ;;  %v2871_v32 = vld [vmem:[#allocation2 + $0x3a] sm:$0xff] }
  0xc1   : > { %4379 = vmatprep.subr.bf16.mxu1 %v5031_v18  ;;  %v5047_v57 = vld [vmem:[%s5972_s3 + $0x128] sm:$0xff]  }
  0xc4   : > { %4380 = vmatpush3.bf16.msra.mxu1 %v5031_v18  ;;  %v2588_v18 = vld [vmem:[#allocation2 + $0x151] sm:$0xff] }
  0xc5   : > { %4381 = vmatprep.subr.bf16.mxu1 %v5033_v24 }
  0xc6   : > { %4350 = vmatmul.mubr.bf16.gmra.mrb[12].mxu1 %v5584_v38  ;;  %v5795_v38 = vld [vmem:[%s5972_s3 + $0x100] sm:$0xff]  }
  0xc7   : > { %4558 = vmatmul.mubr.bf16.gmra.mrb[28].mxu0 %v5602_v46  ;;  %4353 = vmatprep.mubr.bf16.mxu1 %v5600_v44  ;;  %v2570_v44 = vld [vmem:[#allocation2 + $0x79] sm:$0xff]  ;;  %v2571_v46 = vld [vmem:[#allocation2 + $0x81] sm:$0xff] }
  0xc8   : > { %4577 = vmatprep.mubr.bf16.mxu0 %v2596_v29  ;;  %4382 = vmatpush3.bf16.msra.mxu1 %v5033_v24  ;;  %v2599_v37 = vpack.c.bf16 %v2571_v46, %v2570_v44  ;;  %v5045_v24 = vld [vmem:[%s5972_s3 + $0x118] sm:$0xff]   ;;  %v5046_v29 = vld [vmem:[%s5972_s3 + $0x120] sm:$0xff]  }
  0xc9   : > { %4383 = vmatprep.subr.bf16.mxu1 %v5035_v33  ;;  %v2878_v44 = vld [vmem:[#allocation2 + $0x92] sm:$0xff]  ;;  %v2879_v46 = vld [vmem:[#allocation2 + $0x9a] sm:$0xff] }
  0xca   : > { %v2906_v13 = vpack.c.bf16 %v2879_v46, %v2878_v44 }
  0xcc   : > { %4384 = vmatpush3.bf16.msra.mxu1 %v5035_v33  ;;  %v2870_v33 = vld [vmem:[#allocation2 + $0x32] sm:$0xff] }
  0xcd   : > { %4657 = vmatprep.subr.bf16.mxu1 %v5795_v38  ;;  %v2902_v4 = vpack.c.bf16 %v2871_v32, %v2870_v33 }
  0xce   : > { %4354 = vmatmul.mubr.bf16.gmra.mrb[16].mxu1 %v5604_v48  ;;  %v5036_v48 = vld [vmem:[%s5972_s3 + $0x218] sm:$0xff]  }
  0xcf   : > { %4578 = vmatmul.mubr.bf16.vlgmr.msra.gmra.mrb[0].mxu0 %v2597_v5  ;;  %4357 = vmatprep.mubr.bf16.mxu1 %v5620_v47  ;;  %v2574_v47 = vld [vmem:[#allocation2 + $0xa9] sm:$0xff] }
  0xd0   : > { %4610 = vmatpush3.bf16.msra.mxu0 %v5030_v42  ;;  %4581 = vmatprep.mubr.bf16.mxu0 %v2598_v6  ;;  %v2601_v8 = vpack.c.bf16 %v2575_v3, %v2574_v47  ;;  %v5821_v42 = vpack.c.bf16 %v2581_v39, %v2580_v26  ;;  %v2875_v5 = vld [vmem:[#allocation2 + $0x6a] sm:$0xff]  ;;  %v5049_v6 = vld [vmem:[%s5972_s3 + $0x138] sm:$0xff]   ;;  %v2885_v3 = vld [vmem:[#allocation2 + $0xe2] sm:$0xff] }
  0xd1   : > { %4611 = vmatprep.subr.bf16.mxu0 %v5032_v7  ;;  %v2894_v26 = vld [vmem:[#allocation2 + $0x152] sm:$0xff] }
  0xd4   : > { %4612 = vmatpush3.bf16.msra.mxu0 %v5032_v7 }
  0xd5   : > { %4613 = vmatprep.subr.bf16.mxu0 %v5034_v55 }
  0xd6   : > { %4358 = vmatmul.mubr.bf16.gmra.mrb[20].mxu1 %v5624_v1  ;;  %v5038_v1 = vld [vmem:[%s5972_s3 + $0x228] sm:$0xff]  }
  0xd7   : > { %4582 = vmatmul.mubr.bf16.gmra.mrb[4].mxu0 %v2599_v37  ;;  %4361 = vmatprep.mubr.bf16.mxu1 %v5640_v63  ;;  %v2578_v63 = vld [vmem:[#allocation2 + $0xd9] sm:$0xff] }
  0xd8   : > { %4585 = vmatprep.mubr.bf16.mxu0 %v2600_v58  ;;  %4614 = vmatpush3.bf16.msra.mxu0 %v5034_v55  ;;  %v5819_v35 = vpack.c.bf16 %v2579_v17, %v2578_v63  ;;  %v2880_v55 = vld [vmem:[#allocation2 + $0xaa] sm:$0xff]  ;;  %v2881_v37 = vld [vmem:[#allocation2 + $0xb2] sm:$0xff]  ;;  %v2882_v58 = vld [vmem:[#allocation2 + $0xc2] sm:$0xff] }
  0xd9   : > { %4615 = vmatprep.subr.bf16.mxu0 %v5036_v48  ;;  %v2893_v17 = vld [vmem:[#allocation2 + $0x142] sm:$0xff] }
  0xdc   : > { %4616 = vmatpush3.bf16.msra.mxu0 %v5036_v48  ;;  %v2907_v48 = vpack.c.bf16 %v2881_v37, %v2880_v55 }
  0xdd   : > { %4617 = vmatprep.subr.bf16.mxu0 %v5037_v20 }
  0xde   : > { %4362 = vmatmul.mubr.bf16.gmra.mrb[24].mxu1 %v5644_v11  ;;  %v5040_v11 = vld [vmem:[%s5972_s3 + $0x238] sm:$0xff]  }
  0xdf   : > { %4586 = vmatmul.mubr.bf16.gmra.mrb[8].mxu0 %v2601_v8  ;;  %4365 = vmatprep.mubr.bf16.mxu1 %v5658_v28  ;;  %v2582_v28 = vld [vmem:[#allocation2 + $0x109] sm:$0xff]  ;;  %v2889_v8 = vld [vmem:[#allocation2 + $0x112] sm:$0xff] }
  0xe0   : > { %4589 = vmatprep.mubr.bf16.mxu0 %v2602_v16  ;;  %4618 = vmatpush3.bf16.msra.mxu0 %v5037_v20  ;;  %v5830_v0 = vpack.c.bf16 %v2583_v45, %v2582_v28  ;;  %v2890_v16 = vld [vmem:[#allocation2 + $0x122] sm:$0xff] }
  0xe1   : > { %4619 = vmatprep.subr.bf16.mxu0 %v5038_v1  ;;  %v1673_v28 = vld [vmem:[#allocation2 + $0x169] sm:$0xff] }
  0xe2   : > { %v2898_v45 = vld [vmem:[#allocation2 + $0x182] sm:$0xff] }
  0xe4   : > { %4620 = vmatpush3.bf16.msra.mxu0 %v5038_v1 }
  0xe5   : > { %4621 = vmatprep.subr.bf16.mxu0 %v5039_v40 }
  0xe6   : > { %4366 = vmatmul.mubr.bf16.gmra.mrb[28].mxu1 %v5662_v34  ;;  %v2587_v34 = vld [vmem:[#allocation2 + $0x141] sm:$0xff] }
  0xe7   : > { %4590 = vmatmul.mubr.bf16.gmra.mrb[12].mxu0 %v5819_v35  ;;  %4385 = vmatprep.mubr.bf16.mxu1 %v5618_v41  ;;  %v2586_v41 = vld [vmem:[#allocation2 + $0x139] sm:$0xff] }
  0xe8   : > { %4593 = vmatprep.mubr.bf16.mxu0 %v5821_v42  ;;  %4622 = vmatpush3.bf16.msra.mxu0 %v5039_v40  ;;  %v5842_v21 = vpack.c.bf16 %v2587_v34, %v2586_v41  ;;  %v2916_v41 = vpack.c.bf16 %v2899_v51, %v2898_v45  ;;  %v1675_v34 = vld [vmem:[#allocation2 + $0x181] sm:$0xff] }
  0xe9   : > { %4623 = vmatprep.subr.bf16.mxu0 %v5040_v11 }
  0xec   : > { %4624 = vmatpush3.bf16.msra.mxu0 %v5040_v11  ;;  %v2897_v11 = vld [vmem:[#allocation2 + $0x172] sm:$0xff] }
  0xee   : > { %4386 = vmatmul.mubr.bf16.vlgmr.msra.gmra.mrb[0].mxu1 %v5622_v49  ;;  %v5844_v49 = vpack.c.bf16 %v2589_v30, %v2588_v18  ;;  %v2901_v18 = vld [vmem:[#allocation2 + $0x1a2] sm:$0xff] }
  0xef   : > { %4594 = vmatmul.mubr.bf16.gmra.mrb[16].mxu0 %v5830_v0  ;;  %4665 = vmatpush3.bf16.msra.mxu1 %v5795_v38 }
  0xf0   : > { %4389 = vmatprep.mubr.bf16.mxu1 %v5638_v60  ;;  %4597 = vmatprep.mubr.bf16.mxu0 %v5832_v12  ;;  %v5044_v60 = vld [vmem:[%s5972_s3 + $0x110] sm:$0xff]  }
  0xf1   : > { %4658 = vmatprep.subr.bf16.mxu1 %v5043_v54 }
  0xf3   : > { %4666 = vmatpush3.bf16.msra.mxu1 %v5043_v54  ;;  %v1676_v54 = vld [vmem:[#allocation2 + $0x189] sm:$0xff] }
  0xf4   : > { %4659 = vmatprep.subr.bf16.mxu1 %v5044_v60  ;;  %v1692_v30 = vpack.c.bf16 %v1676_v54, %v1675_v34 }
  0xf6   : > { %4390 = vmatmul.mubr.bf16.gmra.mrb[4].mxu1 %v5642_v2  ;;  %v2594_v2 = vld [vmem:[#allocation2 + $0x199] sm:$0xff] }
  0xf7   : > { %4598 = vmatmul.mubr.bf16.gmra.mrb[20].mxu0 %v5842_v21  ;;  %4393 = vmatprep.mubr.bf16.mxu1 %v5656_v27  ;;  %v2595_v27 = vld [vmem:[#allocation2 + $0x1a1] sm:$0xff] }
  0xf8   : > { %4601 = vmatprep.mubr.bf16.mxu0 %v5844_v49  ;;  %4667 = vmatpush3.bf16.msra.mxu1 %v5044_v60  ;;  %v2611_v59 = vpack.c.bf16 %v2595_v27, %v2594_v2 }
  0xf9   : > { %4660 = vmatprep.subr.bf16.mxu1 %v5045_v24 }
  0xfc   : > { %4668 = vmatpush3.bf16.msra.mxu1 %v5045_v24 }
  0xfd   : > { %4661 = vmatprep.subr.bf16.mxu1 %v5046_v29 }
  0xfe   : > { %4394 = vmatmul.mubr.bf16.gmra.mrb[8].mxu1 %v5660_v31  ;;  %v2872_v31 = vld [vmem:[#allocation2 + $0x4a] sm:$0xff] }
  0xff   : > { %4602 = vmatmul.mubr.bf16.gmra.mrb[24].mxu0 %v5598_v43  ;;  %4397 = vmatprep.mubr.bf16.mxu1 %v5680_v53  ;;  %v5048_v43 = vld [vmem:[%s5972_s3 + $0x130] sm:$0xff]   ;;  %v2874_v53 = vld [vmem:[#allocation2 + $0x62] sm:$0xff] }
 0x100   : > { %4605 = vmatprep.mubr.bf16.mxu0 %v5674_v36  ;;  %4669 = vmatpush3.bf16.msra.mxu1 %v5046_v29  ;;  %v2873_v36 = vld [vmem:[#allocation2 + $0x52] sm:$0xff]  ;;  %v2904_v38 = vpack.c.bf16 %v2875_v5, %v2874_v53 }
 0x101   : > { %4662 = vmatprep.subr.bf16.mxu1 %v5047_v57  ;;  %v2903_v7 = vpack.c.bf16 %v2873_v36, %v2872_v31 }
 0x104   : > { %4670 = vmatpush3.bf16.msra.mxu1 %v5047_v57 }
 0x105   : > { %4663 = vmatprep.subr.bf16.mxu1 %v5048_v43 }
 0x106   : > { %4398 = vmatmul.mubr.bf16.gmra.mrb[12].mxu1 %v5682_v56  ;;  %v2876_v56 = vld [vmem:[#allocation2 + $0x7a] sm:$0xff] }
 0x107   : > { %4606 = vmatmul.mubr.bf16.gmra.mrb[28].mxu0 %v2611_v59  ;;  %4401 = vmatprep.mubr.bf16.mxu1 %v5695_v61  ;;  %v2877_v61 = vld [vmem:[#allocation2 + $0x82] sm:$0xff] }
 0x108   : > { %4625 = vmatprep.mubr.bf16.mxu0 %v2902_v4  ;;  %4671 = vmatpush3.bf16.msra.mxu1 %v5048_v43  ;;  %v2905_v9 = vpack.c.bf16 %v2877_v61, %v2876_v56 }
 0x109   : > { %4664 = vmatprep.subr.bf16.mxu1 %v5049_v6 }
 0x10c   : > { %4672 = vmatpush3.bf16.msra.mxu1 %v5049_v6 }
 0x10e   : > { %4402 = vmatmul.mubr.bf16.gmra.mrb[16].mxu1 %v5697_v62  ;;  %v2883_v62 = vld [vmem:[#allocation2 + $0xca] sm:$0xff] }
 0x10f   : > { %4626 = vmatmul.mubr.bf16.vlgmr.msra.gmra.mrb[0].mxu0 %v2903_v7  ;;  %4405 = vmatprep.mubr.bf16.mxu1 %v5711_v15  ;;  %v2908_v47 = vpack.c.bf16 %v2883_v62, %v2882_v58  ;;  %v2884_v15 = vld [vmem:[#allocation2 + $0xda] sm:$0xff] }
 0x110   : > { %4629 = vmatprep.mubr.bf16.mxu0 %v2904_v38  ;;  %v2909_v25 = vpack.c.bf16 %v2885_v3, %v2884_v15 }
 0x116   : > { %4406 = vmatmul.mubr.bf16.gmra.mrb[20].mxu1 %v5713_v50  ;;  %v2887_v50 = vld [vmem:[#allocation2 + $0xfa] sm:$0xff] }
 0x117   : > { %4630 = vmatmul.mubr.bf16.gmra.mrb[4].mxu0 %v2905_v9  ;;  %4409 = vmatprep.mubr.bf16.mxu1 %v5725_v19  ;;  %v2910_v20 = vpack.c.bf16 %v2887_v50, %v2886_v22  ;;  %v2888_v19 = vld [vmem:[#allocation2 + $0x10a] sm:$0xff] }
 0x118   : > { %4633 = vmatprep.mubr.bf16.mxu0 %v2906_v13  ;;  %v2911_v1 = vpack.c.bf16 %v2889_v8, %v2888_v19 }
 0x11e   : > { %4410 = vmatmul.mubr.bf16.gmra.mrb[24].mxu1 %v5727_v14  ;;  %v2891_v14 = vld [vmem:[#allocation2 + $0x12a] sm:$0xff] }
 0x11f   : > { %4634 = vmatmul.mubr.bf16.gmra.mrb[8].mxu0 %v2907_v48  ;;  %4413 = vmatprep.mubr.bf16.mxu1 %v5739_v23  ;;  %v2912_v63 = vpack.c.bf16 %v2891_v14, %v2890_v16  ;;  %v2892_v23 = vld [vmem:[#allocation2 + $0x13a] sm:$0xff] }
 0x120   : > { %4637 = vmatprep.mubr.bf16.mxu0 %v2908_v47  ;;  %v2913_v39 = vpack.c.bf16 %v2893_v17, %v2892_v23 }
 0x126   : > { %4414 = vmatmul.mubr.bf16.gmra.mrb[28].mxu1 %v5771_v10  ;;  %v2895_v10 = vld [vmem:[#allocation2 + $0x15a] sm:$0xff] }
 0x127   : > { %4638 = vmatmul.mubr.bf16.gmra.mrb[12].mxu0 %v2909_v25  ;;  %4449 = vmatprep.mubr.bf16.mxu1 %v5819_v35  ;;  %v2914_v40 = vpack.c.bf16 %v2895_v10, %v2894_v26  ;;  %v2896_v35 = vld [vmem:[#allocation2 + $0x16a] sm:$0xff] }
 0x128   : > { %4641 = vmatprep.mubr.bf16.mxu0 %v2910_v20  ;;  %v2915_v52 = vpack.c.bf16 %v2897_v11, %v2896_v35 }
 0x12e   : > { %4450 = vmatmul.mubr.bf16.vlgmr.msra.gmra.mrb[16].mxu1 %v5821_v42  ;;  %v1674_v42 = vld [vmem:[#allocation2 + $0x171] sm:$0xff] }
 0x12f   : > { %4642 = vmatmul.mubr.bf16.gmra.mrb[16].mxu0 %v2911_v1  ;;  %4453 = vmatprep.mubr.bf16.mxu1 %v5830_v0  ;;  %v1691_v0 = vpack.c.bf16 %v1674_v42, %v1673_v28 }
 0x130   : > { %4645 = vmatprep.mubr.bf16.mxu0 %v2912_v63 }
 0x136   : > { %4454 = vmatmul.mubr.bf16.gmra.mrb[20].mxu1 %v5832_v12  ;;  %v2900_v12 = vld [vmem:[#allocation2 + $0x19a] sm:$0xff] }
 0x137   : > { %4646 = vmatmul.mubr.bf16.gmra.mrb[20].mxu0 %v2913_v39  ;;  %4457 = vmatprep.mubr.bf16.mxu1 %v5842_v21  ;;  %v2917_v21 = vpack.c.bf16 %v2901_v18, %v2900_v12 }
 0x138   : > { %4649 = vmatprep.mubr.bf16.mxu0 %v2914_v40 }
 0x13e   : > { %4458 = vmatmul.mubr.bf16.gmra.mrb[24].mxu1 %v5844_v49 }
 0x13f   : > { %4650 = vmatmul.mubr.bf16.gmra.mrb[24].mxu0 %v2915_v52  ;;  %4461 = vmatprep.mubr.bf16.mxu1 %v1691_v0 }
 0x140   : > { %4653 = vmatprep.mubr.bf16.mxu0 %v2916_v41 }
 0x146   : > { %4462 = vmatmul.mubr.bf16.gmra.mrb[28].mxu1 %v1692_v30 }
 0x147   : > { %4654 = vmatmul.mubr.bf16.gmra.mrb[28].mxu0 %v2917_v21 }
 0x1c1   : > { %v4387_v60 = vpop.f32.mrb[0].mxu1 }
 0x1c2   : > { %v1486_v24 = vpop.f32.mrb[1].mxu1 }
 0x1c3   : > { %v4388_v29 = vpop.f32.mrb[2].mxu1 }
 0x1c4   : > { %v1489_v2 = vpop.f32.mrb[3].mxu1 }
 0x1c9   : > { %v4391_v27 = vpop.f32.mrb[4].mxu1 }
 0x1ca   : > { %v1502_v33 = vpop.f32.mrb[5].mxu1 }
 0x1cb   : > { %v4392_v32 = vpop.f32.mrb[6].mxu1 }
 0x1cc   : > { %v1505_v57 = vpop.f32.mrb[7].mxu1 }
 0x1d1   : > { %v4395_v49 = vpop.f32.mrb[8].mxu1 }
 0x1d2   : > { %v1518_v59 = vpop.f32.mrb[9].mxu1 }
 0x1d3   : > { %v4396_v4 = vpop.f32.mrb[10].mxu1 }
 0x1d4   : > { %v1521_v43 = vpop.f32.mrb[11].mxu1 }
 0x1d9   : > { %v5887_v31 = vpop.f32.mrb[12].mxu1 }
 0x1da   : > { %v5889_v36 = vpop.f32.mrb[13].mxu1 }
 0x1db   : > { %v5891_v53 = vpop.f32.mrb[14].mxu1 }
 0x1dc   : > { %v5893_v5 = vpop.f32.mrb[15].mxu1 }
 0x1e2   : > { %v4627_v6 = vpop.f32.mrb[0].mxu0 }
 0x1e3   : > { %v4673_v7 = vadd.f32 %v4627_v6, %v4387_v60  ;;  %v3017_v38 = vpop.f32.mrb[1].mxu0 }
 0x1e4   : > { %v4674_v56 = vadd.f32 %v3017_v38, %v1486_v24  ;;  %v4628_v61 = vpop.f32.mrb[2].mxu0 }
 0x1e5   : > { %v4675_v44 = vadd.f32 %v4628_v61, %v4388_v29  ;;  %v3020_v46 = vpop.f32.mrb[3].mxu0  ;;  %v3375_v48 = vmul.f32 %v4673_v7, %v4673_v7 }
 0x1e6   : > { %v4676_v9 = vadd.f32 %v3020_v46, %v1489_v2  ;;  %v3373_v55 = vmul.f32 %v4674_v56, %v4674_v56 }
 0x1e7   : > { %v3907_v13 = vpack.c.bf16 %v4675_v44, %v4673_v7  ;;  %v3376_v25 = vmul.f32 %v4675_v44, %v4675_v44 }
 0x1e8   : > { %v3902_v37 = vpack.c.bf16 %v4676_v9, %v4674_v56  ;;  %v3336_v58 = vadd.f32 %v4676_v9, %v4674_v56  ;;  %v3374_v62 = vmul.f32 %v4676_v9, %v4676_v9 }
 0x1e9   : > { %3994 = vst [vmem:[%s5900_s10 + $0x8] sm:$0xff] %v3907_v13  }
 0x1ea   : > { %3903 = vst [vmem:[%s5900_s10] sm:$0xff] %v3902_v37   ;;  %v3337_v47 = vadd.f32 %v4673_v7, %v3336_v58  ;;  %v3405_v15 = vadd.f32 %v3374_v62, %v3373_v55  ;;  %v4631_v3 = vpop.f32.mrb[4].mxu0 }
 0x1eb   : > { %v4677_v22 = vadd.f32 %v4631_v3, %v4391_v27  ;;  %v3033_v50 = vpop.f32.mrb[5].mxu0 }
 0x1ec   : > { %v3406_v20 = vadd.f32 %v3405_v15, %v3375_v48  ;;  %v4678_v19 = vadd.f32 %v3033_v50, %v1502_v33  ;;  %v3338_v8 = vadd.f32 %v4675_v44, %v3337_v47  ;;  %v4632_v16 = vpop.f32.mrb[6].mxu0 }
 0x1ed   : > { %v4679_v14 = vadd.f32 %v4632_v16, %v4392_v32  ;;  %v3036_v1 = vpop.f32.mrb[7].mxu0  ;;  %v3379_v28 = vmul.f32 %v4677_v22, %v4677_v22 }
 0x1ee   : > { %v3339_v63 = vadd.f32 %v4678_v19, %v3338_v8  ;;  %v3377_v23 = vmul.f32 %v4678_v19, %v4678_v19  ;;  %v3407_v17 = vadd.f32 %v3406_v20, %v3376_v25  ;;  %v4680_v26 = vadd.f32 %v3036_v1, %v1505_v57 }
 0x1ef   : > { %v3917_v10 = vpack.c.bf16 %v4679_v14, %v4677_v22  ;;  %v3380_v41 = vmul.f32 %v4679_v14, %v4679_v14 }
 0x1f0   : > { %v3408_v39 = vadd.f32 %v3407_v17, %v3377_v23  ;;  %v3912_v40 = vpack.c.bf16 %v4680_v26, %v4678_v19  ;;  %v3340_v35 = vadd.f32 %v4680_v26, %v3339_v63  ;;  %v3378_v11 = vmul.f32 %v4680_v26, %v4680_v26 }
 0x1f1   : > { %3996 = vst [vmem:[%s5900_s10 + $0x18] sm:$0xff] %v3917_v10  }
 0x1f2   : > { %3995 = vst [vmem:[%s5900_s10 + $0x10] sm:$0xff] %v3912_v40   ;;  %v3341_v42 = vadd.f32 %v4677_v22, %v3340_v35  ;;  %v3409_v45 = vadd.f32 %v3408_v39, %v3378_v11  ;;  %v4635_v51 = vpop.f32.mrb[8].mxu0 }
 0x1f3   : > { %v4681_v52 = vadd.f32 %v4635_v51, %v4395_v49  ;;  %v3049_v0 = vpop.f32.mrb[9].mxu0 }
 0x1f4   : > { %v3410_v34 = vadd.f32 %v3409_v45, %v3379_v28  ;;  %v4682_v54 = vadd.f32 %v3049_v0, %v1518_v59  ;;  %v3342_v12 = vadd.f32 %v4679_v14, %v3341_v42  ;;  %v4636_v18 = vpop.f32.mrb[10].mxu0 }
 0x1f5   : > { %v4683_v30 = vadd.f32 %v4636_v18, %v4396_v4  ;;  %v3052_v21 = vpop.f32.mrb[11].mxu0  ;;  %v3383_v49 = vmul.f32 %v4681_v52, %v4681_v52 }
 0x1f6   : > { %v3343_v60 = vadd.f32 %v4682_v54, %v3342_v12  ;;  %v3381_v24 = vmul.f32 %v4682_v54, %v4682_v54  ;;  %v3411_v29 = vadd.f32 %v3410_v34, %v3380_v41  ;;  %v4684_v2 = vadd.f32 %v3052_v21, %v1521_v43 }
 0x1f7   : > { %v3927_v27 = vpack.c.bf16 %v4683_v30, %v4681_v52  ;;  %v3384_v4 = vmul.f32 %v4683_v30, %v4683_v30 }
 0x1f8   : > { %v3412_v33 = vadd.f32 %v3411_v29, %v3381_v24  ;;  %v3922_v32 = vpack.c.bf16 %v4684_v2, %v4682_v54  ;;  %v3344_v57 = vadd.f32 %v4684_v2, %v3343_v60  ;;  %v3382_v6 = vmul.f32 %v4684_v2, %v4684_v2 }
 0x1f9   : > { %3998 = vst [vmem:[%s5900_s10 + $0x28] sm:$0xff] %v3927_v27  }
 0x1fa   : > { %3997 = vst [vmem:[%s5900_s10 + $0x20] sm:$0xff] %v3922_v32   ;;  %v3345_v7 = vadd.f32 %v4681_v52, %v3344_v57  ;;  %v3413_v38 = vadd.f32 %v3412_v33, %v3382_v6  ;;  %v4639_v59 = vpop.f32.mrb[12].mxu0 }
 0x1fb   : > { %v4685_v56 = vadd.f32 %v4639_v59, %v5887_v31  ;;  %v3065_v61 = vpop.f32.mrb[13].mxu0 }
 0x1fc   : > { %v3414_v44 = vadd.f32 %v3413_v38, %v3383_v49  ;;  %v4686_v46 = vadd.f32 %v3065_v61, %v5889_v36  ;;  %v3346_v43 = vadd.f32 %v4683_v30, %v3345_v7  ;;  %v4640_v9 = vpop.f32.mrb[14].mxu0 }
 0x1fd   : > { %v4687_v13 = vadd.f32 %v4640_v9, %v5891_v53  ;;  %v3068_v55 = vpop.f32.mrb[15].mxu0  ;;  %v3387_v25 = vmul.f32 %v4685_v56, %v4685_v56 }
 0x1fe   : > { %v3347_v37 = vadd.f32 %v4686_v46, %v3346_v43  ;;  %v3385_v58 = vmul.f32 %v4686_v46, %v4686_v46  ;;  %v3415_v62 = vadd.f32 %v3414_v44, %v3384_v4  ;;  %v4688_v48 = vadd.f32 %v3068_v55, %v5893_v5 }
 0x1ff   : > { %v3937_v47 = vpack.c.bf16 %v4687_v13, %v4685_v56  ;;  %v3388_v1 = vmul.f32 %v4687_v13, %v4687_v13 }
 0x200   : > { %v3416_v15 = vadd.f32 %v3415_v62, %v3385_v58  ;;  %v3932_v31 = vpack.c.bf16 %v4688_v48, %v4686_v46  ;;  %v3348_v3 = vadd.f32 %v4688_v48, %v3347_v37  ;;  %v3386_v22 = vmul.f32 %v4688_v48, %v4688_v48 }
 0x201   : > { %4000 = vst [vmem:[%s5900_s10 + $0x38] sm:$0xff] %v3937_v47   ;;  %v4451_v50 = vpop.f32.mrb[16].mxu1 }
 0x202   : > { %3999 = vst [vmem:[%s5900_s10 + $0x30] sm:$0xff] %v3932_v31   ;;  %v3349_v36 = vadd.f32 %v4685_v56, %v3348_v3  ;;  %v3417_v20 = vadd.f32 %v3416_v15, %v3386_v22  ;;  %v4643_v19 = vpop.f32.mrb[16].mxu0  ;;  %v1856_v8 = vpop.f32.mrb[17].mxu1 }
 0x203   : > { %v4689_v53 = vadd.f32 %v4643_v19, %v4451_v50  ;;  %v3081_v16 = vpop.f32.mrb[17].mxu0  ;;  %v4452_v14 = vpop.f32.mrb[18].mxu1 }
 0x204   : > { %v3418_v63 = vadd.f32 %v3417_v20, %v3387_v25  ;;  %v4690_v5 = vadd.f32 %v3081_v16, %v1856_v8  ;;  %v3350_v23 = vadd.f32 %v4687_v13, %v3349_v36  ;;  %v4644_v17 = vpop.f32.mrb[18].mxu0  ;;  %v1859_v26 = vpop.f32.mrb[19].mxu1 }
 0x205   : > { %v4691_v10 = vadd.f32 %v4644_v17, %v4452_v14  ;;  %v3084_v39 = vpop.f32.mrb[19].mxu0  ;;  %v3391_v34 = vmul.f32 %v4689_v53, %v4689_v53 }
 0x206   : > { %v3351_v40 = vadd.f32 %v4690_v5, %v3350_v23  ;;  %v3389_v35 = vmul.f32 %v4690_v5, %v4690_v5  ;;  %v3419_v11 = vadd.f32 %v3418_v63, %v3388_v1  ;;  %v4692_v28 = vadd.f32 %v3084_v39, %v1859_v26 }
 0x207   : > { %v3947_v42 = vpack.c.bf16 %v4691_v10, %v4689_v53  ;;  %v3392_v29 = vmul.f32 %v4691_v10, %v4691_v10 }
 0x208   : > { %v3420_v45 = vadd.f32 %v3419_v11, %v3389_v35  ;;  %v3942_v51 = vpack.c.bf16 %v4692_v28, %v4690_v5  ;;  %v3352_v52 = vadd.f32 %v4692_v28, %v3351_v40  ;;  %v3390_v0 = vmul.f32 %v4692_v28, %v4692_v28 }
 0x209   : > { %4002 = vst [vmem:[%s5900_s10 + $0x48] sm:$0xff] %v3947_v42   ;;  %v4455_v41 = vpop.f32.mrb[20].mxu1 }
 0x20a   : > { %4001 = vst [vmem:[%s5900_s10 + $0x40] sm:$0xff] %v3942_v51   ;;  %v3353_v54 = vadd.f32 %v4689_v53, %v3352_v52  ;;  %v3421_v12 = vadd.f32 %v3420_v45, %v3390_v0  ;;  %v4647_v18 = vpop.f32.mrb[20].mxu0  ;;  %v1872_v30 = vpop.f32.mrb[21].mxu1 }
 0x20b   : > { %v4693_v21 = vadd.f32 %v4647_v18, %v4455_v41  ;;  %v3097_v60 = vpop.f32.mrb[21].mxu0  ;;  %v4456_v24 = vpop.f32.mrb[22].mxu1 }
 0x20c   : > { %v3422_v2 = vadd.f32 %v3421_v12, %v3391_v34  ;;  %v4694_v27 = vadd.f32 %v3097_v60, %v1872_v30  ;;  %v3354_v33 = vadd.f32 %v4691_v10, %v3353_v54  ;;  %v4648_v32 = vpop.f32.mrb[22].mxu0  ;;  %v1875_v57 = vpop.f32.mrb[23].mxu1 }
 0x20d   : > { %v4695_v6 = vadd.f32 %v4648_v32, %v4456_v24  ;;  %v3100_v49 = vpop.f32.mrb[23].mxu0  ;;  %v3395_v13 = vmul.f32 %v4693_v21, %v4693_v21 }
 0x20e   : > { %v3355_v7 = vadd.f32 %v4694_v27, %v3354_v33  ;;  %v3393_v38 = vmul.f32 %v4694_v27, %v4694_v27  ;;  %v3423_v59 = vadd.f32 %v3422_v2, %v3392_v29  ;;  %v4696_v56 = vadd.f32 %v3100_v49, %v1875_v57 }
 0x20f   : > { %v3957_v61 = vpack.c.bf16 %v4695_v6, %v4693_v21  ;;  %v3396_v31 = vmul.f32 %v4695_v6, %v4695_v6 }
 0x210   : > { %v3424_v4 = vadd.f32 %v3423_v59, %v3393_v38  ;;  %v3952_v44 = vpack.c.bf16 %v4696_v56, %v4694_v27  ;;  %v3356_v46 = vadd.f32 %v4696_v56, %v3355_v7  ;;  %v3394_v43 = vmul.f32 %v4696_v56, %v4696_v56 }
 0x211   : > { %4004 = vst [vmem:[%s5900_s10 + $0x58] sm:$0xff] %v3957_v61   ;;  %v4459_v9 = vpop.f32.mrb[24].mxu1 }
 0x212   : > { %4003 = vst [vmem:[%s5900_s10 + $0x50] sm:$0xff] %v3952_v44   ;;  %v3357_v55 = vadd.f32 %v4693_v21, %v3356_v46  ;;  %v3425_v37 = vadd.f32 %v3424_v4, %v3394_v43  ;;  %v4651_v58 = vpop.f32.mrb[24].mxu0  ;;  %v1888_v62 = vpop.f32.mrb[25].mxu1  ;;  %v3442_v46 = vlaneseq }
 0x213   : > { %v4697_v48 = vadd.f32 %v4651_v58, %v4459_v9  ;;  %v3113_v47 = vpop.f32.mrb[25].mxu0  ;;  %v4460_v15 = vpop.f32.mrb[26].mxu1 }
 0x214   : > { %v3426_v3 = vadd.f32 %v3425_v37, %v3395_v13  ;;  %v4698_v22 = vadd.f32 %v3113_v47, %v1888_v62  ;;  %v3358_v50 = vadd.f32 %v4695_v6, %v3357_v55  ;;  %v4652_v25 = vpop.f32.mrb[26].mxu0  ;;  %v1891_v36 = vpop.f32.mrb[27].mxu1  ;;  %v3443_v37 = vshrl.u32 %v3442_v46, 7 }
 0x215   : > { %v4699_v20 = vadd.f32 %v4652_v25, %v4460_v15  ;;  %v3116_v19 = vpop.f32.mrb[27].mxu0  ;;  %v3399_v10 = vmul.f32 %v4697_v48, %v4697_v48 }
 0x216   : > { %v3359_v8 = vadd.f32 %v4698_v22, %v3358_v50  ;;  %v3397_v53 = vmul.f32 %v4698_v22, %v4698_v22  ;;  %v3427_v16 = vadd.f32 %v3426_v3, %v3396_v31  ;;  %v4700_v14 = vadd.f32 %v3116_v19, %v1891_v36 }
 0x217   : > { %v3967_v1 = vpack.c.bf16 %v4699_v20, %v4697_v48  ;;  %v3400_v51 = vmul.f32 %v4699_v20, %v4699_v20  ;;  %vm3445_vm0 = vcmp.eq.s32.totalorder %v3443_v37, 1  ;;  %vm3444_vm1 = vcmp.eq.s32.totalorder %v3443_v37, 0 }
 0x218   : > { %v3428_v63 = vadd.f32 %v3427_v16, %v3397_v53  ;;  %v3962_v5 = vpack.c.bf16 %v4700_v14, %v4698_v22  ;;  %v3360_v23 = vadd.f32 %v4700_v14, %v3359_v8  ;;  %v3398_v17 = vmul.f32 %v4700_v14, %v4700_v14 }
 0x219   : > { %4006 = vst [vmem:[%s5900_s10 + $0x68] sm:$0xff] %v3967_v1   ;;  %v4463_v26 = vpop.f32.mrb[28].mxu1 }
 0x21a   : > { %4005 = vst [vmem:[%s5900_s10 + $0x60] sm:$0xff] %v3962_v5   ;;  %v3361_v39 = vadd.f32 %v4697_v48, %v3360_v23  ;;  %v3429_v40 = vadd.f32 %v3428_v63, %v3398_v17  ;;  %v4655_v35 = vpop.f32.mrb[28].mxu0  ;;  %v1904_v11 = vpop.f32.mrb[29].mxu1 }
 0x21b   : > { %v4701_v28 = vadd.f32 %v4655_v35, %v4463_v26  ;;  %v3129_v42 = vpop.f32.mrb[29].mxu0  ;;  %v4464_v45 = vpop.f32.mrb[30].mxu1 }
 0x21c   : > { %v3430_v52 = vadd.f32 %v3429_v40, %v3399_v10  ;;  %v4702_v0 = vadd.f32 %v3129_v42, %v1904_v11  ;;  %v3362_v41 = vadd.f32 %v4699_v20, %v3361_v39  ;;  %v4656_v34 = vpop.f32.mrb[30].mxu0  ;;  %v1907_v54 = vpop.f32.mrb[31].mxu1 }
 0x21d   : > { %v4703_v12 = vadd.f32 %v4656_v34, %v4464_v45  ;;  %v3132_v18 = vpop.f32.mrb[31].mxu0  ;;  %v3403_v57 = vmul.f32 %v4701_v28, %v4701_v28 }
 0x21e   : > { %v3363_v30 = vadd.f32 %v4702_v0, %v3362_v41  ;;  %v3401_v21 = vmul.f32 %v4702_v0, %v4702_v0  ;;  %v3431_v60 = vadd.f32 %v3430_v52, %v3400_v51  ;;  %v4704_v24 = vadd.f32 %v3132_v18, %v1907_v54 }
 0x21f   : > { %v3977_v29 = vpack.c.bf16 %v4703_v12, %v4701_v28  ;;  %v3404_v7 = vmul.f32 %v4703_v12, %v4703_v12 }
 0x220   : > { %v3432_v2 = vadd.f32 %v3431_v60, %v3401_v21  ;;  %v3972_v27 = vpack.c.bf16 %v4704_v24, %v4702_v0  ;;  %v3364_v33 = vadd.f32 %v4704_v24, %v3363_v30  ;;  %v3402_v32 = vmul.f32 %v4704_v24, %v4704_v24 }
 0x221   : > { %4008 = vst [vmem:[%s5900_s10 + $0x78] sm:$0xff] %v3977_v29  }
 0x222   : > { %4007 = vst [vmem:[%s5900_s10 + $0x70] sm:$0xff] %v3972_v27   ;;  %v3365_v6 = vadd.f32 %v4701_v28, %v3364_v33  ;;  %v3433_v49 = vadd.f32 %v3432_v2, %v3402_v32 }
 0x224   : > { %v3366_v38 = vadd.f32 %v4703_v12, %v3365_v6  ;;  %v3434_v59 = vadd.f32 %v3433_v49, %v3403_v57 }
 0x226   : > { %v3367_v56 = vrot.slane %v3366_v38, 4  ;;  %v3435_v61 = vadd.f32 %v3434_v59, %v3404_v7 }
 0x228   : > { %v3368_v4 = vadd.f32 %v3367_v56, %v3366_v38  ;;  %v3436_v44 = vrot.slane %v3435_v61, 4 }
 0x22a   : > { %v3369_v43 = vrot.slane %v3368_v4, 2  ;;  %v3437_v9 = vadd.f32 %v3436_v44, %v3435_v61 }
 0x22c   : > { %v3370_v13 = vadd.f32 %v3369_v43, %v3368_v4  ;;  %v3438_v55 = vrot.slane %v3437_v9, 2 }
 0x22e   : > { %v3439_v58 = vadd.f32 %v3438_v55, %v3437_v9  ;;  %v3371_v62 = vrot.slane %v3370_v13, 1 }
 0x230   : > { %v3440_v48 = vrot.slane %v3439_v58, 1  ;;  %v3372_v15 = vadd.f32 %v3371_v62, %v3370_v13 }
 0x232   : > { %v3441_v47 = vadd.f32 %v3440_v48, %v3439_v58 }
 0x234   : > { %v3446_v31 = vsel %vm3445_vm0, %v3441_v47, 0.0 }
 0x235   : > { %v3447_v3 = vsel %vm3444_vm1, %v3372_v15, %v3446_v31 }
 0x236   : > { %3448 = vst [vmem:[%s226_s12] sm:$0xff] %v3447_v3 }
 0x237   : > { %5063 = shalt.err (!%p5060_p3)
}
 0x238   : > { %s5064_s30 = scalar_lea.hbm %s5927_s14, 128  ;;  %s5068_s10 = scalar_lea.hbm %s5974_s5, 256 }
 0x239   : > { %p5065_p4 = scmp.ne.s32.totalorder %s5927_s14, %s5064_s30  ;;  %p5069_p9 = scmp.lt.u32.totalorder %s5927_s14, %s5974_s5 }
 0x23a   : > { %p5070_p10 = scmp.lt.u32.totalorder %s5068_s10, %s5064_s30  ;;  %p5072_p12 = scmp.lt.u32.totalorder %s5064_s30, %s5927_s14 }
 0x23b   : > { %p5066_p7 = pnand %p5065_p4, %p5184_p5 }
 0x23c   : > { %p5071_p11 = por %p5070_p10, %p5069_p9 }
 0x23d   : > { %p5067_p8 = pneg %p5066_p7 }
 0x23e   : > { %p5073_p13 = por %p5072_p12, %p5071_p11 }
 0x240   : > { %p5074_p0 = pnand %p5073_p13, %p5067_p8 }
 0x242   : > { %5077 = shalt.err (!%p5074_p0)
}
 0x243   : > { %4929 = dma.vmem_to_hbm [thread:$0]  (%p5184_p5), %s5929_s13, 128, %s5927_s14, %s3455_s17  }
 0x244 PF: > { %p4935_p1 = scmp.ge.s32.totalorder %s5112_s21, 2  ;;  %s3492_s11 = sand.u32 1, %s5100_s18  }
 0x245   : > { %s3493_s12 = scalar_lea.sflag [#allocation4], %s3492_s11 }
 0x246   : > { %p4932_p2 = pnand %p4935_p1, %p5188_p6 }
 0x248   : > { %5095 = dma.done.wait (!%p4932_p2), %s3493_s12, 128  }
 0x249   : > { %5097 = vsyncadd (!%p4932_p2), %s3493_s12, 4294967168  ;;  %p16_p3 = scmp.ge.s32.totalorder %s5171_s24, 4   ;;  %s5977_s18 = smov %s5104_s19 }
 0x24a   : > { %s5978_s19 = smov %s5108_s20  ;;  %s5979_s20 = smov %s5182_s27 }
 0x24b   : > { %s5980_s21 = smov %s5171_s24  ;;  %18 = sbr.rel (!%p16_p3) target bundleno = 3 (0x3), region = 94 }
 0x252   :  { %3498 = vsyncpa [#allocation4], 1 }
 0x253   :  { %3500 = vsyncpa [#allocation4 + $0x1], 1 }

</bundles_post_ra>
